<compile_context>
chip_gen: v7x
topology: tpu7x:2x2x1
jax: 0.10.0
libtpu: 0.0.40
codegen_flags: <defaults>
</compile_context>

<pallas_src>
import math
from functools import partial

import jax
import jax.numpy as jnp
from jax.experimental import pallas as pl
from jax.experimental.pallas import tpu as pltpu


# -----------------------------------------------------------------------------
# Generation-aware VMEM budget & tile targets.
#   v5e/v6e: 128 MiB physical -> ~96 MiB scoped budget, bigger row tiles.
#   v7x:      64 MiB physical -> ~48 MiB scoped budget, smaller tiles.
# -----------------------------------------------------------------------------
def _detect_vmem_limit():
    try:
        info = pltpu.get_tpu_info()
        cap = getattr(info, "vmem_capacity_bytes", None)
        if cap:
            return max(32 << 20, (int(cap) * 3) // 4)
    except Exception:
        pass
    return 48 << 20


VMEM_LIMIT = _detect_vmem_limit()
_LARGE_VMEM = VMEM_LIMIT >= (64 << 20)

LN_TM = 1024 if _LARGE_VMEM else 512      # mem-bound row kernels: big tiles
FFN_TM = 512 if _LARGE_VMEM else 256
PROJ_TM = 512 if _LARGE_VMEM else 256
ATTN_TQ = 256 if _LARGE_VMEM else 128

NEG_INF = -1e30  # finite large-negative mask (avoids NaN on fully-masked rows)


def _pick_tile(dim, target):
    """Largest 'nice' tile <= target that divides dim (falls back to full dim)."""
    if dim <= target:
        return dim
    for t in (target, target // 2, target // 4, 1024, 512, 256, 128, 64, 32, 16, 8):
        if 0 < t <= target and dim % t == 0:
            return t
    return dim


def _row_tiles(M, target):
    """Pick a row tile and (possibly padded) row count.

    Prefers an exact divisor of M; otherwise pads M up to a multiple of an
    8-aligned tile so we never fall back to one whole-array block.
    """
    if M <= target:
        return M, M
    for t in (target, target // 2, target // 4, 1024, 512, 256, 128, 64, 32, 16, 8):
        if 0 < t <= target and M % t == 0:
            return t, M
    tm = max(8, (target // 8) * 8)
    Mp = ((M + tm - 1) // tm) * tm
    return tm, Mp


# -----------------------------------------------------------------------------
# Fused multi-projection kernels:  y_j = (x * mask) @ W_j + b_j  for j = 1..n
#   Single-pass variant: no K grid axis, weights VMEM-resident (constant index
#   map), no accumulator scratch.  K-split variant: "arbitrary" reduction axis
#   with f32 VMEM accumulators for very large K / weight sets.
# -----------------------------------------------------------------------------
def _multi_proj_single_kernel(x_ref, *refs, n, apply_mask):
    off = 1 if apply_mask else 0
    w_refs = refs[off:off + n]
    b_refs = refs[off + n:off + 2 * n]
    o_refs = refs[off + 2 * n:off + 3 * n]

    x = x_ref[...]
    if apply_mask:
        x = x * refs[0][...].astype(x.dtype)
    x = x.astype(jnp.bfloat16)
    for w_ref, b_ref, o_ref in zip(w_refs, b_refs, o_refs):
        o_ref[...] = (jnp.dot(x, w_ref[...].astype(jnp.bfloat16),
                              preferred_element_type=jnp.float32)
                      + b_ref[...]).astype(o_ref.dtype)


def _multi_proj_ksplit_kernel(x_ref, *refs, n, apply_mask):
    off = 1 if apply_mask else 0
    w_refs = refs[off:off + n]
    b_refs = refs[off + n:off + 2 * n]
    o_refs = refs[off + 2 * n:off + 3 * n]
    acc_refs = refs[off + 3 * n:off + 4 * n]

    kk = pl.program_id(1)

    @pl.when(kk == 0)
    def _():
        for acc in acc_refs:
            acc[...] = jnp.zeros_like(acc)

    x = x_ref[...]
    if apply_mask:
        x = x * refs[0][...].astype(x.dtype)
    x = x.astype(jnp.bfloat16)
    for w_ref, acc in zip(w_refs, acc_refs):
        acc[...] += jnp.dot(x, w_ref[...].astype(jnp.bfloat16),
                            preferred_element_type=jnp.float32)

    @pl.when(kk == pl.num_programs(1) - 1)
    def _():
        for b_ref, o_ref, acc in zip(b_refs, o_refs, acc_refs):
            o_ref[...] = (acc[...] + b_ref[...]).astype(o_ref.dtype)


def fused_linears(x2d, weights, biases, mask2d=None, *,
                  tm_target=None, tk_target=512, out_dtype=jnp.bfloat16):
    """x2d: (M, K).  weights[j]: (K, N_j) bf16.  biases[j]: (N_j,).  mask2d: (M,1) or None."""
    M, K = x2d.shape
    n = len(weights)
    tm_target = PROJ_TM if tm_target is None else tm_target
    tm, Mp = _row_tiles(M, tm_target)
    if Mp != M:
        x2d = jnp.pad(x2d, ((0, Mp - M), (0, 0)))
        if mask2d is not None:
            mask2d = jnp.pad(mask2d, ((0, Mp - M), (0, 0)))
    apply_mask = mask2d is not None

    # Single-pass (VMEM-resident weights) whenever the estimated residency fits.
    wbytes = sum(K * w.shape[1] * 2 for w in weights)               # bf16 weights
    est = (2 * tm * K * x2d.dtype.itemsize                          # x tiles (2-buf)
           + 2 * wbytes                                             # weight blocks
           + 2 * sum(tm * w.shape[1] * 2 for w in weights)          # output tiles
           + sum(tm * w.shape[1] * 4 for w in weights))             # temps headroom
    single = est <= int(VMEM_LIMIT * 0.6)
    tk = K if single else _pick_tile(K, tk_target)

    mask_args = [mask2d] if apply_mask else []
    bias_args = [b.reshape(1, -1).astype(jnp.float32) for b in biases]
    out_shape = tuple(jax.ShapeDtypeStruct((Mp, w.shape[1]), out_dtype) for w in weights)

    if tk == K:
        in_specs = [pl.BlockSpec((tm, K), lambda i: (i, 0))]
        if apply_mask:
            in_specs.append(pl.BlockSpec((tm, 1), lambda i: (i, 0)))
        for w in weights:
            in_specs.append(pl.BlockSpec((K, w.shape[1]), lambda i: (0, 0)))
        for w in weights:
            in_specs.append(pl.BlockSpec((1, w.shape[1]), lambda i: (0, 0)))
        out_specs = tuple(pl.BlockSpec((tm, w.shape[1]), lambda i: (i, 0)) for w in weights)
        outs = pl.pallas_call(
            partial(_multi_proj_single_kernel, n=n, apply_mask=apply_mask),
            grid=(Mp // tm,),
            in_specs=in_specs, out_specs=out_specs, out_shape=out_shape,
            compiler_params=pltpu.CompilerParams(
                dimension_semantics=("parallel",), vmem_limit_bytes=VMEM_LIMIT),
        )(x2d, *mask_args, *weights, *bias_args)
    else:
        in_specs = [pl.BlockSpec((tm, tk), lambda i, kk: (i, kk))]
        if apply_mask:
            in_specs.append(pl.BlockSpec((tm, 1), lambda i, kk: (i, 0)))
        for w in weights:
            in_specs.append(pl.BlockSpec((tk, w.shape[1]), lambda i, kk: (kk, 0)))
        for w in weights:
            in_specs.append(pl.BlockSpec((1, w.shape[1]), lambda i, kk: (0, 0)))
        out_specs = tuple(pl.BlockSpec((tm, w.shape[1]), lambda i, kk: (i, 0)) for w in weights)
        scratch = [pltpu.VMEM((tm, w.shape[1]), jnp.float32) for w in weights]
        outs = pl.pallas_call(
            partial(_multi_proj_ksplit_kernel, n=n, apply_mask=apply_mask),
            grid=(Mp // tm, K // tk),
            in_specs=in_specs, out_specs=out_specs, out_shape=out_shape,
            scratch_shapes=scratch,
            compiler_params=pltpu.CompilerParams(
                dimension_semantics=("parallel", "arbitrary"),
                vmem_limit_bytes=VMEM_LIMIT),
        )(x2d, *mask_args, *weights, *bias_args)

    if not isinstance(outs, (list, tuple)):
        outs = (outs,)
    if Mp != M:
        outs = tuple(o[:M] for o in outs)
    return tuple(outs)


# -----------------------------------------------------------------------------
# Fused (optional mask) + residual-add + LayerNorm kernel (eps=1e-5)
# -----------------------------------------------------------------------------
def _add_ln_kernel(x_ref, y_ref, *refs, apply_mask):
    if apply_mask:
        m_ref, g_ref, b_ref, o_ref = refs
    else:
        g_ref, b_ref, o_ref = refs
    x = x_ref[...].astype(jnp.float32)
    if apply_mask:
        x = x * m_ref[...]
    s = x + y_ref[...].astype(jnp.float32)
    mu = jnp.mean(s, axis=-1, keepdims=True)
    var = jnp.mean(jnp.square(s - mu), axis=-1, keepdims=True)
    o_ref[...] = ((s - mu) * jax.lax.rsqrt(var + 1e-5) * g_ref[...]
                  + b_ref[...]).astype(o_ref.dtype)


def add_layer_norm(x, y, gamma, beta, xmask=None, *, tm_target=None,
                   out_dtype=jnp.bfloat16):
    """LayerNorm(x * xmask + y) over the last dim.  x, y: (B, S, D)."""
    B, S, D = x.shape
    M = B * S
    tm, Mp = _row_tiles(M, LN_TM if tm_target is None else tm_target)
    x2 = x.reshape(M, D)
    y2 = y.reshape(M, D)
    m2 = None if xmask is None else xmask.astype(jnp.float32).reshape(M, 1)
    if Mp != M:
        x2 = jnp.pad(x2, ((0, Mp - M), (0, 0)))
        y2 = jnp.pad(y2, ((0, Mp - M), (0, 0)))
        if m2 is not None:
            m2 = jnp.pad(m2, ((0, Mp - M), (0, 0)))
    apply_mask = m2 is not None

    in_specs = [pl.BlockSpec((tm, D), lambda i: (i, 0)),
                pl.BlockSpec((tm, D), lambda i: (i, 0))]
    args = [x2, y2]
    if apply_mask:
        in_specs.append(pl.BlockSpec((tm, 1), lambda i: (i, 0)))
        args.append(m2)
    in_specs += [pl.BlockSpec((1, D), lambda i: (0, 0)),
                 pl.BlockSpec((1, D), lambda i: (0, 0))]
    args += [gamma.reshape(1, D), beta.reshape(1, D)]

    out = pl.pallas_call(
        partial(_add_ln_kernel, apply_mask=apply_mask),
        grid=(Mp // tm,),
        in_specs=in_specs,
        out_specs=pl.BlockSpec((tm, D), lambda i: (i, 0)),
        out_shape=jax.ShapeDtypeStruct((Mp, D), out_dtype),
        compiler_params=pltpu.CompilerParams(
            dimension_semantics=("parallel",), vmem_limit_bytes=VMEM_LIMIT),
    )(*args)
    if Mp != M:
        out = out[:M]
    return out.reshape(B, S, D)


# -----------------------------------------------------------------------------
# Position-wise FFN: relu(x @ Wa + ba) @ Wb + bb.
#   Rows tiled ("parallel"); hidden dim tiled ("arbitrary") with f32 accumulator
#   so Wa/Wb residency stays bounded on v7x's 64 MiB VMEM.
# -----------------------------------------------------------------------------
def _ffn_kernel(x_ref, wa_ref, ba_ref, wb_ref, bb_ref, o_ref, acc_ref):
    dh = pl.program_id(1)

    @pl.when(dh == 0)
    def _():
        acc_ref[...] = jnp.zeros_like(acc_ref)

    x = x_ref[...].astype(jnp.bfloat16)
    h = jnp.dot(x, wa_ref[...].astype(jnp.bfloat16),
                preferred_element_type=jnp.float32) + ba_ref[...]
    h = jnp.maximum(h, 0.0)
    # NOTE: hidden cast to bf16 for the second MXU matmul (precision trade-off).
    acc_ref[...] += jnp.dot(h.astype(jnp.bfloat16), wb_ref[...].astype(jnp.bfloat16),
                            preferred_element_type=jnp.float32)

    @pl.when(dh == pl.num_programs(1) - 1)
    def _():
        o_ref[...] = (acc_ref[...] + bb_ref[...]).astype(o_ref.dtype)


def feed_forward(x, wa, ba, wb, bb, *, tm_target=None, tdh_target=2048,
                 out_dtype=jnp.bfloat16):
    B, S, D = x.shape
    M = B * S
    Dh = wa.shape[1]
    tm, Mp = _row_tiles(M, FFN_TM if tm_target is None else tm_target)
    x2 = x.reshape(M, D)
    if Mp != M:
        x2 = jnp.pad(x2, ((0, Mp - M), (0, 0)))

    est = (2 * tm * D * x2.dtype.itemsize + 2 * (D * Dh + Dh * D) * 2
           + tm * Dh * 4 + 4 * tm * D * 4)
    tdh = Dh if est <= int(VMEM_LIMIT * 0.5) else _pick_tile(Dh, tdh_target)

    out = pl.pallas_call(
        _ffn_kernel,
        grid=(Mp // tm, Dh // tdh),
        in_specs=[
            pl.BlockSpec((tm, D), lambda i, dh: (i, 0)),
            pl.BlockSpec((D, tdh), lambda i, dh: (0, dh)),
            pl.BlockSpec((1, tdh), lambda i, dh: (0, dh)),
            pl.BlockSpec((tdh, D), lambda i, dh: (dh, 0)),
            pl.BlockSpec((1, D), lambda i, dh: (0, 0)),
        ],
        out_specs=pl.BlockSpec((tm, D), lambda i, dh: (i, 0)),
        out_shape=jax.ShapeDtypeStruct((Mp, D), out_dtype),
        scratch_shapes=[pltpu.VMEM((tm, D), jnp.float32)],
        compiler_params=pltpu.CompilerParams(
            dimension_semantics=("parallel", "arbitrary"),
            vmem_limit_bytes=VMEM_LIMIT),
    )(x2, wa, ba.reshape(1, Dh), wb, bb.reshape(1, D))
    if Mp != M:
        out = out[:M]
    return out.reshape(B, S, D)


# -----------------------------------------------------------------------------
# Multi-head attention kernel: grid = (batch, Sq tiles), all heads processed
# in-kernel from the (S, H*d) layout, key/causal masks built in-kernel, per-head
# context written to a (tq, H*dv) VMEM scratch and projected with ONE full-depth
# matmul (+bias) in the epilogue.
# -----------------------------------------------------------------------------
def _attn_kernel(q_ref, k_ref, v_ref, m_ref, wo_ref, bo_ref, o_ref, ctx_ref,
                 *, H, dk, dv, scale, causal, sq_total):
    tq = q_ref.shape[0]
    Sk = k_ref.shape[0]

    # additive bias from key padding mask (1 keep / 0 drop) + in-kernel causal mask
    keymask = m_ref[...]                               # (1, Sk) f32
    bias = jnp.where(keymask > 0.0, 0.0, NEG_INF)
    if causal:
        q_start = pl.program_id(1) * tq
        rows = jax.lax.broadcasted_iota(jnp.int32, (tq, Sk), 0) + q_start
        cols = jax.lax.broadcasted_iota(jnp.int32, (tq, Sk), 1)
        # reference: tril(ones(Sk, Sk))[-Sq:, :]  ==  col <= row + (Sk - Sq)
        bias = jnp.where(cols <= rows + (Sk - sq_total), bias, NEG_INF)

    # Static unroll over heads (H is small); per-head temporaries die each iter
    # because the context lands in VMEM scratch, not a growing live value.
    for h in range(H):
        qh = q_ref[:, h * dk:(h + 1) * dk].astype(jnp.bfloat16)   # (tq, dk)
        kh = k_ref[:, h * dk:(h + 1) * dk].astype(jnp.bfloat16)   # (Sk, dk)
        vh = v_ref[:, h * dv:(h + 1) * dv].astype(jnp.bfloat16)   # (Sk, dv)
        # contract last dims directly -> no explicit transpose of K
        s = jax.lax.dot_general(qh, kh, (((1,), (1,)), ((), ())),
                                preferred_element_type=jnp.float32) * scale + bias
        mx = jnp.max(s, axis=-1, keepdims=True)
        p = jnp.exp(s - mx)
        l = jnp.sum(p, axis=-1, keepdims=True)
        # approx reciprocal (~1e-3 rel err); use approx=False for strict parity
        p = p * pl.reciprocal(l, approx=True)
        ctx_ref[:, h * dv:(h + 1) * dv] = jnp.dot(
            p.astype(jnp.bfloat16), vh,
            preferred_element_type=jnp.float32).astype(ctx_ref.dtype)

    # single full-contraction-depth output projection
    o_ref[...] = (jnp.dot(ctx_ref[...], wo_ref[...].astype(jnp.bfloat16),
                          preferred_element_type=jnp.float32)
                  + bo_ref[...]).astype(o_ref.dtype)


def attention(q3, k3, v3, keymask, o_w, o_b, *, H, dk, dv, scale, causal, out_dim):
    """q3:(B,Sq,H*dk) k3:(B,Sk,H*dk) v3:(B,Sk,H*dv) keymask:(B,1,Sk) -> (B,Sq,out_dim) bf16."""
    B, Sq, Hdk = q3.shape
    Sk = k3.shape[1]
    Hdv = v3.shape[2]
    tq = _pick_tile(Sq, ATTN_TQ)
    # TODO(synk): for long Sk, add an "arbitrary" KV grid axis with flash-style
    #             online softmax instead of holding the whole (Sk, H*d) block.
    kern = partial(_attn_kernel, H=H, dk=dk, dv=dv, scale=scale, causal=causal,
                   sq_total=Sq)
    return pl.pallas_call(
        kern,
        grid=(B, Sq // tq),
        in_specs=[
            pl.BlockSpec((None, tq, Hdk), lambda b, qi: (b, qi, 0)),
            pl.BlockSpec((None, Sk, Hdk), lambda b, qi: (b, 0, 0)),
            pl.BlockSpec((None, Sk, Hdv), lambda b, qi: (b, 0, 0)),
            pl.BlockSpec((None, 1, Sk), lambda b, qi: (b, 0, 0)),
            pl.BlockSpec((Hdv, out_dim), lambda b, qi: (0, 0)),   # resident across grid
            pl.BlockSpec((1, out_dim), lambda b, qi: (0, 0)),
        ],
        out_specs=pl.BlockSpec((None, tq, out_dim), lambda b, qi: (b, qi, 0)),
        out_shape=jax.ShapeDtypeStruct((B, Sq, out_dim), jnp.bfloat16),
        scratch_shapes=[pltpu.VMEM((tq, Hdv), jnp.bfloat16)],
        compiler_params=pltpu.CompilerParams(
            dimension_semantics=("parallel", "parallel"),
            vmem_limit_bytes=VMEM_LIMIT),
    )(q3, k3, v3, keymask, o_w, o_b.reshape(1, out_dim))


# -----------------------------------------------------------------------------
# Model glue (plain JAX only for cheap reshape plumbing)
# -----------------------------------------------------------------------------
def multi_head_attention(p, x, numheads, kv=None, mask=None, premask=None,
                         causal=False, scale=True):
    """MultiHeadAttention.forward.  x: (B, Sq, D); kv (ctx) optional: (B, Sk, D).

    `mask` is the key-side padding mask; `premask` (if given) is multiplied into
    x inside the Q/K/V projection kernel (fusing the block-entry x*mask)."""
    B, Sq, D = x.shape
    H = numheads
    Hdk = p["q_w"].shape[1]
    Hdv = p["v_w"].shape[1]
    dk = Hdk // H
    dv = Hdv // H

    x2d = x.reshape(B * Sq, D)
    pm2d = None if premask is None else premask.astype(jnp.float32).reshape(B * Sq, 1)
    if kv is None:
        Sk = Sq
        q2, k2, v2 = fused_linears(
            x2d,
            [p["q_w"], p["k_w"], p["v_w"]],
            [p["q_b"], p["k_b"], p["v_b"]],
            mask2d=pm2d)
    else:
        Sk = kv.shape[1]
        ctx2d = kv.reshape(B * Sk, D)
        (q2,) = fused_linears(x2d, [p["q_w"]], [p["q_b"]], mask2d=pm2d)
        k2, v2 = fused_linears(ctx2d, [p["k_w"], p["v_w"]], [p["k_b"], p["v_b"]])

    q3 = q2.reshape(B, Sq, Hdk)
    k3 = k2.reshape(B, Sk, Hdk)
    v3 = v2.reshape(B, Sk, Hdv)

    if mask is None:
        keymask = jnp.ones((B, 1, Sk), jnp.float32)
    else:
        keymask = mask.astype(jnp.float32).reshape(B, 1, Sk)

    scale_val = (1.0 / math.sqrt(dk)) if scale else 1.0
    return attention(q3, k3, v3, keymask, p["o_w"], p["o_b"],
                     H=H, dk=dk, dv=dv, scale=scale_val, causal=causal, out_dim=D)


def encoder_block(p, x, numheads, mask=None):
    # entry x*mask fused into the QKV projection and the residual LN kernel
    a = multi_head_attention(p["attn"], x, numheads, mask=mask, premask=mask,
                             causal=False)
    n = add_layer_norm(x, a, p["ln_slf_g"], p["ln_slf_b"], xmask=mask)
    m = feed_forward(n, p["ffn_wa"], p["ffn_ba"], p["ffn_wb"], p["ffn_bb"])
    h = add_layer_norm(n, m, p["ln_ff_g"], p["ln_ff_b"])
    return h


def decoder_block(p, x, ctx, numheads, mask=None, ctxmask=None):
    a = multi_head_attention(p["slf_attn"], x, numheads, mask=mask, premask=mask,
                             causal=True)
    na = add_layer_norm(x, a, p["ln_slf_g"], p["ln_slf_b"], xmask=mask)
    b = multi_head_attention(p["ctx_attn"], na, numheads, kv=ctx,
                             mask=ctxmask, causal=False)
    nb = add_layer_norm(na, b, p["ln_ctx_g"], p["ln_ctx_b"])
    m = feed_forward(nb, p["ffn_wa"], p["ffn_ba"], p["ffn_wb"], p["ffn_bb"])
    h = add_layer_norm(nb, m, p["ln_ff_g"], p["ln_ff_b"])
    return h


def encoder_forward(p, x, numheads, mask=None):
    S = x.shape[1]
    h = x + p["posemb"][:S][None, :, :]
    for lp in p["layers"]:
        h = encoder_block(lp, h, numheads, mask=mask)
    return h


def decoder_forward(p, y, ctx, numheads, mask=None, ctxmask=None):
    S = y.shape[1]
    h = y + p["posemb"][:S][None, :, :]
    for lp in p["layers"]:
        h = decoder_block(lp, h, ctx, numheads, mask=mask, ctxmask=ctxmask)
    return h


def ts2s_forward(params, x, y, xmask, ymask, numheads):
    ctx = encoder_forward(params["enc"], x, numheads, mask=xmask)
    out = decoder_forward(params["dec"], y, ctx, numheads, mask=ymask, ctxmask=xmask)
    return out


# -----------------------------------------------------------------------------
# Deterministic parameter initialization (shapes from the PyTorch __init__).
# Matmul weights stored bf16 (MXU-native operands, half the HBM traffic);
# biases / LayerNorm params / position embeddings stay f32.
# -----------------------------------------------------------------------------
def _init_mha(key, indim, numheads):
    dk = indim // numheads
    dv = indim // numheads
    k0, k1, k2, k3 = jax.random.split(key, 4)
    std_qk = math.sqrt(2.0 / (indim + dk))
    std_v = math.sqrt(2.0 / (indim + dv))
    std_o = math.sqrt(2.0 / (numheads * dv + indim))  # xavier normal
    return {
        "q_w": (std_qk * jax.random.normal(k0, (indim, numheads * dk), jnp.float32)).astype(jnp.bfloat16),
        "q_b": jnp.zeros((numheads * dk,), jnp.float32),
        "k_w": (std_qk * jax.random.normal(k1, (indim, numheads * dk), jnp.float32)).astype(jnp.bfloat16),
        "k_b": jnp.zeros((numheads * dk,), jnp.float32),
        "v_w": (std_v * jax.random.normal(k2, (indim, numheads * dv), jnp.float32)).astype(jnp.bfloat16),
        "v_b": jnp.zeros((numheads * dv,), jnp.float32),
        "o_w": (std_o * jax.random.normal(k3, (numheads * dv, indim), jnp.float32)).astype(jnp.bfloat16),
        "o_b": jnp.zeros((indim,), jnp.float32),
    }


def _init_ffn(key, indim):
    dh = 4 * indim
    ka, kb = jax.random.split(key)
    std = math.sqrt(2.0 / (indim + dh))
    return {
        "ffn_wa": (std * jax.random.normal(ka, (indim, dh), jnp.float32)).astype(jnp.bfloat16),
        "ffn_ba": jnp.zeros((dh,), jnp.float32),
        "ffn_wb": (std * jax.random.normal(kb, (dh, indim), jnp.float32)).astype(jnp.bfloat16),
        "ffn_bb": jnp.zeros((indim,), jnp.float32),
    }


def _init_enc_block(key, dim, numheads):
    ka, kf = jax.random.split(key)
    p = {"attn": _init_mha(ka, dim, numheads)}
    p.update(_init_ffn(kf, dim))
    p.update({
        "ln_slf_g": jnp.ones((dim,), jnp.float32), "ln_slf_b": jnp.zeros((dim,), jnp.float32),
        "ln_ff_g": jnp.ones((dim,), jnp.float32), "ln_ff_b": jnp.zeros((dim,), jnp.float32),
    })
    return p


def _init_dec_block(key, dim, numheads):
    ks, kc, kf = jax.random.split(key, 3)
    p = {"slf_attn": _init_mha(ks, dim, numheads),
         "ctx_attn": _init_mha(kc, dim, numheads)}
    p.update(_init_ffn(kf, dim))
    p.update({
        "ln_slf_g": jnp.ones((dim,), jnp.float32), "ln_slf_b": jnp.zeros((dim,), jnp.float32),
        "ln_ctx_g": jnp.ones((dim,), jnp.float32), "ln_ctx_b": jnp.zeros((dim,), jnp.float32),
        "ln_ff_g": jnp.ones((dim,), jnp.float32), "ln_ff_b": jnp.zeros((dim,), jnp.float32),
    })
    return p


def init_ts2s_params(key, dim, numheads, numlayers, maxlen):
    ke, kd, kpe, kpd = jax.random.split(key, 4)
    enc_layer_keys = jax.random.split(ke, numlayers)
    dec_layer_keys = jax.random.split(kd, numlayers)
    return {
        "enc": {
            "posemb": 0.1 * jax.random.normal(kpe, (maxlen, dim), jnp.float32),
            "layers": [_init_enc_block(k, dim, numheads) for k in enc_layer_keys],
        },
        "dec": {
            "posemb": 0.1 * jax.random.normal(kpd, (maxlen, dim), jnp.float32),
            "layers": [_init_dec_block(k, dim, numheads) for k in dec_layer_keys],
        },
    }


# -----------------------------------------------------------------------------
# Main
# -----------------------------------------------------------------------------
if __name__ == "__main__":
    B, S_ENC, S_DEC, DIM, HEADS, LAYERS, MAXLEN = 2, 8, 8, 32, 4, 2, 16

    key = jax.random.PRNGKey(0)
    kp, kx, ky = jax.random.split(key, 3)

    params = init_ts2s_params(kp, DIM, HEADS, LAYERS, MAXLEN)
    x = jax.random.normal(kx, (B, S_ENC, DIM), jnp.float32)   # encoder input vectors
    y = jax.random.normal(ky, (B, S_DEC, DIM), jnp.float32)   # decoder input vectors
    xmask = jnp.ones((B, S_ENC), jnp.float32).at[1, -1].set(0.0)  # key-side mask on ctx
    ymask = jnp.ones((B, S_DEC), jnp.float32)

    fwd = jax.jit(lambda xx, yy, xm, ym: ts2s_forward(params, xx, yy, xm, ym, numheads=HEADS))
    out = jax.block_until_ready(fwd(x, y, xmask, ymask))

    assert out.shape == (B, S_DEC, DIM), out.shape
    assert bool(jnp.all(jnp.isfinite(out.astype(jnp.float32))))
    print("KERNEL_OK")
</pallas_src>

<mosaic_0001>
module attributes {stable_mosaic.version = 11 : i64} {
  func.func @_multi_proj_single_kernel(%arg0: i32, %arg1: memref<16x32xf32, #tpu.memory_space<vmem>>, %arg2: memref<16x1xf32, #tpu.memory_space<vmem>>, %arg3: memref<32x32xbf16, #tpu.memory_space<vmem>>, %arg4: memref<32x32xbf16, #tpu.memory_space<vmem>>, %arg5: memref<32x32xbf16, #tpu.memory_space<vmem>>, %arg6: memref<1x32xf32, #tpu.memory_space<vmem>>, %arg7: memref<1x32xf32, #tpu.memory_space<vmem>>, %arg8: memref<1x32xf32, #tpu.memory_space<vmem>>, %arg9: memref<16x32xbf16, #tpu.memory_space<vmem>>, %arg10: memref<16x32xbf16, #tpu.memory_space<vmem>>, %arg11: memref<16x32xbf16, #tpu.memory_space<vmem>>) attributes {dimension_semantics = [#tpu.dimension_semantics<parallel>], iteration_bounds = array<i64: 1>, scalar_prefetch = 0 : i64, scratch_operands = 0 : i64, tpu.core_type = #tpu.core_type<tc>, window_params = [{transform_indices = @transform_0, window_bounds = array<i64: 16, 32>}, {transform_indices = @transform_1, window_bounds = array<i64: 16, 1>}, {pipeline_mode = #tpu.pipeline_mode<synchronous>, transform_indices = @transform_2, window_bounds = array<i64: 32, 32>}, {pipeline_mode = #tpu.pipeline_mode<synchronous>, transform_indices = @transform_3, window_bounds = array<i64: 32, 32>}, {pipeline_mode = #tpu.pipeline_mode<synchronous>, transform_indices = @transform_4, window_bounds = array<i64: 32, 32>}, {pipeline_mode = #tpu.pipeline_mode<synchronous>, transform_indices = @transform_5, window_bounds = array<i64: 1, 32>}, {pipeline_mode = #tpu.pipeline_mode<synchronous>, transform_indices = @transform_6, window_bounds = array<i64: 1, 32>}, {pipeline_mode = #tpu.pipeline_mode<synchronous>, transform_indices = @transform_7, window_bounds = array<i64: 1, 32>}, {transform_indices = @transform_8, window_bounds = array<i64: 16, 32>}, {transform_indices = @transform_9, window_bounds = array<i64: 16, 32>}, {transform_indices = @transform_10, window_bounds = array<i64: 16, 32>}]} {
    %c0 = arith.constant 0 : index
    %c0_0 = arith.constant 0 : index
    %0 = vector.load %arg1[%c0, %c0_0] : memref<16x32xf32, #tpu.memory_space<vmem>>, vector<16x32xf32>
    %c0_1 = arith.constant 0 : index
    %c0_2 = arith.constant 0 : index
    %1 = vector.load %arg2[%c0_1, %c0_2] : memref<16x1xf32, #tpu.memory_space<vmem>>, vector<16x1xf32>
    %2 = vector.broadcast %1 : vector<16x1xf32> to vector<16x32xf32>
    %3 = arith.mulf %0, %2 : vector<16x32xf32>
    %4 = arith.truncf %3 : vector<16x32xf32> to vector<16x32xbf16>
    %c0_3 = arith.constant 0 : index
    %c0_4 = arith.constant 0 : index
    %5 = vector.load %arg3[%c0_3, %c0_4] : memref<32x32xbf16, #tpu.memory_space<vmem>>, vector<32x32xbf16>
    %cst = arith.constant dense<0.000000e+00> : vector<16x32xf32>
    %6 = tpu.matmul %4, %5, %cst {dimension_numbers = #tpu.dot_dimension_numbers<[1], [0], [0], [1], [0, 0, 1, 1], [], []>} : vector<16x32xbf16>, vector<32x32xbf16>, vector<16x32xf32> -> vector<16x32xf32>
    %c0_5 = arith.constant 0 : index
    %c0_6 = arith.constant 0 : index
    %7 = vector.load %arg6[%c0_5, %c0_6] : memref<1x32xf32, #tpu.memory_space<vmem>>, vector<1x32xf32>
    %8 = vector.broadcast %7 : vector<1x32xf32> to vector<16x32xf32>
    %9 = arith.addf %6, %8 : vector<16x32xf32>
    %10 = arith.truncf %9 : vector<16x32xf32> to vector<16x32xbf16>
    %c0_7 = arith.constant 0 : index
    %c0_8 = arith.constant 0 : index
    %11 = vector.load %arg9[%c0_7, %c0_8] : memref<16x32xbf16, #tpu.memory_space<vmem>>, vector<16x32xbf16>
    tpu.vector_store %arg9[%c0_7, %c0_8], %10 {strides = array<i32>} : memref<16x32xbf16, #tpu.memory_space<vmem>>, vector<16x32xbf16>,
    %c0_9 = arith.constant 0 : index
    %c0_10 = arith.constant 0 : index
    %12 = vector.load %arg4[%c0_9, %c0_10] : memref<32x32xbf16, #tpu.memory_space<vmem>>, vector<32x32xbf16>
    %cst_11 = arith.constant dense<0.000000e+00> : vector<16x32xf32>
    %13 = tpu.matmul %4, %12, %cst_11 {dimension_numbers = #tpu.dot_dimension_numbers<[1], [0], [0], [1], [0, 0, 1, 1], [], []>} : vector<16x32xbf16>, vector<32x32xbf16>, vector<16x32xf32> -> vector<16x32xf32>
    %c0_12 = arith.constant 0 : index
    %c0_13 = arith.constant 0 : index
    %14 = vector.load %arg7[%c0_12, %c0_13] : memref<1x32xf32, #tpu.memory_space<vmem>>, vector<1x32xf32>
    %15 = vector.broadcast %14 : vector<1x32xf32> to vector<16x32xf32>
    %16 = arith.addf %13, %15 : vector<16x32xf32>
    %17 = arith.truncf %16 : vector<16x32xf32> to vector<16x32xbf16>
    %c0_14 = arith.constant 0 : index
    %c0_15 = arith.constant 0 : index
    %18 = vector.load %arg10[%c0_14, %c0_15] : memref<16x32xbf16, #tpu.memory_space<vmem>>, vector<16x32xbf16>
    tpu.vector_store %arg10[%c0_14, %c0_15], %17 {strides = array<i32>} : memref<16x32xbf16, #tpu.memory_space<vmem>>, vector<16x32xbf16>,
    %c0_16 = arith.constant 0 : index
    %c0_17 = arith.constant 0 : index
    %19 = vector.load %arg5[%c0_16, %c0_17] : memref<32x32xbf16, #tpu.memory_space<vmem>>, vector<32x32xbf16>
    %cst_18 = arith.constant dense<0.000000e+00> : vector<16x32xf32>
    %20 = tpu.matmul %4, %19, %cst_18 {dimension_numbers = #tpu.dot_dimension_numbers<[1], [0], [0], [1], [0, 0, 1, 1], [], []>} : vector<16x32xbf16>, vector<32x32xbf16>, vector<16x32xf32> -> vector<16x32xf32>
    %c0_19 = arith.constant 0 : index
    %c0_20 = arith.constant 0 : index
    %21 = vector.load %arg8[%c0_19, %c0_20] : memref<1x32xf32, #tpu.memory_space<vmem>>, vector<1x32xf32>
    %22 = vector.broadcast %21 : vector<1x32xf32> to vector<16x32xf32>
    %23 = arith.addf %20, %22 : vector<16x32xf32>
    %24 = arith.truncf %23 : vector<16x32xf32> to vector<16x32xbf16>
    %c0_21 = arith.constant 0 : index
    %c0_22 = arith.constant 0 : index
    %25 = vector.load %arg11[%c0_21, %c0_22] : memref<16x32xbf16, #tpu.memory_space<vmem>>, vector<16x32xbf16>
    tpu.vector_store %arg11[%c0_21, %c0_22], %24 {strides = array<i32>} : memref<16x32xbf16, #tpu.memory_space<vmem>>, vector<16x32xbf16>,
    return
  }
  func.func @transform_0(%arg0: i32) -> (i32, i32) {
    %c0_i32 = arith.constant 0 : i32
    %c0_i32_0 = arith.constant 0 : i32
    return %arg0, %c0_i32 : i32, i32
  }
  func.func @transform_1(%arg0: i32) -> (i32, i32) {
    %c0_i32 = arith.constant 0 : i32
    %c0_i32_0 = arith.constant 0 : i32
    return %arg0, %c0_i32 : i32, i32
  }
  func.func @transform_2(%arg0: i32) -> (i32, i32) {
    %c0_i32 = arith.constant 0 : i32
    %c0_i32_0 = arith.constant 0 : i32
    %c0_i32_1 = arith.constant 0 : i32
    return %c0_i32, %c0_i32_0 : i32, i32
  }
  func.func @transform_3(%arg0: i32) -> (i32, i32) {
    %c0_i32 = arith.constant 0 : i32
    %c0_i32_0 = arith.constant 0 : i32
    %c0_i32_1 = arith.constant 0 : i32
    return %c0_i32, %c0_i32_0 : i32, i32
  }
  func.func @transform_4(%arg0: i32) -> (i32, i32) {
    %c0_i32 = arith.constant 0 : i32
    %c0_i32_0 = arith.constant 0 : i32
    %c0_i32_1 = arith.constant 0 : i32
    return %c0_i32, %c0_i32_0 : i32, i32
  }
  func.func @transform_5(%arg0: i32) -> (i32, i32) {
    %c0_i32 = arith.constant 0 : i32
    %c0_i32_0 = arith.constant 0 : i32
    %c0_i32_1 = arith.constant 0 : i32
    return %c0_i32, %c0_i32_0 : i32, i32
  }
  func.func @transform_6(%arg0: i32) -> (i32, i32) {
    %c0_i32 = arith.constant 0 : i32
    %c0_i32_0 = arith.constant 0 : i32
    %c0_i32_1 = arith.constant 0 : i32
    return %c0_i32, %c0_i32_0 : i32, i32
  }
  func.func @transform_7(%arg0: i32) -> (i32, i32) {
    %c0_i32 = arith.constant 0 : i32
    %c0_i32_0 = arith.constant 0 : i32
    %c0_i32_1 = arith.constant 0 : i32
    return %c0_i32, %c0_i32_0 : i32, i32
  }
  func.func @transform_8(%arg0: i32) -> (i32, i32) {
    %c0_i32 = arith.constant 0 : i32
    %c0_i32_0 = arith.constant 0 : i32
    return %arg0, %c0_i32 : i32, i32
  }
  func.func @transform_9(%arg0: i32) -> (i32, i32) {
    %c0_i32 = arith.constant 0 : i32
    %c0_i32_0 = arith.constant 0 : i32
    return %arg0, %c0_i32 : i32, i32
  }
  func.func @transform_10(%arg0: i32) -> (i32, i32) {
    %c0_i32 = arith.constant 0 : i32
    %c0_i32_0 = arith.constant 0 : i32
    return %arg0, %c0_i32 : i32, i32
  }
}

module attributes {stable_mosaic.version = 11 : i64} {
  func.func @_attn_kernel(%arg0: i32, %arg1: i32, %arg2: memref<1x8x32xbf16, #tpu.memory_space<vmem>>, %arg3: memref<1x8x32xbf16, #tpu.memory_space<vmem>>, %arg4: memref<1x8x32xbf16, #tpu.memory_space<vmem>>, %arg5: memref<1x1x8xf32, #tpu.memory_space<vmem>>, %arg6: memref<32x32xbf16, #tpu.memory_space<vmem>>, %arg7: memref<1x32xf32, #tpu.memory_space<vmem>>, %arg8: memref<1x8x32xbf16, #tpu.memory_space<vmem>>, %arg9: memref<8x32xbf16, #tpu.memory_space<vmem>>) attributes {dimension_semantics = [#tpu.dimension_semantics<parallel>, #tpu.dimension_semantics<parallel>], iteration_bounds = array<i64: 2, 1>, scalar_prefetch = 0 : i64, scratch_operands = 1 : i64, tpu.core_type = #tpu.core_type<tc>, window_params = [{transform_indices = @transform_0, window_bounds = array<i64: 1, 8, 32>}, {transform_indices = @transform_1, window_bounds = array<i64: 1, 8, 32>}, {transform_indices = @transform_2, window_bounds = array<i64: 1, 8, 32>}, {transform_indices = @transform_3, window_bounds = array<i64: 1, 1, 8>}, {pipeline_mode = #tpu.pipeline_mode<synchronous>, transform_indices = @transform_4, window_bounds = array<i64: 32, 32>}, {pipeline_mode = #tpu.pipeline_mode<synchronous>, transform_indices = @transform_5, window_bounds = array<i64: 1, 32>}, {transform_indices = @transform_6, window_bounds = array<i64: 1, 8, 32>}]} {
    %c0 = arith.constant 0 : index
    %c0_0 = arith.constant 0 : index
    %c0_1 = arith.constant 0 : index
    %0 = vector.load %arg5[%c0, %c0_0, %c0_1] : memref<1x1x8xf32, #tpu.memory_space<vmem>>, vector<1x1x8xf32>
    %1 = vector.shape_cast %0 : vector<1x1x8xf32> to vector<1x8xf32>
    %cst = arith.constant 0.000000e+00 : f32
    %2 = vector.broadcast %cst : f32 to vector<1x8xf32>
    %3 = arith.cmpf ogt, %1, %2 : vector<1x8xf32>
    %cst_2 = arith.constant 0.000000e+00 : f32
    %cst_3 = arith.constant -1.000000e+30 : f32
    %4 = vector.broadcast %cst_2 : f32 to vector<1x8xf32>
    %5 = vector.broadcast %cst_3 : f32 to vector<1x8xf32>
    %6 = arith.select %3, %4, %5 : vector<1x8xi1>, vector<1x8xf32>
    %c0_4 = arith.constant 0 : index
    %c0_5 = arith.constant 0 : index
    %c0_6 = arith.constant 0 : index
    %7 = vector.load %arg2[%c0_4, %c0_5, %c0_6] : memref<1x8x32xbf16, #tpu.memory_space<vmem>>, vector<1x8x8xbf16>
    %8 = vector.shape_cast %7 : vector<1x8x8xbf16> to vector<8x8xbf16>
    %c0_7 = arith.constant 0 : index
    %c0_8 = arith.constant 0 : index
    %c0_9 = arith.constant 0 : index
    %9 = vector.load %arg3[%c0_7, %c0_8, %c0_9] : memref<1x8x32xbf16, #tpu.memory_space<vmem>>, vector<1x8x8xbf16>
    %10 = vector.shape_cast %9 : vector<1x8x8xbf16> to vector<8x8xbf16>
    %c0_10 = arith.constant 0 : index
    %c0_11 = arith.constant 0 : index
    %c0_12 = arith.constant 0 : index
    %11 = vector.load %arg4[%c0_10, %c0_11, %c0_12] : memref<1x8x32xbf16, #tpu.memory_space<vmem>>, vector<1x8x8xbf16>
    %12 = vector.shape_cast %11 : vector<1x8x8xbf16> to vector<8x8xbf16>
    %cst_13 = arith.constant dense<0.000000e+00> : vector<8x8xf32>
    %13 = tpu.matmul %8, %10, %cst_13 {dimension_numbers = #tpu.dot_dimension_numbers<[1], [1], [0], [0], [0, 0, 1, 0], [], []>} : vector<8x8xbf16>, vector<8x8xbf16>, vector<8x8xf32> -> vector<8x8xf32>
    %cst_14 = arith.constant 0.353553385 : f32
    %14 = vector.broadcast %cst_14 : f32 to vector<8x8xf32>
    %15 = arith.mulf %13, %14 : vector<8x8xf32>
    %16 = vector.broadcast %6 : vector<1x8xf32> to vector<8x8xf32>
    %17 = arith.addf %15, %16 : vector<8x8xf32>
    %cst_15 = arith.constant dense<0xFF800000> : vector<8xf32>
    %18 = vector.multi_reduction <maximumf>, %17, %cst_15 [1] : vector<8x8xf32> to vector<8xf32>
    %19 = vector.shape_cast %18 : vector<8xf32> to vector<8x1xf32>
    %20 = vector.broadcast %19 : vector<8x1xf32> to vector<8x8xf32>
    %21 = arith.subf %17, %20 : vector<8x8xf32>
    %22 = math.exp %21 : vector<8x8xf32>
    %cst_16 = arith.constant dense<0.000000e+00> : vector<8xf32>
    %23 = vector.multi_reduction <add>, %22, %cst_16 [1] : vector<8x8xf32> to vector<8xf32>
    %24 = vector.shape_cast %23 : vector<8xf32> to vector<8x1xf32>
    %25 = tpu.reciprocal %24 {approx = true} : vector<8x1xf32> -> vector<8x1xf32>
    %26 = vector.broadcast %25 : vector<8x1xf32> to vector<8x8xf32>
    %27 = arith.mulf %22, %26 : vector<8x8xf32>
    %28 = arith.truncf %27 : vector<8x8xf32> to vector<8x8xbf16>
    %cst_17 = arith.constant dense<0.000000e+00> : vector<8x8xf32>
    %29 = tpu.matmul %28, %12, %cst_17 {dimension_numbers = #tpu.dot_dimension_numbers<[1], [0], [0], [1], [0, 0, 1, 1], [], []>} : vector<8x8xbf16>, vector<8x8xbf16>, vector<8x8xf32> -> vector<8x8xf32>
    %30 = arith.truncf %29 : vector<8x8xf32> to vector<8x8xbf16>
    %c0_18 = arith.constant 0 : index
    %c0_19 = arith.constant 0 : index
    %31 = vector.load %arg9[%c0_18, %c0_19] : memref<8x32xbf16, #tpu.memory_space<vmem>>, vector<8x8xbf16>
    tpu.vector_store %arg9[%c0_18, %c0_19], %30 {strides = array<i32>} : memref<8x32xbf16, #tpu.memory_space<vmem>>, vector<8x8xbf16>,
    %c0_20 = arith.constant 0 : index
    %c0_21 = arith.constant 0 : index
    %c8 = arith.constant 8 : index
    %32 = vector.load %arg2[%c0_20, %c0_21, %c8] : memref<1x8x32xbf16, #tpu.memory_space<vmem>>, vector<1x8x8xbf16>
    %33 = vector.shape_cast %32 : vector<1x8x8xbf16> to vector<8x8xbf16>
    %c0_22 = arith.constant 0 : index
    %c0_23 = arith.constant 0 : index
    %c8_24 = arith.constant 8 : index
    %34 = vector.load %arg3[%c0_22, %c0_23, %c8_24] : memref<1x8x32xbf16, #tpu.memory_space<vmem>>, vector<1x8x8xbf16>
    %35 = vector.shape_cast %34 : vector<1x8x8xbf16> to vector<8x8xbf16>
    %c0_25 = arith.constant 0 : index
    %c0_26 = arith.constant 0 : index
    %c8_27 = arith.constant 8 : index
    %36 = vector.load %arg4[%c0_25, %c0_26, %c8_27] : memref<1x8x32xbf16, #tpu.memory_space<vmem>>, vector<1x8x8xbf16>
    %37 = vector.shape_cast %36 : vector<1x8x8xbf16> to vector<8x8xbf16>
    %cst_28 = arith.constant dense<0.000000e+00> : vector<8x8xf32>
    %38 = tpu.matmul %33, %35, %cst_28 {dimension_numbers = #tpu.dot_dimension_numbers<[1], [1], [0], [0], [0, 0, 1, 0], [], []>} : vector<8x8xbf16>, vector<8x8xbf16>, vector<8x8xf32> -> vector<8x8xf32>
    %cst_29 = arith.constant 0.353553385 : f32
    %39 = vector.broadcast %cst_29 : f32 to vector<8x8xf32>
    %40 = arith.mulf %38, %39 : vector<8x8xf32>
    %41 = vector.broadcast %6 : vector<1x8xf32> to vector<8x8xf32>
    %42 = arith.addf %40, %41 : vector<8x8xf32>
    %cst_30 = arith.constant dense<0xFF800000> : vector<8xf32>
    %43 = vector.multi_reduction <maximumf>, %42, %cst_30 [1] : vector<8x8xf32> to vector<8xf32>
    %44 = vector.shape_cast %43 : vector<8xf32> to vector<8x1xf32>
    %45 = vector.broadcast %44 : vector<8x1xf32> to vector<8x8xf32>
    %46 = arith.subf %42, %45 : vector<8x8xf32>
    %47 = math.exp %46 : vector<8x8xf32>
    %cst_31 = arith.constant dense<0.000000e+00> : vector<8xf32>
    %48 = vector.multi_reduction <add>, %47, %cst_31 [1] : vector<8x8xf32> to vector<8xf32>
    %49 = vector.shape_cast %48 : vector<8xf32> to vector<8x1xf32>
    %50 = tpu.reciprocal %49 {approx = true} : vector<8x1xf32> -> vector<8x1xf32>
    %51 = vector.broadcast %50 : vector<8x1xf32> to vector<8x8xf32>
    %52 = arith.mulf %47, %51 : vector<8x8xf32>
    %53 = arith.truncf %52 : vector<8x8xf32> to vector<8x8xbf16>
    %cst_32 = arith.constant dense<0.000000e+00> : vector<8x8xf32>
    %54 = tpu.matmul %53, %37, %cst_32 {dimension_numbers = #tpu.dot_dimension_numbers<[1], [0], [0], [1], [0, 0, 1, 1], [], []>} : vector<8x8xbf16>, vector<8x8xbf16>, vector<8x8xf32> -> vector<8x8xf32>
    %55 = arith.truncf %54 : vector<8x8xf32> to vector<8x8xbf16>
    %c0_33 = arith.constant 0 : index
    %c8_34 = arith.constant 8 : index
    %56 = vector.load %arg9[%c0_33, %c8_34] : memref<8x32xbf16, #tpu.memory_space<vmem>>, vector<8x8xbf16>
    tpu.vector_store %arg9[%c0_33, %c8_34], %55 {strides = array<i32>} : memref<8x32xbf16, #tpu.memory_space<vmem>>, vector<8x8xbf16>,
    %c0_35 = arith.constant 0 : index
    %c0_36 = arith.constant 0 : index
    %c16 = arith.constant 16 : index
    %57 = vector.load %arg2[%c0_35, %c0_36, %c16] : memref<1x8x32xbf16, #tpu.memory_space<vmem>>, vector<1x8x8xbf16>
    %58 = vector.shape_cast %57 : vector<1x8x8xbf16> to vector<8x8xbf16>
    %c0_37 = arith.constant 0 : index
    %c0_38 = arith.constant 0 : index
    %c16_39 = arith.constant 16 : index
    %59 = vector.load %arg3[%c0_37, %c0_38, %c16_39] : memref<1x8x32xbf16, #tpu.memory_space<vmem>>, vector<1x8x8xbf16>
    %60 = vector.shape_cast %59 : vector<1x8x8xbf16> to vector<8x8xbf16>
    %c0_40 = arith.constant 0 : index
    %c0_41 = arith.constant 0 : index
    %c16_42 = arith.constant 16 : index
    %61 = vector.load %arg4[%c0_40, %c0_41, %c16_42] : memref<1x8x32xbf16, #tpu.memory_space<vmem>>, vector<1x8x8xbf16>
    %62 = vector.shape_cast %61 : vector<1x8x8xbf16> to vector<8x8xbf16>
    %cst_43 = arith.constant dense<0.000000e+00> : vector<8x8xf32>
    %63 = tpu.matmul %58, %60, %cst_43 {dimension_numbers = #tpu.dot_dimension_numbers<[1], [1], [0], [0], [0, 0, 1, 0], [], []>} : vector<8x8xbf16>, vector<8x8xbf16>, vector<8x8xf32> -> vector<8x8xf32>
    %cst_44 = arith.constant 0.353553385 : f32
    %64 = vector.broadcast %cst_44 : f32 to vector<8x8xf32>
    %65 = arith.mulf %63, %64 : vector<8x8xf32>
    %66 = vector.broadcast %6 : vector<1x8xf32> to vector<8x8xf32>
    %67 = arith.addf %65, %66 : vector<8x8xf32>
    %cst_45 = arith.constant dense<0xFF800000> : vector<8xf32>
    %68 = vector.multi_reduction <maximumf>, %67, %cst_45 [1] : vector<8x8xf32> to vector<8xf32>
    %69 = vector.shape_cast %68 : vector<8xf32> to vector<8x1xf32>
    %70 = vector.broadcast %69 : vector<8x1xf32> to vector<8x8xf32>
    %71 = arith.subf %67, %70 : vector<8x8xf32>
    %72 = math.exp %71 : vector<8x8xf32>
    %cst_46 = arith.constant dense<0.000000e+00> : vector<8xf32>
    %73 = vector.multi_reduction <add>, %72, %cst_46 [1] : vector<8x8xf32> to vector<8xf32>
    %74 = vector.shape_cast %73 : vector<8xf32> to vector<8x1xf32>
    %75 = tpu.reciprocal %74 {approx = true} : vector<8x1xf32> -> vector<8x1xf32>
    %76 = vector.broadcast %75 : vector<8x1xf32> to vector<8x8xf32>
    %77 = arith.mulf %72, %76 : vector<8x8xf32>
    %78 = arith.truncf %77 : vector<8x8xf32> to vector<8x8xbf16>
    %cst_47 = arith.constant dense<0.000000e+00> : vector<8x8xf32>
    %79 = tpu.matmul %78, %62, %cst_47 {dimension_numbers = #tpu.dot_dimension_numbers<[1], [0], [0], [1], [0, 0, 1, 1], [], []>} : vector<8x8xbf16>, vector<8x8xbf16>, vector<8x8xf32> -> vector<8x8xf32>
    %80 = arith.truncf %79 : vector<8x8xf32> to vector<8x8xbf16>
    %c0_48 = arith.constant 0 : index
    %c16_49 = arith.constant 16 : index
    %81 = vector.load %arg9[%c0_48, %c16_49] : memref<8x32xbf16, #tpu.memory_space<vmem>>, vector<8x8xbf16>
    tpu.vector_store %arg9[%c0_48, %c16_49], %80 {strides = array<i32>} : memref<8x32xbf16, #tpu.memory_space<vmem>>, vector<8x8xbf16>,
    %c0_50 = arith.constant 0 : index
    %c0_51 = arith.constant 0 : index
    %c24 = arith.constant 24 : index
    %82 = vector.load %arg2[%c0_50, %c0_51, %c24] : memref<1x8x32xbf16, #tpu.memory_space<vmem>>, vector<1x8x8xbf16>
    %83 = vector.shape_cast %82 : vector<1x8x8xbf16> to vector<8x8xbf16>
    %c0_52 = arith.constant 0 : index
    %c0_53 = arith.constant 0 : index
    %c24_54 = arith.constant 24 : index
    %84 = vector.load %arg3[%c0_52, %c0_53, %c24_54] : memref<1x8x32xbf16, #tpu.memory_space<vmem>>, vector<1x8x8xbf16>
    %85 = vector.shape_cast %84 : vector<1x8x8xbf16> to vector<8x8xbf16>
    %c0_55 = arith.constant 0 : index
    %c0_56 = arith.constant 0 : index
    %c24_57 = arith.constant 24 : index
    %86 = vector.load %arg4[%c0_55, %c0_56, %c24_57] : memref<1x8x32xbf16, #tpu.memory_space<vmem>>, vector<1x8x8xbf16>
    %87 = vector.shape_cast %86 : vector<1x8x8xbf16> to vector<8x8xbf16>
    %cst_58 = arith.constant dense<0.000000e+00> : vector<8x8xf32>
    %88 = tpu.matmul %83, %85, %cst_58 {dimension_numbers = #tpu.dot_dimension_numbers<[1], [1], [0], [0], [0, 0, 1, 0], [], []>} : vector<8x8xbf16>, vector<8x8xbf16>, vector<8x8xf32> -> vector<8x8xf32>
    %cst_59 = arith.constant 0.353553385 : f32
    %89 = vector.broadcast %cst_59 : f32 to vector<8x8xf32>
    %90 = arith.mulf %88, %89 : vector<8x8xf32>
    %91 = vector.broadcast %6 : vector<1x8xf32> to vector<8x8xf32>
    %92 = arith.addf %90, %91 : vector<8x8xf32>
    %cst_60 = arith.constant dense<0xFF800000> : vector<8xf32>
    %93 = vector.multi_reduction <maximumf>, %92, %cst_60 [1] : vector<8x8xf32> to vector<8xf32>
    %94 = vector.shape_cast %93 : vector<8xf32> to vector<8x1xf32>
    %95 = vector.broadcast %94 : vector<8x1xf32> to vector<8x8xf32>
    %96 = arith.subf %92, %95 : vector<8x8xf32>
    %97 = math.exp %96 : vector<8x8xf32>
    %cst_61 = arith.constant dense<0.000000e+00> : vector<8xf32>
    %98 = vector.multi_reduction <add>, %97, %cst_61 [1] : vector<8x8xf32> to vector<8xf32>
    %99 = vector.shape_cast %98 : vector<8xf32> to vector<8x1xf32>
    %100 = tpu.reciprocal %99 {approx = true} : vector<8x1xf32> -> vector<8x1xf32>
    %101 = vector.broadcast %100 : vector<8x1xf32> to vector<8x8xf32>
    %102 = arith.mulf %97, %101 : vector<8x8xf32>
    %103 = arith.truncf %102 : vector<8x8xf32> to vector<8x8xbf16>
    %cst_62 = arith.constant dense<0.000000e+00> : vector<8x8xf32>
    %104 = tpu.matmul %103, %87, %cst_62 {dimension_numbers = #tpu.dot_dimension_numbers<[1], [0], [0], [1], [0, 0, 1, 1], [], []>} : vector<8x8xbf16>, vector<8x8xbf16>, vector<8x8xf32> -> vector<8x8xf32>
    %105 = arith.truncf %104 : vector<8x8xf32> to vector<8x8xbf16>
    %c0_63 = arith.constant 0 : index
    %c24_64 = arith.constant 24 : index
    %106 = vector.load %arg9[%c0_63, %c24_64] : memref<8x32xbf16, #tpu.memory_space<vmem>>, vector<8x8xbf16>
    tpu.vector_store %arg9[%c0_63, %c24_64], %105 {strides = array<i32>} : memref<8x32xbf16, #tpu.memory_space<vmem>>, vector<8x8xbf16>,
    %c0_65 = arith.constant 0 : index
    %c0_66 = arith.constant 0 : index
    %107 = vector.load %arg9[%c0_65, %c0_66] : memref<8x32xbf16, #tpu.memory_space<vmem>>, vector<8x32xbf16>
    %c0_67 = arith.constant 0 : index
    %c0_68 = arith.constant 0 : index
    %108 = vector.load %arg6[%c0_67, %c0_68] : memref<32x32xbf16, #tpu.memory_space<vmem>>, vector<32x32xbf16>
    %cst_69 = arith.constant dense<0.000000e+00> : vector<8x32xf32>
    %109 = tpu.matmul %107, %108, %cst_69 {dimension_numbers = #tpu.dot_dimension_numbers<[1], [0], [0], [1], [0, 0, 1, 1], [], []>} : vector<8x32xbf16>, vector<32x32xbf16>, vector<8x32xf32> -> vector<8x32xf32>
    %c0_70 = arith.constant 0 : index
    %c0_71 = arith.constant 0 : index
    %110 = vector.load %arg7[%c0_70, %c0_71] : memref<1x32xf32, #tpu.memory_space<vmem>>, vector<1x32xf32>
    %111 = vector.broadcast %110 : vector<1x32xf32> to vector<8x32xf32>
    %112 = arith.addf %109, %111 : vector<8x32xf32>
    %113 = arith.truncf %112 : vector<8x32xf32> to vector<8x32xbf16>
    %c0_72 = arith.constant 0 : index
    %c0_73 = arith.constant 0 : index
    %c0_74 = arith.constant 0 : index
    %114 = vector.load %arg8[%c0_72, %c0_73, %c0_74] : memref<1x8x32xbf16, #tpu.memory_space<vmem>>, vector<1x8x32xbf16>
    %115 = vector.shape_cast %114 : vector<1x8x32xbf16> to vector<8x32xbf16>
    %116 = vector.shape_cast %113 : vector<8x32xbf16> to vector<1x8x32xbf16>
    tpu.vector_store %arg8[%c0_72, %c0_73, %c0_74], %116 {strides = array<i32>} : memref<1x8x32xbf16, #tpu.memory_space<vmem>>, vector<1x8x32xbf16>,
    return
  }
  func.func @transform_0(%arg0: i32, %arg1: i32) -> (i32, i32, i32) {
    %c0_i32 = arith.constant 0 : i32
    %c0_i32_0 = arith.constant 0 : i32
    return %arg0, %arg1, %c0_i32 : i32, i32, i32
  }
  func.func @transform_1(%arg0: i32, %arg1: i32) -> (i32, i32, i32) {
    %c0_i32 = arith.constant 0 : i32
    %c0_i32_0 = arith.constant 0 : i32
    %c0_i32_1 = arith.constant 0 : i32
    return %arg0, %c0_i32, %c0_i32_0 : i32, i32, i32
  }
  func.func @transform_2(%arg0: i32, %arg1: i32) -> (i32, i32, i32) {
    %c0_i32 = arith.constant 0 : i32
    %c0_i32_0 = arith.constant 0 : i32
    %c0_i32_1 = arith.constant 0 : i32
    return %arg0, %c0_i32, %c0_i32_0 : i32, i32, i32
  }
  func.func @transform_3(%arg0: i32, %arg1: i32) -> (i32, i32, i32) {
    %c0_i32 = arith.constant 0 : i32
    %c0_i32_0 = arith.constant 0 : i32
    %c0_i32_1 = arith.constant 0 : i32
    return %arg0, %c0_i32, %c0_i32_0 : i32, i32, i32
  }
  func.func @transform_4(%arg0: i32, %arg1: i32) -> (i32, i32) {
    %c0_i32 = arith.constant 0 : i32
    %c0_i32_0 = arith.constant 0 : i32
    %c0_i32_1 = arith.constant 0 : i32
    return %c0_i32, %c0_i32_0 : i32, i32
  }
  func.func @transform_5(%arg0: i32, %arg1: i32) -> (i32, i32) {
    %c0_i32 = arith.constant 0 : i32
    %c0_i32_0 = arith.constant 0 : i32
    %c0_i32_1 = arith.constant 0 : i32
    return %c0_i32, %c0_i32_0 : i32, i32
  }
  func.func @transform_6(%arg0: i32, %arg1: i32) -> (i32, i32, i32) {
    %c0_i32 = arith.constant 0 : i32
    %c0_i32_0 = arith.constant 0 : i32
    return %arg0, %arg1, %c0_i32 : i32, i32, i32
  }
}

module attributes {stable_mosaic.version = 11 : i64} {
  func.func @_ffn_kernel(%arg0: i32, %arg1: i32, %arg2: memref<16x32xbf16, #tpu.memory_space<vmem>>, %arg3: memref<32x128xbf16, #tpu.memory_space<vmem>>, %arg4: memref<1x128xf32, #tpu.memory_space<vmem>>, %arg5: memref<128x32xbf16, #tpu.memory_space<vmem>>, %arg6: memref<1x32xf32, #tpu.memory_space<vmem>>, %arg7: memref<16x32xbf16, #tpu.memory_space<vmem>>, %arg8: memref<16x32xf32, #tpu.memory_space<vmem>>) attributes {dimension_semantics = [#tpu.dimension_semantics<parallel>, #tpu.dimension_semantics<arbitrary>], iteration_bounds = array<i64: 1, 1>, scalar_prefetch = 0 : i64, scratch_operands = 1 : i64, tpu.core_type = #tpu.core_type<tc>, window_params = [{transform_indices = @transform_0, window_bounds = array<i64: 16, 32>}, {transform_indices = @transform_1, window_bounds = array<i64: 32, 128>}, {transform_indices = @transform_2, window_bounds = array<i64: 1, 128>}, {transform_indices = @transform_3, window_bounds = array<i64: 128, 32>}, {pipeline_mode = #tpu.pipeline_mode<synchronous>, transform_indices = @transform_4, window_bounds = array<i64: 1, 32>}, {transform_indices = @transform_5, window_bounds = array<i64: 16, 32>}]} {
    %c0_i32 = arith.constant 0 : i32
    %0 = arith.cmpi eq, %arg1, %c0_i32 : i32
    %1 = arith.extui %0 : i1 to i32
    %c0_i32_0 = arith.constant 0 : i32
    %2 = arith.cmpi ne, %1, %c0_i32_0 : i32
    scf.if %2 {
      %cst_16 = arith.constant 0.000000e+00 : f32
      %20 = vector.broadcast %cst_16 : f32 to vector<16x32xf32>
      %c0_17 = arith.constant 0 : index
      %c0_18 = arith.constant 0 : index
      %21 = vector.load %arg8[%c0_17, %c0_18] : memref<16x32xf32, #tpu.memory_space<vmem>>, vector<16x32xf32>
      tpu.vector_store %arg8[%c0_17, %c0_18], %20 {strides = array<i32>} : memref<16x32xf32, #tpu.memory_space<vmem>>, vector<16x32xf32>,
    } else {
    }
    %c0 = arith.constant 0 : index
    %c0_1 = arith.constant 0 : index
    %3 = vector.load %arg2[%c0, %c0_1] : memref<16x32xbf16, #tpu.memory_space<vmem>>, vector<16x32xbf16>
    %c0_2 = arith.constant 0 : index
    %c0_3 = arith.constant 0 : index
    %4 = vector.load %arg3[%c0_2, %c0_3] : memref<32x128xbf16, #tpu.memory_space<vmem>>, vector<32x128xbf16>
    %cst = arith.constant dense<0.000000e+00> : vector<16x128xf32>
    %5 = tpu.matmul %3, %4, %cst {dimension_numbers = #tpu.dot_dimension_numbers<[1], [0], [0], [1], [0, 0, 1, 1], [], []>} : vector<16x32xbf16>, vector<32x128xbf16>, vector<16x128xf32> -> vector<16x128xf32>
    %c0_4 = arith.constant 0 : index
    %c0_5 = arith.constant 0 : index
    %6 = vector.load %arg4[%c0_4, %c0_5] : memref<1x128xf32, #tpu.memory_space<vmem>>, vector<1x128xf32>
    %7 = vector.broadcast %6 : vector<1x128xf32> to vector<16x128xf32>
    %8 = arith.addf %5, %7 : vector<16x128xf32>
    %cst_6 = arith.constant 0.000000e+00 : f32
    %9 = vector.broadcast %cst_6 : f32 to vector<16x128xf32>
    %10 = arith.maximumf %8, %9 : vector<16x128xf32>
    %c0_7 = arith.constant 0 : index
    %c0_8 = arith.constant 0 : index
    %11 = vector.load %arg8[%c0_7, %c0_8] : memref<16x32xf32, #tpu.memory_space<vmem>>, vector<16x32xf32>
    %12 = arith.truncf %10 : vector<16x128xf32> to vector<16x128xbf16>
    %c0_9 = arith.constant 0 : index
    %c0_10 = arith.constant 0 : index
    %13 = vector.load %arg5[%c0_9, %c0_10] : memref<128x32xbf16, #tpu.memory_space<vmem>>, vector<128x32xbf16>
    %cst_11 = arith.constant dense<0.000000e+00> : vector<16x32xf32>
    %14 = tpu.matmul %12, %13, %cst_11 {dimension_numbers = #tpu.dot_dimension_numbers<[1], [0], [0], [1], [0, 0, 1, 1], [], []>} : vector<16x128xbf16>, vector<128x32xbf16>, vector<16x32xf32> -> vector<16x32xf32>
    %15 = arith.addf %11, %14 : vector<16x32xf32>
    %c0_12 = arith.constant 0 : index
    %c0_13 = arith.constant 0 : index
    %16 = vector.load %arg8[%c0_12, %c0_13] : memref<16x32xf32, #tpu.memory_space<vmem>>, vector<16x32xf32>
    tpu.vector_store %arg8[%c0_12, %c0_13], %15 {strides = array<i32>} : memref<16x32xf32, #tpu.memory_space<vmem>>, vector<16x32xf32>,
    %c0_i32_14 = arith.constant 0 : i32
    %17 = arith.cmpi eq, %arg1, %c0_i32_14 : i32
    %18 = arith.extui %17 : i1 to i32
    %c0_i32_15 = arith.constant 0 : i32
    %19 = arith.cmpi ne, %18, %c0_i32_15 : i32
    scf.if %19 {
      %c0_16 = arith.constant 0 : index
      %c0_17 = arith.constant 0 : index
      %20 = vector.load %arg8[%c0_16, %c0_17] : memref<16x32xf32, #tpu.memory_space<vmem>>, vector<16x32xf32>
      %c0_18 = arith.constant 0 : index
      %c0_19 = arith.constant 0 : index
      %21 = vector.load %arg6[%c0_18, %c0_19] : memref<1x32xf32, #tpu.memory_space<vmem>>, vector<1x32xf32>
      %22 = vector.broadcast %21 : vector<1x32xf32> to vector<16x32xf32>
      %23 = arith.addf %20, %22 : vector<16x32xf32>
      %24 = arith.truncf %23 : vector<16x32xf32> to vector<16x32xbf16>
      %c0_20 = arith.constant 0 : index
      %c0_21 = arith.constant 0 : index
      %25 = vector.load %arg7[%c0_20, %c0_21] : memref<16x32xbf16, #tpu.memory_space<vmem>>, vector<16x32xbf16>
      tpu.vector_store %arg7[%c0_20, %c0_21], %24 {strides = array<i32>} : memref<16x32xbf16, #tpu.memory_space<vmem>>, vector<16x32xbf16>,
    } else {
    }
    return
  }
  func.func @transform_0(%arg0: i32, %arg1: i32) -> (i32, i32) {
    %c0_i32 = arith.constant 0 : i32
    %c0_i32_0 = arith.constant 0 : i32
    return %arg0, %c0_i32 : i32, i32
  }
  func.func @transform_1(%arg0: i32, %arg1: i32) -> (i32, i32) {
    %c0_i32 = arith.constant 0 : i32
    %c0_i32_0 = arith.constant 0 : i32
    return %c0_i32, %arg1 : i32, i32
  }
  func.func @transform_2(%arg0: i32, %arg1: i32) -> (i32, i32) {
    %c0_i32 = arith.constant 0 : i32
    %c0_i32_0 = arith.constant 0 : i32
    return %c0_i32, %arg1 : i32, i32
  }
  func.func @transform_3(%arg0: i32, %arg1: i32) -> (i32, i32) {
    %c0_i32 = arith.constant 0 : i32
    %c0_i32_0 = arith.constant 0 : i32
    return %arg1, %c0_i32 : i32, i32
  }
  func.func @transform_4(%arg0: i32, %arg1: i32) -> (i32, i32) {
    %c0_i32 = arith.constant 0 : i32
    %c0_i32_0 = arith.constant 0 : i32
    %c0_i32_1 = arith.constant 0 : i32
    return %c0_i32, %c0_i32_0 : i32, i32
  }
  func.func @transform_5(%arg0: i32, %arg1: i32) -> (i32, i32) {
    %c0_i32 = arith.constant 0 : i32
    %c0_i32_0 = arith.constant 0 : i32
    return %arg0, %c0_i32 : i32, i32
  }
}

module attributes {stable_mosaic.version = 11 : i64} {
  func.func @_add_ln_kernel(%arg0: i32, %arg1: memref<16x32xf32, #tpu.memory_space<vmem>>, %arg2: memref<16x32xbf16, #tpu.memory_space<vmem>>, %arg3: memref<16x1xf32, #tpu.memory_space<vmem>>, %arg4: memref<1x32xf32, #tpu.memory_space<vmem>>, %arg5: memref<1x32xf32, #tpu.memory_space<vmem>>, %arg6: memref<16x32xbf16, #tpu.memory_space<vmem>>) attributes {dimension_semantics = [#tpu.dimension_semantics<parallel>], iteration_bounds = array<i64: 1>, scalar_prefetch = 0 : i64, scratch_operands = 0 : i64, tpu.core_type = #tpu.core_type<tc>, window_params = [{transform_indices = @transform_0, window_bounds = array<i64: 16, 32>}, {transform_indices = @transform_1, window_bounds = array<i64: 16, 32>}, {transform_indices = @transform_2, window_bounds = array<i64: 16, 1>}, {pipeline_mode = #tpu.pipeline_mode<synchronous>, transform_indices = @transform_3, window_bounds = array<i64: 1, 32>}, {pipeline_mode = #tpu.pipeline_mode<synchronous>, transform_indices = @transform_4, window_bounds = array<i64: 1, 32>}, {transform_indices = @transform_5, window_bounds = array<i64: 16, 32>}]} {
    %c0 = arith.constant 0 : index
    %c0_0 = arith.constant 0 : index
    %0 = vector.load %arg1[%c0, %c0_0] : memref<16x32xf32, #tpu.memory_space<vmem>>, vector<16x32xf32>
    %c0_1 = arith.constant 0 : index
    %c0_2 = arith.constant 0 : index
    %1 = vector.load %arg3[%c0_1, %c0_2] : memref<16x1xf32, #tpu.memory_space<vmem>>, vector<16x1xf32>
    %2 = vector.broadcast %1 : vector<16x1xf32> to vector<16x32xf32>
    %3 = arith.mulf %0, %2 : vector<16x32xf32>
    %c0_3 = arith.constant 0 : index
    %c0_4 = arith.constant 0 : index
    %4 = vector.load %arg2[%c0_3, %c0_4] : memref<16x32xbf16, #tpu.memory_space<vmem>>, vector<16x32xbf16>
    %5 = arith.extf %4 : vector<16x32xbf16> to vector<16x32xf32>
    %6 = arith.addf %3, %5 : vector<16x32xf32>
    %cst = arith.constant dense<0.000000e+00> : vector<16xf32>
    %7 = vector.multi_reduction <add>, %6, %cst [1] : vector<16x32xf32> to vector<16xf32>
    %8 = vector.shape_cast %7 : vector<16xf32> to vector<16x1xf32>
    %cst_5 = arith.constant 3.200000e+01 : f32
    %9 = vector.broadcast %cst_5 : f32 to vector<16x1xf32>
    %10 = arith.divf %8, %9 : vector<16x1xf32>
    %11 = vector.broadcast %10 : vector<16x1xf32> to vector<16x32xf32>
    %12 = arith.subf %6, %11 : vector<16x32xf32>
    %13 = arith.mulf %12, %12 : vector<16x32xf32>
    %cst_6 = arith.constant dense<0.000000e+00> : vector<16xf32>
    %14 = vector.multi_reduction <add>, %13, %cst_6 [1] : vector<16x32xf32> to vector<16xf32>
    %15 = vector.shape_cast %14 : vector<16xf32> to vector<16x1xf32>
    %cst_7 = arith.constant 3.200000e+01 : f32
    %16 = vector.broadcast %cst_7 : f32 to vector<16x1xf32>
    %17 = arith.divf %15, %16 : vector<16x1xf32>
    %18 = vector.broadcast %10 : vector<16x1xf32> to vector<16x32xf32>
    %19 = arith.subf %6, %18 : vector<16x32xf32>
    %cst_8 = arith.constant 9.99999974E-6 : f32
    %20 = vector.broadcast %cst_8 : f32 to vector<16x1xf32>
    %21 = arith.addf %17, %20 : vector<16x1xf32>
    %22 = math.rsqrt %21 : vector<16x1xf32>
    %23 = vector.broadcast %22 : vector<16x1xf32> to vector<16x32xf32>
    %24 = arith.mulf %19, %23 : vector<16x32xf32>
    %c0_9 = arith.constant 0 : index
    %c0_10 = arith.constant 0 : index
    %25 = vector.load %arg4[%c0_9, %c0_10] : memref<1x32xf32, #tpu.memory_space<vmem>>, vector<1x32xf32>
    %26 = vector.broadcast %25 : vector<1x32xf32> to vector<16x32xf32>
    %27 = arith.mulf %24, %26 : vector<16x32xf32>
    %c0_11 = arith.constant 0 : index
    %c0_12 = arith.constant 0 : index
    %28 = vector.load %arg5[%c0_11, %c0_12] : memref<1x32xf32, #tpu.memory_space<vmem>>, vector<1x32xf32>
    %29 = vector.broadcast %28 : vector<1x32xf32> to vector<16x32xf32>
    %30 = arith.addf %27, %29 : vector<16x32xf32>
    %31 = arith.truncf %30 : vector<16x32xf32> to vector<16x32xbf16>
    %c0_13 = arith.constant 0 : index
    %c0_14 = arith.constant 0 : index
    %32 = vector.load %arg6[%c0_13, %c0_14] : memref<16x32xbf16, #tpu.memory_space<vmem>>, vector<16x32xbf16>
    tpu.vector_store %arg6[%c0_13, %c0_14], %31 {strides = array<i32>} : memref<16x32xbf16, #tpu.memory_space<vmem>>, vector<16x32xbf16>,
    return
  }
  func.func @transform_0(%arg0: i32) -> (i32, i32) {
    %c0_i32 = arith.constant 0 : i32
    %c0_i32_0 = arith.constant 0 : i32
    return %arg0, %c0_i32 : i32, i32
  }
  func.func @transform_1(%arg0: i32) -> (i32, i32) {
    %c0_i32 = arith.constant 0 : i32
    %c0_i32_0 = arith.constant 0 : i32
    return %arg0, %c0_i32 : i32, i32
  }
  func.func @transform_2(%arg0: i32) -> (i32, i32) {
    %c0_i32 = arith.constant 0 : i32
    %c0_i32_0 = arith.constant 0 : i32
    return %arg0, %c0_i32 : i32, i32
  }
  func.func @transform_3(%arg0: i32) -> (i32, i32) {
    %c0_i32 = arith.constant 0 : i32
    %c0_i32_0 = arith.constant 0 : i32
    %c0_i32_1 = arith.constant 0 : i32
    return %c0_i32, %c0_i32_0 : i32, i32
  }
  func.func @transform_4(%arg0: i32) -> (i32, i32) {
    %c0_i32 = arith.constant 0 : i32
    %c0_i32_0 = arith.constant 0 : i32
    %c0_i32_1 = arith.constant 0 : i32
    return %c0_i32, %c0_i32_0 : i32, i32
  }
  func.func @transform_5(%arg0: i32) -> (i32, i32) {
    %c0_i32 = arith.constant 0 : i32
    %c0_i32_0 = arith.constant 0 : i32
    return %arg0, %c0_i32 : i32, i32
  }
}

module attributes {stable_mosaic.version = 11 : i64} {
  func.func @_add_ln_kernel(%arg0: i32, %arg1: memref<16x32xbf16, #tpu.memory_space<vmem>>, %arg2: memref<16x32xbf16, #tpu.memory_space<vmem>>, %arg3: memref<1x32xf32, #tpu.memory_space<vmem>>, %arg4: memref<1x32xf32, #tpu.memory_space<vmem>>, %arg5: memref<16x32xbf16, #tpu.memory_space<vmem>>) attributes {dimension_semantics = [#tpu.dimension_semantics<parallel>], iteration_bounds = array<i64: 1>, scalar_prefetch = 0 : i64, scratch_operands = 0 : i64, tpu.core_type = #tpu.core_type<tc>, window_params = [{transform_indices = @transform_0, window_bounds = array<i64: 16, 32>}, {transform_indices = @transform_1, window_bounds = array<i64: 16, 32>}, {pipeline_mode = #tpu.pipeline_mode<synchronous>, transform_indices = @transform_2, window_bounds = array<i64: 1, 32>}, {pipeline_mode = #tpu.pipeline_mode<synchronous>, transform_indices = @transform_3, window_bounds = array<i64: 1, 32>}, {transform_indices = @transform_4, window_bounds = array<i64: 16, 32>}]} {
    %c0 = arith.constant 0 : index
    %c0_0 = arith.constant 0 : index
    %0 = vector.load %arg1[%c0, %c0_0] : memref<16x32xbf16, #tpu.memory_space<vmem>>, vector<16x32xbf16>
    %1 = arith.extf %0 : vector<16x32xbf16> to vector<16x32xf32>
    %c0_1 = arith.constant 0 : index
    %c0_2 = arith.constant 0 : index
    %2 = vector.load %arg2[%c0_1, %c0_2] : memref<16x32xbf16, #tpu.memory_space<vmem>>, vector<16x32xbf16>
    %3 = arith.extf %2 : vector<16x32xbf16> to vector<16x32xf32>
    %4 = arith.addf %1, %3 : vector<16x32xf32>
    %cst = arith.constant dense<0.000000e+00> : vector<16xf32>
    %5 = vector.multi_reduction <add>, %4, %cst [1] : vector<16x32xf32> to vector<16xf32>
    %6 = vector.shape_cast %5 : vector<16xf32> to vector<16x1xf32>
    %cst_3 = arith.constant 3.200000e+01 : f32
    %7 = vector.broadcast %cst_3 : f32 to vector<16x1xf32>
    %8 = arith.divf %6, %7 : vector<16x1xf32>
    %9 = vector.broadcast %8 : vector<16x1xf32> to vector<16x32xf32>
    %10 = arith.subf %4, %9 : vector<16x32xf32>
    %11 = arith.mulf %10, %10 : vector<16x32xf32>
    %cst_4 = arith.constant dense<0.000000e+00> : vector<16xf32>
    %12 = vector.multi_reduction <add>, %11, %cst_4 [1] : vector<16x32xf32> to vector<16xf32>
    %13 = vector.shape_cast %12 : vector<16xf32> to vector<16x1xf32>
    %cst_5 = arith.constant 3.200000e+01 : f32
    %14 = vector.broadcast %cst_5 : f32 to vector<16x1xf32>
    %15 = arith.divf %13, %14 : vector<16x1xf32>
    %16 = vector.broadcast %8 : vector<16x1xf32> to vector<16x32xf32>
    %17 = arith.subf %4, %16 : vector<16x32xf32>
    %cst_6 = arith.constant 9.99999974E-6 : f32
    %18 = vector.broadcast %cst_6 : f32 to vector<16x1xf32>
    %19 = arith.addf %15, %18 : vector<16x1xf32>
    %20 = math.rsqrt %19 : vector<16x1xf32>
    %21 = vector.broadcast %20 : vector<16x1xf32> to vector<16x32xf32>
    %22 = arith.mulf %17, %21 : vector<16x32xf32>
    %c0_7 = arith.constant 0 : index
    %c0_8 = arith.constant 0 : index
    %23 = vector.load %arg3[%c0_7, %c0_8] : memref<1x32xf32, #tpu.memory_space<vmem>>, vector<1x32xf32>
    %24 = vector.broadcast %23 : vector<1x32xf32> to vector<16x32xf32>
    %25 = arith.mulf %22, %24 : vector<16x32xf32>
    %c0_9 = arith.constant 0 : index
    %c0_10 = arith.constant 0 : index
    %26 = vector.load %arg4[%c0_9, %c0_10] : memref<1x32xf32, #tpu.memory_space<vmem>>, vector<1x32xf32>
    %27 = vector.broadcast %26 : vector<1x32xf32> to vector<16x32xf32>
    %28 = arith.addf %25, %27 : vector<16x32xf32>
    %29 = arith.truncf %28 : vector<16x32xf32> to vector<16x32xbf16>
    %c0_11 = arith.constant 0 : index
    %c0_12 = arith.constant 0 : index
    %30 = vector.load %arg5[%c0_11, %c0_12] : memref<16x32xbf16, #tpu.memory_space<vmem>>, vector<16x32xbf16>
    tpu.vector_store %arg5[%c0_11, %c0_12], %29 {strides = array<i32>} : memref<16x32xbf16, #tpu.memory_space<vmem>>, vector<16x32xbf16>,
    return
  }
  func.func @transform_0(%arg0: i32) -> (i32, i32) {
    %c0_i32 = arith.constant 0 : i32
    %c0_i32_0 = arith.constant 0 : i32
    return %arg0, %c0_i32 : i32, i32
  }
  func.func @transform_1(%arg0: i32) -> (i32, i32) {
    %c0_i32 = arith.constant 0 : i32
    %c0_i32_0 = arith.constant 0 : i32
    return %arg0, %c0_i32 : i32, i32
  }
  func.func @transform_2(%arg0: i32) -> (i32, i32) {
    %c0_i32 = arith.constant 0 : i32
    %c0_i32_0 = arith.constant 0 : i32
    %c0_i32_1 = arith.constant 0 : i32
    return %c0_i32, %c0_i32_0 : i32, i32
  }
  func.func @transform_3(%arg0: i32) -> (i32, i32) {
    %c0_i32 = arith.constant 0 : i32
    %c0_i32_0 = arith.constant 0 : i32
    %c0_i32_1 = arith.constant 0 : i32
    return %c0_i32, %c0_i32_0 : i32, i32
  }
  func.func @transform_4(%arg0: i32) -> (i32, i32) {
    %c0_i32 = arith.constant 0 : i32
    %c0_i32_0 = arith.constant 0 : i32
    return %arg0, %c0_i32 : i32, i32
  }
}

module attributes {stable_mosaic.version = 11 : i64} {
  func.func @_multi_proj_single_kernel(%arg0: i32, %arg1: memref<16x32xbf16, #tpu.memory_space<vmem>>, %arg2: memref<16x1xf32, #tpu.memory_space<vmem>>, %arg3: memref<32x32xbf16, #tpu.memory_space<vmem>>, %arg4: memref<32x32xbf16, #tpu.memory_space<vmem>>, %arg5: memref<32x32xbf16, #tpu.memory_space<vmem>>, %arg6: memref<1x32xf32, #tpu.memory_space<vmem>>, %arg7: memref<1x32xf32, #tpu.memory_space<vmem>>, %arg8: memref<1x32xf32, #tpu.memory_space<vmem>>, %arg9: memref<16x32xbf16, #tpu.memory_space<vmem>>, %arg10: memref<16x32xbf16, #tpu.memory_space<vmem>>, %arg11: memref<16x32xbf16, #tpu.memory_space<vmem>>) attributes {dimension_semantics = [#tpu.dimension_semantics<parallel>], iteration_bounds = array<i64: 1>, scalar_prefetch = 0 : i64, scratch_operands = 0 : i64, tpu.core_type = #tpu.core_type<tc>, window_params = [{transform_indices = @transform_0, window_bounds = array<i64: 16, 32>}, {transform_indices = @transform_1, window_bounds = array<i64: 16, 1>}, {pipeline_mode = #tpu.pipeline_mode<synchronous>, transform_indices = @transform_2, window_bounds = array<i64: 32, 32>}, {pipeline_mode = #tpu.pipeline_mode<synchronous>, transform_indices = @transform_3, window_bounds = array<i64: 32, 32>}, {pipeline_mode = #tpu.pipeline_mode<synchronous>, transform_indices = @transform_4, window_bounds = array<i64: 32, 32>}, {pipeline_mode = #tpu.pipeline_mode<synchronous>, transform_indices = @transform_5, window_bounds = array<i64: 1, 32>}, {pipeline_mode = #tpu.pipeline_mode<synchronous>, transform_indices = @transform_6, window_bounds = array<i64: 1, 32>}, {pipeline_mode = #tpu.pipeline_mode<synchronous>, transform_indices = @transform_7, window_bounds = array<i64: 1, 32>}, {transform_indices = @transform_8, window_bounds = array<i64: 16, 32>}, {transform_indices = @transform_9, window_bounds = array<i64: 16, 32>}, {transform_indices = @transform_10, window_bounds = array<i64: 16, 32>}]} {
    %c0 = arith.constant 0 : index
    %c0_0 = arith.constant 0 : index
    %0 = vector.load %arg1[%c0, %c0_0] : memref<16x32xbf16, #tpu.memory_space<vmem>>, vector<16x32xbf16>
    %c0_1 = arith.constant 0 : index
    %c0_2 = arith.constant 0 : index
    %1 = vector.load %arg2[%c0_1, %c0_2] : memref<16x1xf32, #tpu.memory_space<vmem>>, vector<16x1xf32>
    %2 = arith.truncf %1 : vector<16x1xf32> to vector<16x1xbf16>
    %3 = vector.broadcast %2 : vector<16x1xbf16> to vector<16x32xbf16>
    %4 = arith.mulf %0, %3 : vector<16x32xbf16>
    %c0_3 = arith.constant 0 : index
    %c0_4 = arith.constant 0 : index
    %5 = vector.load %arg3[%c0_3, %c0_4] : memref<32x32xbf16, #tpu.memory_space<vmem>>, vector<32x32xbf16>
    %cst = arith.constant dense<0.000000e+00> : vector<16x32xf32>
    %6 = tpu.matmul %4, %5, %cst {dimension_numbers = #tpu.dot_dimension_numbers<[1], [0], [0], [1], [0, 0, 1, 1], [], []>} : vector<16x32xbf16>, vector<32x32xbf16>, vector<16x32xf32> -> vector<16x32xf32>
    %c0_5 = arith.constant 0 : index
    %c0_6 = arith.constant 0 : index
    %7 = vector.load %arg6[%c0_5, %c0_6] : memref<1x32xf32, #tpu.memory_space<vmem>>, vector<1x32xf32>
    %8 = vector.broadcast %7 : vector<1x32xf32> to vector<16x32xf32>
    %9 = arith.addf %6, %8 : vector<16x32xf32>
    %10 = arith.truncf %9 : vector<16x32xf32> to vector<16x32xbf16>
    %c0_7 = arith.constant 0 : index
    %c0_8 = arith.constant 0 : index
    %11 = vector.load %arg9[%c0_7, %c0_8] : memref<16x32xbf16, #tpu.memory_space<vmem>>, vector<16x32xbf16>
    tpu.vector_store %arg9[%c0_7, %c0_8], %10 {strides = array<i32>} : memref<16x32xbf16, #tpu.memory_space<vmem>>, vector<16x32xbf16>,
    %c0_9 = arith.constant 0 : index
    %c0_10 = arith.constant 0 : index
    %12 = vector.load %arg4[%c0_9, %c0_10] : memref<32x32xbf16, #tpu.memory_space<vmem>>, vector<32x32xbf16>
    %cst_11 = arith.constant dense<0.000000e+00> : vector<16x32xf32>
    %13 = tpu.matmul %4, %12, %cst_11 {dimension_numbers = #tpu.dot_dimension_numbers<[1], [0], [0], [1], [0, 0, 1, 1], [], []>} : vector<16x32xbf16>, vector<32x32xbf16>, vector<16x32xf32> -> vector<16x32xf32>
    %c0_12 = arith.constant 0 : index
    %c0_13 = arith.constant 0 : index
    %14 = vector.load %arg7[%c0_12, %c0_13] : memref<1x32xf32, #tpu.memory_space<vmem>>, vector<1x32xf32>
    %15 = vector.broadcast %14 : vector<1x32xf32> to vector<16x32xf32>
    %16 = arith.addf %13, %15 : vector<16x32xf32>
    %17 = arith.truncf %16 : vector<16x32xf32> to vector<16x32xbf16>
    %c0_14 = arith.constant 0 : index
    %c0_15 = arith.constant 0 : index
    %18 = vector.load %arg10[%c0_14, %c0_15] : memref<16x32xbf16, #tpu.memory_space<vmem>>, vector<16x32xbf16>
    tpu.vector_store %arg10[%c0_14, %c0_15], %17 {strides = array<i32>} : memref<16x32xbf16, #tpu.memory_space<vmem>>, vector<16x32xbf16>,
    %c0_16 = arith.constant 0 : index
    %c0_17 = arith.constant 0 : index
    %19 = vector.load %arg5[%c0_16, %c0_17] : memref<32x32xbf16, #tpu.memory_space<vmem>>, vector<32x32xbf16>
    %cst_18 = arith.constant dense<0.000000e+00> : vector<16x32xf32>
    %20 = tpu.matmul %4, %19, %cst_18 {dimension_numbers = #tpu.dot_dimension_numbers<[1], [0], [0], [1], [0, 0, 1, 1], [], []>} : vector<16x32xbf16>, vector<32x32xbf16>, vector<16x32xf32> -> vector<16x32xf32>
    %c0_19 = arith.constant 0 : index
    %c0_20 = arith.constant 0 : index
    %21 = vector.load %arg8[%c0_19, %c0_20] : memref<1x32xf32, #tpu.memory_space<vmem>>, vector<1x32xf32>
    %22 = vector.broadcast %21 : vector<1x32xf32> to vector<16x32xf32>
    %23 = arith.addf %20, %22 : vector<16x32xf32>
    %24 = arith.truncf %23 : vector<16x32xf32> to vector<16x32xbf16>
    %c0_21 = arith.constant 0 : index
    %c0_22 = arith.constant 0 : index
    %25 = vector.load %arg11[%c0_21, %c0_22] : memref<16x32xbf16, #tpu.memory_space<vmem>>, vector<16x32xbf16>
    tpu.vector_store %arg11[%c0_21, %c0_22], %24 {strides = array<i32>} : memref<16x32xbf16, #tpu.memory_space<vmem>>, vector<16x32xbf16>,
    return
  }
  func.func @transform_0(%arg0: i32) -> (i32, i32) {
    %c0_i32 = arith.constant 0 : i32
    %c0_i32_0 = arith.constant 0 : i32
    return %arg0, %c0_i32 : i32, i32
  }
  func.func @transform_1(%arg0: i32) -> (i32, i32) {
    %c0_i32 = arith.constant 0 : i32
    %c0_i32_0 = arith.constant 0 : i32
    return %arg0, %c0_i32 : i32, i32
  }
  func.func @transform_2(%arg0: i32) -> (i32, i32) {
    %c0_i32 = arith.constant 0 : i32
    %c0_i32_0 = arith.constant 0 : i32
    %c0_i32_1 = arith.constant 0 : i32
    return %c0_i32, %c0_i32_0 : i32, i32
  }
  func.func @transform_3(%arg0: i32) -> (i32, i32) {
    %c0_i32 = arith.constant 0 : i32
    %c0_i32_0 = arith.constant 0 : i32
    %c0_i32_1 = arith.constant 0 : i32
    return %c0_i32, %c0_i32_0 : i32, i32
  }
  func.func @transform_4(%arg0: i32) -> (i32, i32) {
    %c0_i32 = arith.constant 0 : i32
    %c0_i32_0 = arith.constant 0 : i32
    %c0_i32_1 = arith.constant 0 : i32
    return %c0_i32, %c0_i32_0 : i32, i32
  }
  func.func @transform_5(%arg0: i32) -> (i32, i32) {
    %c0_i32 = arith.constant 0 : i32
    %c0_i32_0 = arith.constant 0 : i32
    %c0_i32_1 = arith.constant 0 : i32
    return %c0_i32, %c0_i32_0 : i32, i32
  }
  func.func @transform_6(%arg0: i32) -> (i32, i32) {
    %c0_i32 = arith.constant 0 : i32
    %c0_i32_0 = arith.constant 0 : i32
    %c0_i32_1 = arith.constant 0 : i32
    return %c0_i32, %c0_i32_0 : i32, i32
  }
  func.func @transform_7(%arg0: i32) -> (i32, i32) {
    %c0_i32 = arith.constant 0 : i32
    %c0_i32_0 = arith.constant 0 : i32
    %c0_i32_1 = arith.constant 0 : i32
    return %c0_i32, %c0_i32_0 : i32, i32
  }
  func.func @transform_8(%arg0: i32) -> (i32, i32) {
    %c0_i32 = arith.constant 0 : i32
    %c0_i32_0 = arith.constant 0 : i32
    return %arg0, %c0_i32 : i32, i32
  }
  func.func @transform_9(%arg0: i32) -> (i32, i32) {
    %c0_i32 = arith.constant 0 : i32
    %c0_i32_0 = arith.constant 0 : i32
    return %arg0, %c0_i32 : i32, i32
  }
  func.func @transform_10(%arg0: i32) -> (i32, i32) {
    %c0_i32 = arith.constant 0 : i32
    %c0_i32_0 = arith.constant 0 : i32
    return %arg0, %c0_i32 : i32, i32
  }
}

module attributes {stable_mosaic.version = 11 : i64} {
  func.func @_add_ln_kernel(%arg0: i32, %arg1: memref<16x32xbf16, #tpu.memory_space<vmem>>, %arg2: memref<16x32xbf16, #tpu.memory_space<vmem>>, %arg3: memref<16x1xf32, #tpu.memory_space<vmem>>, %arg4: memref<1x32xf32, #tpu.memory_space<vmem>>, %arg5: memref<1x32xf32, #tpu.memory_space<vmem>>, %arg6: memref<16x32xbf16, #tpu.memory_space<vmem>>) attributes {dimension_semantics = [#tpu.dimension_semantics<parallel>], iteration_bounds = array<i64: 1>, scalar_prefetch = 0 : i64, scratch_operands = 0 : i64, tpu.core_type = #tpu.core_type<tc>, window_params = [{transform_indices = @transform_0, window_bounds = array<i64: 16, 32>}, {transform_indices = @transform_1, window_bounds = array<i64: 16, 32>}, {transform_indices = @transform_2, window_bounds = array<i64: 16, 1>}, {pipeline_mode = #tpu.pipeline_mode<synchronous>, transform_indices = @transform_3, window_bounds = array<i64: 1, 32>}, {pipeline_mode = #tpu.pipeline_mode<synchronous>, transform_indices = @transform_4, window_bounds = array<i64: 1, 32>}, {transform_indices = @transform_5, window_bounds = array<i64: 16, 32>}]} {
    %c0 = arith.constant 0 : index
    %c0_0 = arith.constant 0 : index
    %0 = vector.load %arg1[%c0, %c0_0] : memref<16x32xbf16, #tpu.memory_space<vmem>>, vector<16x32xbf16>
    %1 = arith.extf %0 : vector<16x32xbf16> to vector<16x32xf32>
    %c0_1 = arith.constant 0 : index
    %c0_2 = arith.constant 0 : index
    %2 = vector.load %arg3[%c0_1, %c0_2] : memref<16x1xf32, #tpu.memory_space<vmem>>, vector<16x1xf32>
    %3 = vector.broadcast %2 : vector<16x1xf32> to vector<16x32xf32>
    %4 = arith.mulf %1, %3 : vector<16x32xf32>
    %c0_3 = arith.constant 0 : index
    %c0_4 = arith.constant 0 : index
    %5 = vector.load %arg2[%c0_3, %c0_4] : memref<16x32xbf16, #tpu.memory_space<vmem>>, vector<16x32xbf16>
    %6 = arith.extf %5 : vector<16x32xbf16> to vector<16x32xf32>
    %7 = arith.addf %4, %6 : vector<16x32xf32>
    %cst = arith.constant dense<0.000000e+00> : vector<16xf32>
    %8 = vector.multi_reduction <add>, %7, %cst [1] : vector<16x32xf32> to vector<16xf32>
    %9 = vector.shape_cast %8 : vector<16xf32> to vector<16x1xf32>
    %cst_5 = arith.constant 3.200000e+01 : f32
    %10 = vector.broadcast %cst_5 : f32 to vector<16x1xf32>
    %11 = arith.divf %9, %10 : vector<16x1xf32>
    %12 = vector.broadcast %11 : vector<16x1xf32> to vector<16x32xf32>
    %13 = arith.subf %7, %12 : vector<16x32xf32>
    %14 = arith.mulf %13, %13 : vector<16x32xf32>
    %cst_6 = arith.constant dense<0.000000e+00> : vector<16xf32>
    %15 = vector.multi_reduction <add>, %14, %cst_6 [1] : vector<16x32xf32> to vector<16xf32>
    %16 = vector.shape_cast %15 : vector<16xf32> to vector<16x1xf32>
    %cst_7 = arith.constant 3.200000e+01 : f32
    %17 = vector.broadcast %cst_7 : f32 to vector<16x1xf32>
    %18 = arith.divf %16, %17 : vector<16x1xf32>
    %19 = vector.broadcast %11 : vector<16x1xf32> to vector<16x32xf32>
    %20 = arith.subf %7, %19 : vector<16x32xf32>
    %cst_8 = arith.constant 9.99999974E-6 : f32
    %21 = vector.broadcast %cst_8 : f32 to vector<16x1xf32>
    %22 = arith.addf %18, %21 : vector<16x1xf32>
    %23 = math.rsqrt %22 : vector<16x1xf32>
    %24 = vector.broadcast %23 : vector<16x1xf32> to vector<16x32xf32>
    %25 = arith.mulf %20, %24 : vector<16x32xf32>
    %c0_9 = arith.constant 0 : index
    %c0_10 = arith.constant 0 : index
    %26 = vector.load %arg4[%c0_9, %c0_10] : memref<1x32xf32, #tpu.memory_space<vmem>>, vector<1x32xf32>
    %27 = vector.broadcast %26 : vector<1x32xf32> to vector<16x32xf32>
    %28 = arith.mulf %25, %27 : vector<16x32xf32>
    %c0_11 = arith.constant 0 : index
    %c0_12 = arith.constant 0 : index
    %29 = vector.load %arg5[%c0_11, %c0_12] : memref<1x32xf32, #tpu.memory_space<vmem>>, vector<1x32xf32>
    %30 = vector.broadcast %29 : vector<1x32xf32> to vector<16x32xf32>
    %31 = arith.addf %28, %30 : vector<16x32xf32>
    %32 = arith.truncf %31 : vector<16x32xf32> to vector<16x32xbf16>
    %c0_13 = arith.constant 0 : index
    %c0_14 = arith.constant 0 : index
    %33 = vector.load %arg6[%c0_13, %c0_14] : memref<16x32xbf16, #tpu.memory_space<vmem>>, vector<16x32xbf16>
    tpu.vector_store %arg6[%c0_13, %c0_14], %32 {strides = array<i32>} : memref<16x32xbf16, #tpu.memory_space<vmem>>, vector<16x32xbf16>,
    return
  }
  func.func @transform_0(%arg0: i32) -> (i32, i32) {
    %c0_i32 = arith.constant 0 : i32
    %c0_i32_0 = arith.constant 0 : i32
    return %arg0, %c0_i32 : i32, i32
  }
  func.func @transform_1(%arg0: i32) -> (i32, i32) {
    %c0_i32 = arith.constant 0 : i32
    %c0_i32_0 = arith.constant 0 : i32
    return %arg0, %c0_i32 : i32, i32
  }
  func.func @transform_2(%arg0: i32) -> (i32, i32) {
    %c0_i32 = arith.constant 0 : i32
    %c0_i32_0 = arith.constant 0 : i32
    return %arg0, %c0_i32 : i32, i32
  }
  func.func @transform_3(%arg0: i32) -> (i32, i32) {
    %c0_i32 = arith.constant 0 : i32
    %c0_i32_0 = arith.constant 0 : i32
    %c0_i32_1 = arith.constant 0 : i32
    return %c0_i32, %c0_i32_0 : i32, i32
  }
  func.func @transform_4(%arg0: i32) -> (i32, i32) {
    %c0_i32 = arith.constant 0 : i32
    %c0_i32_0 = arith.constant 0 : i32
    %c0_i32_1 = arith.constant 0 : i32
    return %c0_i32, %c0_i32_0 : i32, i32
  }
  func.func @transform_5(%arg0: i32) -> (i32, i32) {
    %c0_i32 = arith.constant 0 : i32
    %c0_i32_0 = arith.constant 0 : i32
    return %arg0, %c0_i32 : i32, i32
  }
}

module attributes {stable_mosaic.version = 11 : i64} {
  func.func @_multi_proj_single_kernel(%arg0: i32, %arg1: memref<16x32xbf16, #tpu.memory_space<vmem>>, %arg2: memref<32x32xbf16, #tpu.memory_space<vmem>>, %arg3: memref<32x32xbf16, #tpu.memory_space<vmem>>, %arg4: memref<1x32xf32, #tpu.memory_space<vmem>>, %arg5: memref<1x32xf32, #tpu.memory_space<vmem>>, %arg6: memref<16x32xbf16, #tpu.memory_space<vmem>>, %arg7: memref<16x32xbf16, #tpu.memory_space<vmem>>) attributes {dimension_semantics = [#tpu.dimension_semantics<parallel>], iteration_bounds = array<i64: 1>, scalar_prefetch = 0 : i64, scratch_operands = 0 : i64, tpu.core_type = #tpu.core_type<tc>, window_params = [{transform_indices = @transform_0, window_bounds = array<i64: 16, 32>}, {pipeline_mode = #tpu.pipeline_mode<synchronous>, transform_indices = @transform_1, window_bounds = array<i64: 32, 32>}, {pipeline_mode = #tpu.pipeline_mode<synchronous>, transform_indices = @transform_2, window_bounds = array<i64: 32, 32>}, {pipeline_mode = #tpu.pipeline_mode<synchronous>, transform_indices = @transform_3, window_bounds = array<i64: 1, 32>}, {pipeline_mode = #tpu.pipeline_mode<synchronous>, transform_indices = @transform_4, window_bounds = array<i64: 1, 32>}, {transform_indices = @transform_5, window_bounds = array<i64: 16, 32>}, {transform_indices = @transform_6, window_bounds = array<i64: 16, 32>}]} {
    %c0 = arith.constant 0 : index
    %c0_0 = arith.constant 0 : index
    %0 = vector.load %arg1[%c0, %c0_0] : memref<16x32xbf16, #tpu.memory_space<vmem>>, vector<16x32xbf16>
    %c0_1 = arith.constant 0 : index
    %c0_2 = arith.constant 0 : index
    %1 = vector.load %arg2[%c0_1, %c0_2] : memref<32x32xbf16, #tpu.memory_space<vmem>>, vector<32x32xbf16>
    %cst = arith.constant dense<0.000000e+00> : vector<16x32xf32>
    %2 = tpu.matmul %0, %1, %cst {dimension_numbers = #tpu.dot_dimension_numbers<[1], [0], [0], [1], [0, 0, 1, 1], [], []>} : vector<16x32xbf16>, vector<32x32xbf16>, vector<16x32xf32> -> vector<16x32xf32>
    %c0_3 = arith.constant 0 : index
    %c0_4 = arith.constant 0 : index
    %3 = vector.load %arg4[%c0_3, %c0_4] : memref<1x32xf32, #tpu.memory_space<vmem>>, vector<1x32xf32>
    %4 = vector.broadcast %3 : vector<1x32xf32> to vector<16x32xf32>
    %5 = arith.addf %2, %4 : vector<16x32xf32>
    %6 = arith.truncf %5 : vector<16x32xf32> to vector<16x32xbf16>
    %c0_5 = arith.constant 0 : index
    %c0_6 = arith.constant 0 : index
    %7 = vector.load %arg6[%c0_5, %c0_6] : memref<16x32xbf16, #tpu.memory_space<vmem>>, vector<16x32xbf16>
    tpu.vector_store %arg6[%c0_5, %c0_6], %6 {strides = array<i32>} : memref<16x32xbf16, #tpu.memory_space<vmem>>, vector<16x32xbf16>,
    %c0_7 = arith.constant 0 : index
    %c0_8 = arith.constant 0 : index
    %8 = vector.load %arg3[%c0_7, %c0_8] : memref<32x32xbf16, #tpu.memory_space<vmem>>, vector<32x32xbf16>
    %cst_9 = arith.constant dense<0.000000e+00> : vector<16x32xf32>
    %9 = tpu.matmul %0, %8, %cst_9 {dimension_numbers = #tpu.dot_dimension_numbers<[1], [0], [0], [1], [0, 0, 1, 1], [], []>} : vector<16x32xbf16>, vector<32x32xbf16>, vector<16x32xf32> -> vector<16x32xf32>
    %c0_10 = arith.constant 0 : index
    %c0_11 = arith.constant 0 : index
    %10 = vector.load %arg5[%c0_10, %c0_11] : memref<1x32xf32, #tpu.memory_space<vmem>>, vector<1x32xf32>
    %11 = vector.broadcast %10 : vector<1x32xf32> to vector<16x32xf32>
    %12 = arith.addf %9, %11 : vector<16x32xf32>
    %13 = arith.truncf %12 : vector<16x32xf32> to vector<16x32xbf16>
    %c0_12 = arith.constant 0 : index
    %c0_13 = arith.constant 0 : index
    %14 = vector.load %arg7[%c0_12, %c0_13] : memref<16x32xbf16, #tpu.memory_space<vmem>>, vector<16x32xbf16>
    tpu.vector_store %arg7[%c0_12, %c0_13], %13 {strides = array<i32>} : memref<16x32xbf16, #tpu.memory_space<vmem>>, vector<16x32xbf16>,
    return
  }
  func.func @transform_0(%arg0: i32) -> (i32, i32) {
    %c0_i32 = arith.constant 0 : i32
    %c0_i32_0 = arith.constant 0 : i32
    return %arg0, %c0_i32 : i32, i32
  }
  func.func @transform_1(%arg0: i32) -> (i32, i32) {
    %c0_i32 = arith.constant 0 : i32
    %c0_i32_0 = arith.constant 0 : i32
    %c0_i32_1 = arith.constant 0 : i32
    return %c0_i32, %c0_i32_0 : i32, i32
  }
  func.func @transform_2(%arg0: i32) -> (i32, i32) {
    %c0_i32 = arith.constant 0 : i32
    %c0_i32_0 = arith.constant 0 : i32
    %c0_i32_1 = arith.constant 0 : i32
    return %c0_i32, %c0_i32_0 : i32, i32
  }
  func.func @transform_3(%arg0: i32) -> (i32, i32) {
    %c0_i32 = arith.constant 0 : i32
    %c0_i32_0 = arith.constant 0 : i32
    %c0_i32_1 = arith.constant 0 : i32
    return %c0_i32, %c0_i32_0 : i32, i32
  }
  func.func @transform_4(%arg0: i32) -> (i32, i32) {
    %c0_i32 = arith.constant 0 : i32
    %c0_i32_0 = arith.constant 0 : i32
    %c0_i32_1 = arith.constant 0 : i32
    return %c0_i32, %c0_i32_0 : i32, i32
  }
  func.func @transform_5(%arg0: i32) -> (i32, i32) {
    %c0_i32 = arith.constant 0 : i32
    %c0_i32_0 = arith.constant 0 : i32
    return %arg0, %c0_i32 : i32, i32
  }
  func.func @transform_6(%arg0: i32) -> (i32, i32) {
    %c0_i32 = arith.constant 0 : i32
    %c0_i32_0 = arith.constant 0 : i32
    return %arg0, %c0_i32 : i32, i32
  }
}

module attributes {stable_mosaic.version = 11 : i64} {
  func.func @_attn_kernel(%arg0: i32, %arg1: i32, %arg2: memref<1x8x32xbf16, #tpu.memory_space<vmem>>, %arg3: memref<1x8x32xbf16, #tpu.memory_space<vmem>>, %arg4: memref<1x8x32xbf16, #tpu.memory_space<vmem>>, %arg5: memref<1x1x8xf32, #tpu.memory_space<vmem>>, %arg6: memref<32x32xbf16, #tpu.memory_space<vmem>>, %arg7: memref<1x32xf32, #tpu.memory_space<vmem>>, %arg8: memref<1x8x32xbf16, #tpu.memory_space<vmem>>, %arg9: memref<8x32xbf16, #tpu.memory_space<vmem>>) attributes {dimension_semantics = [#tpu.dimension_semantics<parallel>, #tpu.dimension_semantics<parallel>], iteration_bounds = array<i64: 2, 1>, scalar_prefetch = 0 : i64, scratch_operands = 1 : i64, tpu.core_type = #tpu.core_type<tc>, window_params = [{transform_indices = @transform_0, window_bounds = array<i64: 1, 8, 32>}, {transform_indices = @transform_1, window_bounds = array<i64: 1, 8, 32>}, {transform_indices = @transform_2, window_bounds = array<i64: 1, 8, 32>}, {transform_indices = @transform_3, window_bounds = array<i64: 1, 1, 8>}, {pipeline_mode = #tpu.pipeline_mode<synchronous>, transform_indices = @transform_4, window_bounds = array<i64: 32, 32>}, {pipeline_mode = #tpu.pipeline_mode<synchronous>, transform_indices = @transform_5, window_bounds = array<i64: 1, 32>}, {transform_indices = @transform_6, window_bounds = array<i64: 1, 8, 32>}]} {
    %c0 = arith.constant 0 : index
    %c0_0 = arith.constant 0 : index
    %c0_1 = arith.constant 0 : index
    %0 = vector.load %arg5[%c0, %c0_0, %c0_1] : memref<1x1x8xf32, #tpu.memory_space<vmem>>, vector<1x1x8xf32>
    %1 = vector.shape_cast %0 : vector<1x1x8xf32> to vector<1x8xf32>
    %cst = arith.constant 0.000000e+00 : f32
    %2 = vector.broadcast %cst : f32 to vector<1x8xf32>
    %3 = arith.cmpf ogt, %1, %2 : vector<1x8xf32>
    %cst_2 = arith.constant 0.000000e+00 : f32
    %cst_3 = arith.constant -1.000000e+30 : f32
    %4 = vector.broadcast %cst_2 : f32 to vector<1x8xf32>
    %5 = vector.broadcast %cst_3 : f32 to vector<1x8xf32>
    %6 = arith.select %3, %4, %5 : vector<1x8xi1>, vector<1x8xf32>
    %c8_i32 = arith.constant 8 : i32
    %7 = arith.muli %arg1, %c8_i32 : i32
    %8 = tpu.iota {dimensions = array<i32: 0>} : vector<8x8xi32>
    %9 = vector.broadcast %7 : i32 to vector<8x8xi32>
    %10 = arith.addi %8, %9 : vector<8x8xi32>
    %11 = tpu.iota {dimensions = array<i32: 1>} : vector<8x8xi32>
    %c0_i32 = arith.constant 0 : i32
    %12 = vector.broadcast %c0_i32 : i32 to vector<8x8xi32>
    %13 = arith.addi %10, %12 : vector<8x8xi32>
    %14 = arith.cmpi sle, %11, %13 : vector<8x8xi32>
    %cst_4 = arith.constant -1.000000e+30 : f32
    %15 = vector.shape_cast %6 : vector<1x8xf32> to vector<1x8xf32>
    %16 = vector.broadcast %15 : vector<1x8xf32> to vector<8x8xf32>
    %17 = vector.broadcast %cst_4 : f32 to vector<8x8xf32>
    %18 = arith.select %14, %16, %17 : vector<8x8xi1>, vector<8x8xf32>
    %c0_5 = arith.constant 0 : index
    %c0_6 = arith.constant 0 : index
    %c0_7 = arith.constant 0 : index
    %19 = vector.load %arg2[%c0_5, %c0_6, %c0_7] : memref<1x8x32xbf16, #tpu.memory_space<vmem>>, vector<1x8x8xbf16>
    %20 = vector.shape_cast %19 : vector<1x8x8xbf16> to vector<8x8xbf16>
    %c0_8 = arith.constant 0 : index
    %c0_9 = arith.constant 0 : index
    %c0_10 = arith.constant 0 : index
    %21 = vector.load %arg3[%c0_8, %c0_9, %c0_10] : memref<1x8x32xbf16, #tpu.memory_space<vmem>>, vector<1x8x8xbf16>
    %22 = vector.shape_cast %21 : vector<1x8x8xbf16> to vector<8x8xbf16>
    %c0_11 = arith.constant 0 : index
    %c0_12 = arith.constant 0 : index
    %c0_13 = arith.constant 0 : index
    %23 = vector.load %arg4[%c0_11, %c0_12, %c0_13] : memref<1x8x32xbf16, #tpu.memory_space<vmem>>, vector<1x8x8xbf16>
    %24 = vector.shape_cast %23 : vector<1x8x8xbf16> to vector<8x8xbf16>
    %cst_14 = arith.constant dense<0.000000e+00> : vector<8x8xf32>
    %25 = tpu.matmul %20, %22, %cst_14 {dimension_numbers = #tpu.dot_dimension_numbers<[1], [1], [0], [0], [0, 0, 1, 0], [], []>} : vector<8x8xbf16>, vector<8x8xbf16>, vector<8x8xf32> -> vector<8x8xf32>
    %cst_15 = arith.constant 0.353553385 : f32
    %26 = vector.broadcast %cst_15 : f32 to vector<8x8xf32>
    %27 = arith.mulf %25, %26 : vector<8x8xf32>
    %28 = arith.addf %27, %18 : vector<8x8xf32>
    %cst_16 = arith.constant dense<0xFF800000> : vector<8xf32>
    %29 = vector.multi_reduction <maximumf>, %28, %cst_16 [1] : vector<8x8xf32> to vector<8xf32>
    %30 = vector.shape_cast %29 : vector<8xf32> to vector<8x1xf32>
    %31 = vector.broadcast %30 : vector<8x1xf32> to vector<8x8xf32>
    %32 = arith.subf %28, %31 : vector<8x8xf32>
    %33 = math.exp %32 : vector<8x8xf32>
    %cst_17 = arith.constant dense<0.000000e+00> : vector<8xf32>
    %34 = vector.multi_reduction <add>, %33, %cst_17 [1] : vector<8x8xf32> to vector<8xf32>
    %35 = vector.shape_cast %34 : vector<8xf32> to vector<8x1xf32>
    %36 = tpu.reciprocal %35 {approx = true} : vector<8x1xf32> -> vector<8x1xf32>
    %37 = vector.broadcast %36 : vector<8x1xf32> to vector<8x8xf32>
    %38 = arith.mulf %33, %37 : vector<8x8xf32>
    %39 = arith.truncf %38 : vector<8x8xf32> to vector<8x8xbf16>
    %cst_18 = arith.constant dense<0.000000e+00> : vector<8x8xf32>
    %40 = tpu.matmul %39, %24, %cst_18 {dimension_numbers = #tpu.dot_dimension_numbers<[1], [0], [0], [1], [0, 0, 1, 1], [], []>} : vector<8x8xbf16>, vector<8x8xbf16>, vector<8x8xf32> -> vector<8x8xf32>
    %41 = arith.truncf %40 : vector<8x8xf32> to vector<8x8xbf16>
    %c0_19 = arith.constant 0 : index
    %c0_20 = arith.constant 0 : index
    %42 = vector.load %arg9[%c0_19, %c0_20] : memref<8x32xbf16, #tpu.memory_space<vmem>>, vector<8x8xbf16>
    tpu.vector_store %arg9[%c0_19, %c0_20], %41 {strides = array<i32>} : memref<8x32xbf16, #tpu.memory_space<vmem>>, vector<8x8xbf16>,
    %c0_21 = arith.constant 0 : index
    %c0_22 = arith.constant 0 : index
    %c8 = arith.constant 8 : index
    %43 = vector.load %arg2[%c0_21, %c0_22, %c8] : memref<1x8x32xbf16, #tpu.memory_space<vmem>>, vector<1x8x8xbf16>
    %44 = vector.shape_cast %43 : vector<1x8x8xbf16> to vector<8x8xbf16>
    %c0_23 = arith.constant 0 : index
    %c0_24 = arith.constant 0 : index
    %c8_25 = arith.constant 8 : index
    %45 = vector.load %arg3[%c0_23, %c0_24, %c8_25] : memref<1x8x32xbf16, #tpu.memory_space<vmem>>, vector<1x8x8xbf16>
    %46 = vector.shape_cast %45 : vector<1x8x8xbf16> to vector<8x8xbf16>
    %c0_26 = arith.constant 0 : index
    %c0_27 = arith.constant 0 : index
    %c8_28 = arith.constant 8 : index
    %47 = vector.load %arg4[%c0_26, %c0_27, %c8_28] : memref<1x8x32xbf16, #tpu.memory_space<vmem>>, vector<1x8x8xbf16>
    %48 = vector.shape_cast %47 : vector<1x8x8xbf16> to vector<8x8xbf16>
    %cst_29 = arith.constant dense<0.000000e+00> : vector<8x8xf32>
    %49 = tpu.matmul %44, %46, %cst_29 {dimension_numbers = #tpu.dot_dimension_numbers<[1], [1], [0], [0], [0, 0, 1, 0], [], []>} : vector<8x8xbf16>, vector<8x8xbf16>, vector<8x8xf32> -> vector<8x8xf32>
    %cst_30 = arith.constant 0.353553385 : f32
    %50 = vector.broadcast %cst_30 : f32 to vector<8x8xf32>
    %51 = arith.mulf %49, %50 : vector<8x8xf32>
    %52 = arith.addf %51, %18 : vector<8x8xf32>
    %cst_31 = arith.constant dense<0xFF800000> : vector<8xf32>
    %53 = vector.multi_reduction <maximumf>, %52, %cst_31 [1] : vector<8x8xf32> to vector<8xf32>
    %54 = vector.shape_cast %53 : vector<8xf32> to vector<8x1xf32>
    %55 = vector.broadcast %54 : vector<8x1xf32> to vector<8x8xf32>
    %56 = arith.subf %52, %55 : vector<8x8xf32>
    %57 = math.exp %56 : vector<8x8xf32>
    %cst_32 = arith.constant dense<0.000000e+00> : vector<8xf32>
    %58 = vector.multi_reduction <add>, %57, %cst_32 [1] : vector<8x8xf32> to vector<8xf32>
    %59 = vector.shape_cast %58 : vector<8xf32> to vector<8x1xf32>
    %60 = tpu.reciprocal %59 {approx = true} : vector<8x1xf32> -> vector<8x1xf32>
    %61 = vector.broadcast %60 : vector<8x1xf32> to vector<8x8xf32>
    %62 = arith.mulf %57, %61 : vector<8x8xf32>
    %63 = arith.truncf %62 : vector<8x8xf32> to vector<8x8xbf16>
    %cst_33 = arith.constant dense<0.000000e+00> : vector<8x8xf32>
    %64 = tpu.matmul %63, %48, %cst_33 {dimension_numbers = #tpu.dot_dimension_numbers<[1], [0], [0], [1], [0, 0, 1, 1], [], []>} : vector<8x8xbf16>, vector<8x8xbf16>, vector<8x8xf32> -> vector<8x8xf32>
    %65 = arith.truncf %64 : vector<8x8xf32> to vector<8x8xbf16>
    %c0_34 = arith.constant 0 : index
    %c8_35 = arith.constant 8 : index
    %66 = vector.load %arg9[%c0_34, %c8_35] : memref<8x32xbf16, #tpu.memory_space<vmem>>, vector<8x8xbf16>
    tpu.vector_store %arg9[%c0_34, %c8_35], %65 {strides = array<i32>} : memref<8x32xbf16, #tpu.memory_space<vmem>>, vector<8x8xbf16>,
    %c0_36 = arith.constant 0 : index
    %c0_37 = arith.constant 0 : index
    %c16 = arith.constant 16 : index
    %67 = vector.load %arg2[%c0_36, %c0_37, %c16] : memref<1x8x32xbf16, #tpu.memory_space<vmem>>, vector<1x8x8xbf16>
    %68 = vector.shape_cast %67 : vector<1x8x8xbf16> to vector<8x8xbf16>
    %c0_38 = arith.constant 0 : index
    %c0_39 = arith.constant 0 : index
    %c16_40 = arith.constant 16 : index
    %69 = vector.load %arg3[%c0_38, %c0_39, %c16_40] : memref<1x8x32xbf16, #tpu.memory_space<vmem>>, vector<1x8x8xbf16>
    %70 = vector.shape_cast %69 : vector<1x8x8xbf16> to vector<8x8xbf16>
    %c0_41 = arith.constant 0 : index
    %c0_42 = arith.constant 0 : index
    %c16_43 = arith.constant 16 : index
    %71 = vector.load %arg4[%c0_41, %c0_42, %c16_43] : memref<1x8x32xbf16, #tpu.memory_space<vmem>>, vector<1x8x8xbf16>
    %72 = vector.shape_cast %71 : vector<1x8x8xbf16> to vector<8x8xbf16>
    %cst_44 = arith.constant dense<0.000000e+00> : vector<8x8xf32>
    %73 = tpu.matmul %68, %70, %cst_44 {dimension_numbers = #tpu.dot_dimension_numbers<[1], [1], [0], [0], [0, 0, 1, 0], [], []>} : vector<8x8xbf16>, vector<8x8xbf16>, vector<8x8xf32> -> vector<8x8xf32>
    %cst_45 = arith.constant 0.353553385 : f32
    %74 = vector.broadcast %cst_45 : f32 to vector<8x8xf32>
    %75 = arith.mulf %73, %74 : vector<8x8xf32>
    %76 = arith.addf %75, %18 : vector<8x8xf32>
    %cst_46 = arith.constant dense<0xFF800000> : vector<8xf32>
    %77 = vector.multi_reduction <maximumf>, %76, %cst_46 [1] : vector<8x8xf32> to vector<8xf32>
    %78 = vector.shape_cast %77 : vector<8xf32> to vector<8x1xf32>
    %79 = vector.broadcast %78 : vector<8x1xf32> to vector<8x8xf32>
    %80 = arith.subf %76, %79 : vector<8x8xf32>
    %81 = math.exp %80 : vector<8x8xf32>
    %cst_47 = arith.constant dense<0.000000e+00> : vector<8xf32>
    %82 = vector.multi_reduction <add>, %81, %cst_47 [1] : vector<8x8xf32> to vector<8xf32>
    %83 = vector.shape_cast %82 : vector<8xf32> to vector<8x1xf32>
    %84 = tpu.reciprocal %83 {approx = true} : vector<8x1xf32> -> vector<8x1xf32>
    %85 = vector.broadcast %84 : vector<8x1xf32> to vector<8x8xf32>
    %86 = arith.mulf %81, %85 : vector<8x8xf32>
    %87 = arith.truncf %86 : vector<8x8xf32> to vector<8x8xbf16>
    %cst_48 = arith.constant dense<0.000000e+00> : vector<8x8xf32>
    %88 = tpu.matmul %87, %72, %cst_48 {dimension_numbers = #tpu.dot_dimension_numbers<[1], [0], [0], [1], [0, 0, 1, 1], [], []>} : vector<8x8xbf16>, vector<8x8xbf16>, vector<8x8xf32> -> vector<8x8xf32>
    %89 = arith.truncf %88 : vector<8x8xf32> to vector<8x8xbf16>
    %c0_49 = arith.constant 0 : index
    %c16_50 = arith.constant 16 : index
    %90 = vector.load %arg9[%c0_49, %c16_50] : memref<8x32xbf16, #tpu.memory_space<vmem>>, vector<8x8xbf16>
    tpu.vector_store %arg9[%c0_49, %c16_50], %89 {strides = array<i32>} : memref<8x32xbf16, #tpu.memory_space<vmem>>, vector<8x8xbf16>,
    %c0_51 = arith.constant 0 : index
    %c0_52 = arith.constant 0 : index
    %c24 = arith.constant 24 : index
    %91 = vector.load %arg2[%c0_51, %c0_52, %c24] : memref<1x8x32xbf16, #tpu.memory_space<vmem>>, vector<1x8x8xbf16>
    %92 = vector.shape_cast %91 : vector<1x8x8xbf16> to vector<8x8xbf16>
    %c0_53 = arith.constant 0 : index
    %c0_54 = arith.constant 0 : index
    %c24_55 = arith.constant 24 : index
    %93 = vector.load %arg3[%c0_53, %c0_54, %c24_55] : memref<1x8x32xbf16, #tpu.memory_space<vmem>>, vector<1x8x8xbf16>
    %94 = vector.shape_cast %93 : vector<1x8x8xbf16> to vector<8x8xbf16>
    %c0_56 = arith.constant 0 : index
    %c0_57 = arith.constant 0 : index
    %c24_58 = arith.constant 24 : index
    %95 = vector.load %arg4[%c0_56, %c0_57, %c24_58] : memref<1x8x32xbf16, #tpu.memory_space<vmem>>, vector<1x8x8xbf16>
    %96 = vector.shape_cast %95 : vector<1x8x8xbf16> to vector<8x8xbf16>
    %cst_59 = arith.constant dense<0.000000e+00> : vector<8x8xf32>
    %97 = tpu.matmul %92, %94, %cst_59 {dimension_numbers = #tpu.dot_dimension_numbers<[1], [1], [0], [0], [0, 0, 1, 0], [], []>} : vector<8x8xbf16>, vector<8x8xbf16>, vector<8x8xf32> -> vector<8x8xf32>
    %cst_60 = arith.constant 0.353553385 : f32
    %98 = vector.broadcast %cst_60 : f32 to vector<8x8xf32>
    %99 = arith.mulf %97, %98 : vector<8x8xf32>
    %100 = arith.addf %99, %18 : vector<8x8xf32>
    %cst_61 = arith.constant dense<0xFF800000> : vector<8xf32>
    %101 = vector.multi_reduction <maximumf>, %100, %cst_61 [1] : vector<8x8xf32> to vector<8xf32>
    %102 = vector.shape_cast %101 : vector<8xf32> to vector<8x1xf32>
    %103 = vector.broadcast %102 : vector<8x1xf32> to vector<8x8xf32>
    %104 = arith.subf %100, %103 : vector<8x8xf32>
    %105 = math.exp %104 : vector<8x8xf32>
    %cst_62 = arith.constant dense<0.000000e+00> : vector<8xf32>
    %106 = vector.multi_reduction <add>, %105, %cst_62 [1] : vector<8x8xf32> to vector<8xf32>
    %107 = vector.shape_cast %106 : vector<8xf32> to vector<8x1xf32>
    %108 = tpu.reciprocal %107 {approx = true} : vector<8x1xf32> -> vector<8x1xf32>
    %109 = vector.broadcast %108 : vector<8x1xf32> to vector<8x8xf32>
    %110 = arith.mulf %105, %109 : vector<8x8xf32>
    %111 = arith.truncf %110 : vector<8x8xf32> to vector<8x8xbf16>
    %cst_63 = arith.constant dense<0.000000e+00> : vector<8x8xf32>
    %112 = tpu.matmul %111, %96, %cst_63 {dimension_numbers = #tpu.dot_dimension_numbers<[1], [0], [0], [1], [0, 0, 1, 1], [], []>} : vector<8x8xbf16>, vector<8x8xbf16>, vector<8x8xf32> -> vector<8x8xf32>
    %113 = arith.truncf %112 : vector<8x8xf32> to vector<8x8xbf16>
    %c0_64 = arith.constant 0 : index
    %c24_65 = arith.constant 24 : index
    %114 = vector.load %arg9[%c0_64, %c24_65] : memref<8x32xbf16, #tpu.memory_space<vmem>>, vector<8x8xbf16>
    tpu.vector_store %arg9[%c0_64, %c24_65], %113 {strides = array<i32>} : memref<8x32xbf16, #tpu.memory_space<vmem>>, vector<8x8xbf16>,
    %c0_66 = arith.constant 0 : index
    %c0_67 = arith.constant 0 : index
    %115 = vector.load %arg9[%c0_66, %c0_67] : memref<8x32xbf16, #tpu.memory_space<vmem>>, vector<8x32xbf16>
    %c0_68 = arith.constant 0 : index
    %c0_69 = arith.constant 0 : index
    %116 = vector.load %arg6[%c0_68, %c0_69] : memref<32x32xbf16, #tpu.memory_space<vmem>>, vector<32x32xbf16>
    %cst_70 = arith.constant dense<0.000000e+00> : vector<8x32xf32>
    %117 = tpu.matmul %115, %116, %cst_70 {dimension_numbers = #tpu.dot_dimension_numbers<[1], [0], [0], [1], [0, 0, 1, 1], [], []>} : vector<8x32xbf16>, vector<32x32xbf16>, vector<8x32xf32> -> vector<8x32xf32>
    %c0_71 = arith.constant 0 : index
    %c0_72 = arith.constant 0 : index
    %118 = vector.load %arg7[%c0_71, %c0_72] : memref<1x32xf32, #tpu.memory_space<vmem>>, vector<1x32xf32>
    %119 = vector.broadcast %118 : vector<1x32xf32> to vector<8x32xf32>
    %120 = arith.addf %117, %119 : vector<8x32xf32>
    %121 = arith.truncf %120 : vector<8x32xf32> to vector<8x32xbf16>
    %c0_73 = arith.constant 0 : index
    %c0_74 = arith.constant 0 : index
    %c0_75 = arith.constant 0 : index
    %122 = vector.load %arg8[%c0_73, %c0_74, %c0_75] : memref<1x8x32xbf16, #tpu.memory_space<vmem>>, vector<1x8x32xbf16>
    %123 = vector.shape_cast %122 : vector<1x8x32xbf16> to vector<8x32xbf16>
    %124 = vector.shape_cast %121 : vector<8x32xbf16> to vector<1x8x32xbf16>
    tpu.vector_store %arg8[%c0_73, %c0_74, %c0_75], %124 {strides = array<i32>} : memref<1x8x32xbf16, #tpu.memory_space<vmem>>, vector<1x8x32xbf16>,
    return
  }
  func.func @transform_0(%arg0: i32, %arg1: i32) -> (i32, i32, i32) {
    %c0_i32 = arith.constant 0 : i32
    %c0_i32_0 = arith.constant 0 : i32
    return %arg0, %arg1, %c0_i32 : i32, i32, i32
  }
  func.func @transform_1(%arg0: i32, %arg1: i32) -> (i32, i32, i32) {
    %c0_i32 = arith.constant 0 : i32
    %c0_i32_0 = arith.constant 0 : i32
    %c0_i32_1 = arith.constant 0 : i32
    return %arg0, %c0_i32, %c0_i32_0 : i32, i32, i32
  }
  func.func @transform_2(%arg0: i32, %arg1: i32) -> (i32, i32, i32) {
    %c0_i32 = arith.constant 0 : i32
    %c0_i32_0 = arith.constant 0 : i32
    %c0_i32_1 = arith.constant 0 : i32
    return %arg0, %c0_i32, %c0_i32_0 : i32, i32, i32
  }
  func.func @transform_3(%arg0: i32, %arg1: i32) -> (i32, i32, i32) {
    %c0_i32 = arith.constant 0 : i32
    %c0_i32_0 = arith.constant 0 : i32
    %c0_i32_1 = arith.constant 0 : i32
    return %arg0, %c0_i32, %c0_i32_0 : i32, i32, i32
  }
  func.func @transform_4(%arg0: i32, %arg1: i32) -> (i32, i32) {
    %c0_i32 = arith.constant 0 : i32
    %c0_i32_0 = arith.constant 0 : i32
    %c0_i32_1 = arith.constant 0 : i32
    return %c0_i32, %c0_i32_0 : i32, i32
  }
  func.func @transform_5(%arg0: i32, %arg1: i32) -> (i32, i32) {
    %c0_i32 = arith.constant 0 : i32
    %c0_i32_0 = arith.constant 0 : i32
    %c0_i32_1 = arith.constant 0 : i32
    return %c0_i32, %c0_i32_0 : i32, i32
  }
  func.func @transform_6(%arg0: i32, %arg1: i32) -> (i32, i32, i32) {
    %c0_i32 = arith.constant 0 : i32
    %c0_i32_0 = arith.constant 0 : i32
    return %arg0, %arg1, %c0_i32 : i32, i32, i32
  }
}

module attributes {stable_mosaic.version = 11 : i64} {
  func.func @_multi_proj_single_kernel(%arg0: i32, %arg1: memref<16x32xbf16, #tpu.memory_space<vmem>>, %arg2: memref<32x32xbf16, #tpu.memory_space<vmem>>, %arg3: memref<1x32xf32, #tpu.memory_space<vmem>>, %arg4: memref<16x32xbf16, #tpu.memory_space<vmem>>) attributes {dimension_semantics = [#tpu.dimension_semantics<parallel>], iteration_bounds = array<i64: 1>, scalar_prefetch = 0 : i64, scratch_operands = 0 : i64, tpu.core_type = #tpu.core_type<tc>, window_params = [{transform_indices = @transform_0, window_bounds = array<i64: 16, 32>}, {pipeline_mode = #tpu.pipeline_mode<synchronous>, transform_indices = @transform_1, window_bounds = array<i64: 32, 32>}, {pipeline_mode = #tpu.pipeline_mode<synchronous>, transform_indices = @transform_2, window_bounds = array<i64: 1, 32>}, {transform_indices = @transform_3, window_bounds = array<i64: 16, 32>}]} {
    %c0 = arith.constant 0 : index
    %c0_0 = arith.constant 0 : index
    %0 = vector.load %arg1[%c0, %c0_0] : memref<16x32xbf16, #tpu.memory_space<vmem>>, vector<16x32xbf16>
    %c0_1 = arith.constant 0 : index
    %c0_2 = arith.constant 0 : index
    %1 = vector.load %arg2[%c0_1, %c0_2] : memref<32x32xbf16, #tpu.memory_space<vmem>>, vector<32x32xbf16>
    %cst = arith.constant dense<0.000000e+00> : vector<16x32xf32>
    %2 = tpu.matmul %0, %1, %cst {dimension_numbers = #tpu.dot_dimension_numbers<[1], [0], [0], [1], [0, 0, 1, 1], [], []>} : vector<16x32xbf16>, vector<32x32xbf16>, vector<16x32xf32> -> vector<16x32xf32>
    %c0_3 = arith.constant 0 : index
    %c0_4 = arith.constant 0 : index
    %3 = vector.load %arg3[%c0_3, %c0_4] : memref<1x32xf32, #tpu.memory_space<vmem>>, vector<1x32xf32>
    %4 = vector.broadcast %3 : vector<1x32xf32> to vector<16x32xf32>
    %5 = arith.addf %2, %4 : vector<16x32xf32>
    %6 = arith.truncf %5 : vector<16x32xf32> to vector<16x32xbf16>
    %c0_5 = arith.constant 0 : index
    %c0_6 = arith.constant 0 : index
    %7 = vector.load %arg4[%c0_5, %c0_6] : memref<16x32xbf16, #tpu.memory_space<vmem>>, vector<16x32xbf16>
    tpu.vector_store %arg4[%c0_5, %c0_6], %6 {strides = array<i32>} : memref<16x32xbf16, #tpu.memory_space<vmem>>, vector<16x32xbf16>,
    return
  }
  func.func @transform_0(%arg0: i32) -> (i32, i32) {
    %c0_i32 = arith.constant 0 : i32
    %c0_i32_0 = arith.constant 0 : i32
    return %arg0, %c0_i32 : i32, i32
  }
  func.func @transform_1(%arg0: i32) -> (i32, i32) {
    %c0_i32 = arith.constant 0 : i32
    %c0_i32_0 = arith.constant 0 : i32
    %c0_i32_1 = arith.constant 0 : i32
    return %c0_i32, %c0_i32_0 : i32, i32
  }
  func.func @transform_2(%arg0: i32) -> (i32, i32) {
    %c0_i32 = arith.constant 0 : i32
    %c0_i32_0 = arith.constant 0 : i32
    %c0_i32_1 = arith.constant 0 : i32
    return %c0_i32, %c0_i32_0 : i32, i32
  }
  func.func @transform_3(%arg0: i32) -> (i32, i32) {
    %c0_i32 = arith.constant 0 : i32
    %c0_i32_0 = arith.constant 0 : i32
    return %arg0, %c0_i32 : i32, i32
  }
}

module attributes {stable_mosaic.version = 11 : i64} {
  func.func @_add_ln_kernel(%arg0: i32, %arg1: memref<16x32xbf16, #tpu.memory_space<vmem>>, %arg2: memref<16x32xbf16, #tpu.memory_space<vmem>>, %arg3: memref<1x32xf32, #tpu.memory_space<vmem>>, %arg4: memref<1x32xf32, #tpu.memory_space<vmem>>, %arg5: memref<16x32xbf16, #tpu.memory_space<vmem>>) attributes {dimension_semantics = [#tpu.dimension_semantics<parallel>], iteration_bounds = array<i64: 1>, scalar_prefetch = 0 : i64, scratch_operands = 0 : i64, tpu.core_type = #tpu.core_type<tc>, window_params = [{transform_indices = @transform_0, window_bounds = array<i64: 16, 32>}, {transform_indices = @transform_1, window_bounds = array<i64: 16, 32>}, {pipeline_mode = #tpu.pipeline_mode<synchronous>, transform_indices = @transform_2, window_bounds = array<i64: 1, 32>}, {pipeline_mode = #tpu.pipeline_mode<synchronous>, transform_indices = @transform_3, window_bounds = array<i64: 1, 32>}, {transform_indices = @transform_4, window_bounds = array<i64: 16, 32>}]} {
    %c0 = arith.constant 0 : index
    %c0_0 = arith.constant 0 : index
    %0 = vector.load %arg1[%c0, %c0_0] : memref<16x32xbf16, #tpu.memory_space<vmem>>, vector<16x32xbf16>
    %1 = arith.extf %0 : vector<16x32xbf16> to vector<16x32xf32>
    %c0_1 = arith.constant 0 : index
    %c0_2 = arith.constant 0 : index
    %2 = vector.load %arg2[%c0_1, %c0_2] : memref<16x32xbf16, #tpu.memory_space<vmem>>, vector<16x32xbf16>
    %3 = arith.extf %2 : vector<16x32xbf16> to vector<16x32xf32>
    %4 = arith.addf %1, %3 : vector<16x32xf32>
    %cst = arith.constant dense<0.000000e+00> : vector<16xf32>
    %5 = vector.multi_reduction <add>, %4, %cst [1] : vector<16x32xf32> to vector<16xf32>
    %6 = vector.shape_cast %5 : vector<16xf32> to vector<16x1xf32>
    %cst_3 = arith.constant 3.200000e+01 : f32
    %7 = vector.broadcast %cst_3 : f32 to vector<16x1xf32>
    %8 = arith.divf %6, %7 : vector<16x1xf32>
    %9 = vector.broadcast %8 : vector<16x1xf32> to vector<16x32xf32>
    %10 = arith.subf %4, %9 : vector<16x32xf32>
    %11 = arith.mulf %10, %10 : vector<16x32xf32>
    %cst_4 = arith.constant dense<0.000000e+00> : vector<16xf32>
    %12 = vector.multi_reduction <add>, %11, %cst_4 [1] : vector<16x32xf32> to vector<16xf32>
    %13 = vector.shape_cast %12 : vector<16xf32> to vector<16x1xf32>
    %cst_5 = arith.constant 3.200000e+01 : f32
    %14 = vector.broadcast %cst_5 : f32 to vector<16x1xf32>
    %15 = arith.divf %13, %14 : vector<16x1xf32>
    %16 = vector.broadcast %8 : vector<16x1xf32> to vector<16x32xf32>
    %17 = arith.subf %4, %16 : vector<16x32xf32>
    %cst_6 = arith.constant 9.99999974E-6 : f32
    %18 = vector.broadcast %cst_6 : f32 to vector<16x1xf32>
    %19 = arith.addf %15, %18 : vector<16x1xf32>
    %20 = math.rsqrt %19 : vector<16x1xf32>
    %21 = vector.broadcast %20 : vector<16x1xf32> to vector<16x32xf32>
    %22 = arith.mulf %17, %21 : vector<16x32xf32>
    %c0_7 = arith.constant 0 : index
    %c0_8 = arith.constant 0 : index
    %23 = vector.load %arg3[%c0_7, %c0_8] : memref<1x32xf32, #tpu.memory_space<vmem>>, vector<1x32xf32>
    %24 = vector.broadcast %23 : vector<1x32xf32> to vector<16x32xf32>
    %25 = arith.mulf %22, %24 : vector<16x32xf32>
    %c0_9 = arith.constant 0 : index
    %c0_10 = arith.constant 0 : index
    %26 = vector.load %arg4[%c0_9, %c0_10] : memref<1x32xf32, #tpu.memory_space<vmem>>, vector<1x32xf32>
    %27 = vector.broadcast %26 : vector<1x32xf32> to vector<16x32xf32>
    %28 = arith.addf %25, %27 : vector<16x32xf32>
    %29 = arith.truncf %28 : vector<16x32xf32> to vector<16x32xbf16>
    %c0_11 = arith.constant 0 : index
    %c0_12 = arith.constant 0 : index
    %30 = vector.load %arg5[%c0_11, %c0_12] : memref<16x32xbf16, #tpu.memory_space<vmem>>, vector<16x32xbf16>
    tpu.vector_store %arg5[%c0_11, %c0_12], %29 {strides = array<i32>} : memref<16x32xbf16, #tpu.memory_space<vmem>>, vector<16x32xbf16>,
    return
  }
  func.func @transform_0(%arg0: i32) -> (i32, i32) {
    %c0_i32 = arith.constant 0 : i32
    %c0_i32_0 = arith.constant 0 : i32
    return %arg0, %c0_i32 : i32, i32
  }
  func.func @transform_1(%arg0: i32) -> (i32, i32) {
    %c0_i32 = arith.constant 0 : i32
    %c0_i32_0 = arith.constant 0 : i32
    return %arg0, %c0_i32 : i32, i32
  }
  func.func @transform_2(%arg0: i32) -> (i32, i32) {
    %c0_i32 = arith.constant 0 : i32
    %c0_i32_0 = arith.constant 0 : i32
    %c0_i32_1 = arith.constant 0 : i32
    return %c0_i32, %c0_i32_0 : i32, i32
  }
  func.func @transform_3(%arg0: i32) -> (i32, i32) {
    %c0_i32 = arith.constant 0 : i32
    %c0_i32_0 = arith.constant 0 : i32
    %c0_i32_1 = arith.constant 0 : i32
    return %c0_i32, %c0_i32_0 : i32, i32
  }
  func.func @transform_4(%arg0: i32) -> (i32, i32) {
    %c0_i32 = arith.constant 0 : i32
    %c0_i32_0 = arith.constant 0 : i32
    return %arg0, %c0_i32 : i32, i32
  }
}

</mosaic_0001>

<bundles_post_ra>
// kernel: _lambda_.28
= control target key start
LH: loop header
LB: loop body
LE: loop exit
PB: predicated region body
PF: predicated region fallthrough
CT: control target
= control target key end

     0   :  { %v356_v0 = vmov 0   ;;  %v357_v3 = vmov 0.0   ;;  %vm358_vm0 = vmmov 0   ;;  %vm73_vm1 = vcmask 261120   ;;  %s480_s1 = inlined_call_operand.vmem [shape: f32[16,1], index: 1, kind: input, shape index: {}]   ;;  %s481_s2 = inlined_call_operand.vmem [shape: bf16[32,32], index: 2, kind: input, shape index: {}]   ;;  %s482_s3 = inlined_call_operand.vmem [shape: bf16[32,32], index: 3, kind: input, shape index: {}]   ;;  %s483_s4 = inlined_call_operand.vmem [shape: bf16[32,32], index: 4, kind: input, shape index: {}]   ;;  %s484_s0 = inlined_call_operand.vmem [shape: f32[16,32], index: 0, kind: input, shape index: {}]   ;;  %s485_s5 = inlined_call_operand.vmem [shape: f32[1,32], index: 5, kind: input, shape index: {}, may-alias: {5,6,7}]   ;;  %s486_s6 = inlined_call_operand.vmem [shape: f32[1,32], index: 6, kind: input, shape index: {}, may-alias: {5,6,7}]   ;;  %s487_s8 = inlined_call_operand.vmem [shape: bf16[16,32], index: 8, kind: output, shape index: {0}]   ;;  %s488_s9 = inlined_call_operand.vmem [shape: bf16[16,32], index: 9, kind: output, shape index: {1}]   ;;  %s489_s7 = inlined_call_operand.vmem [shape: f32[1,32], index: 7, kind: input, shape index: {}, may-alias: {5,6,7}]   ;;  %s490_s10 = inlined_call_operand.vmem [shape: bf16[16,32], index: 10, kind: output, shape index: {2}]  }
   0x1   :  { %349 = vset.pattern.permute.xlu0 %v356_v0  ;;  %v35_v1 = vld [vmem:[%s480_s1] sm:$0xff]  ;;  %v36_v2 = vld [vmem:[%s480_s1 + $0x8] sm:$0xff]  ;;  %322 = vmatprep.subr.bf16.mxu0 %v357_v3  ;;  %vm126_vm2 = vcmask 257024  }
   0x2   :  { %39 = vperm.xlu0 %349, %v35_v1   ;;  %v350_v4 = vld [vmem:[%s481_s2] sm:$0xff]   ;;  %330 = vmatprep.subr.bf16.mxu1 %v357_v3  ;;  %v352_v6 = vld [vmem:[%s481_s2 + $0x8] sm:$0xff]  }
   0x3   :  { %v351_v5 = vld [vmem:[%s482_s3] sm:$0xff]   ;;  %323 = vmatpush3.bf16.msra.mxu0 %v350_v4  ;;  %v353_v7 = vld [vmem:[%s482_s3 + $0x8] sm:$0xff]   ;;  %326 = vmatprep.mubr.msk.bf16.mxu0 %vm358_vm0, %v357_v3 }
   0x4   :  { %331 = vmatpush3.bf16.msra.mxu1 %v351_v5  ;;  %324 = vmatprep.subr.bf16.mxu0 %v357_v3  ;;  %v33_v9 = vld [vmem:[%s484_s0] sm:$0xff]  ;;  %v34_v10 = vld [vmem:[%s484_s0 + $0x8] sm:$0xff] }
   0x5   :  { %332 = vmatprep.subr.bf16.mxu1 %v357_v3  ;;  %334 = vmatprep.mubr.msk.bf16.mxu1 %vm358_vm0, %v357_v3  ;;  %v354_v14 = vld [vmem:[%s483_s4] sm:$0xff]   ;;  %v355_v16 = vld [vmem:[%s483_s4 + $0x8] sm:$0xff]  }
   0x6   :  { %44 = vperm.xlu0 %349, %v36_v2   ;;  %v289_v17 = vld [vmem:[%s485_s5] ss:$0 sm:$0xff] }
   0x7   :  { %325 = vmatpush3.bf16.msra.mxu0 %v352_v6  ;;  %v295_v18 = vld [vmem:[%s486_s6] ss:$0 sm:$0xff] }
   0x8   :  { %333 = vmatpush3.bf16.msra.mxu1 %v353_v7  ;;  %338 = vmatprep.subr.bf16.mxu0 %v357_v3  ;;  %v301_v35 = vld [vmem:[%s489_s7] ss:$0 sm:$0xff] }
  0x81   :  { %v40_v8 = vpop.permute.xlu0 %39 }
  0x82   :  { %v47_v12 = vmul.f32 %v40_v8, %v33_v9 }
  0x85   :  { %v45_v11 = vpop.permute.xlu0 %44 }
  0x86   :  { %v48_v13 = vmul.f32 %v45_v11, %v34_v10 }
  0x88   :  { %v49_v15 = vpack.c.bf16 %v48_v13, %v47_v12 }
  0x8a   :  { %327 = vmatmul.mubr.msk.bf16.vlgmr.msra.gmra.mrb[0].mxu0 %vm73_vm1, %v49_v15  ;;  %335 = vmatmul.mubr.msk.bf16.vlgmr.msra.gmra.mrb[0].mxu1 %vm73_vm1, %v49_v15 }
  0x8b   :  { %339 = vmatpush3.bf16.msra.mxu0 %v354_v14  ;;  %342 = vmatprep.mubr.msk.bf16.mxu0 %vm358_vm0, %v357_v3 }
  0x8c   :  { %340 = vmatprep.subr.bf16.mxu0 %v357_v3 }
  0x8f   :  { %341 = vmatpush3.bf16.msra.mxu0 %v355_v16 }
  0x92   :  { %343 = vmatmul.mubr.msk.bf16.vlgmr.msra.gmra.mrb[4].mxu0 %vm73_vm1, %v49_v15 }
 0x15d   :  { %v111_v19 = vpop.f32.mrb[0].mxu0  ;;  %v186_v20 = vpop.f32.mrb[0].mxu1 }
 0x15e   :  { %v112_v21 = vadd.f32 %v289_v17, %v111_v19  ;;  %v187_v22 = vadd.f32 %v295_v18, %v186_v20  ;;  %v328_v23 = vpop.f32.mrb[1].mxu0  ;;  %v336_v24 = vpop.f32.mrb[1].mxu1 }
 0x15f   :  { %v114_v25 = vpop.f32.mrb[2].mxu0  ;;  %v189_v26 = vpop.f32.mrb[2].mxu1 }
 0x160   :  { %v307_v27 = vpack.c.bf16 %v112_v21, %v112_v21  ;;  %v309_v28 = vpack.c.bf16 %v187_v22, %v187_v22  ;;  %v115_v29 = vadd.f32 %v289_v17, %v114_v25  ;;  %v190_v30 = vadd.f32 %v295_v18, %v189_v26  ;;  %v329_v31 = vpop.f32.mrb[3].mxu0  ;;  %v337_v32 = vpop.f32.mrb[3].mxu1 }
 0x162   :  { %127 = vst.msk [vmem:[%s487_s8] sm:$0xf] %vm126_vm2, %v307_v27  ;;  %201 = vst.msk [vmem:[%s488_s9] sm:$0xf] %vm126_vm2, %v309_v28  ;;  %v308_v33 = vpack.c.bf16 %v115_v29, %v115_v29  ;;  %v310_v34 = vpack.c.bf16 %v190_v30, %v190_v30 }
 0x164   :  { %128 = vst.msk [vmem:[%s487_s8 + $0x4] sm:$0xf] %vm126_vm2, %v308_v33  ;;  %202 = vst.msk [vmem:[%s488_s9 + $0x4] sm:$0xf] %vm126_vm2, %v310_v34 }
 0x165   :  { %v260_v36 = vpop.f32.mrb[4].mxu0 }
 0x166   :  { %v261_v37 = vadd.f32 %v301_v35, %v260_v36  ;;  %v344_v38 = vpop.f32.mrb[5].mxu0 }
 0x167   :  { %v263_v39 = vpop.f32.mrb[6].mxu0 }
 0x168   :  { %v311_v40 = vpack.c.bf16 %v261_v37, %v261_v37  ;;  %v264_v41 = vadd.f32 %v301_v35, %v263_v39  ;;  %v345_v42 = vpop.f32.mrb[7].mxu0 }
 0x16a   :  { %275 = vst.msk [vmem:[%s490_s10] sm:$0xf] %vm126_vm2, %v311_v40  ;;  %v312_v43 = vpack.c.bf16 %v264_v41, %v264_v41 }
 0x16c   :  { %276 = vst.msk [vmem:[%s490_s10 + $0x4] sm:$0xf] %vm126_vm2, %v312_v43 }

// kernel: _lambda_.30
= control target key start
LH: loop header
LB: loop body
LE: loop exit
PB: predicated region body
PF: predicated region fallthrough
CT: control target
= control target key end

     0   :  { %v119_v0 = vmov 0   ;;  %vm42_vm0 = vcmask 261120   ;;  %vm96_vm1 = vcmask 257024   ;;  %s181_s2 = inlined_call_operand.vmem [shape: f32[16,1], index: 2, kind: input, shape index: {}]   ;;  %s182_s1 = inlined_call_operand.vmem [shape: bf16[16,32], index: 1, kind: input, shape index: {}]   ;;  %s183_s0 = inlined_call_operand.vmem [shape: f32[16,32], index: 0, kind: input, shape index: {}]   ;;  %s184_s3 = inlined_call_operand.vmem [shape: f32[1,32], index: 3, kind: input, shape index: {}]   ;;  %s185_s4 = inlined_call_operand.vmem [shape: f32[1,32], index: 4, kind: input, shape index: {}]   ;;  %s186_s5 = inlined_call_operand.vmem [shape: bf16[16,32], index: 5, kind: output, shape index: {}]  }
   0x1   :  { %114 = vset.pattern.permute.xlu0 %v119_v0  ;;  %v22_v1 = vld [vmem:[%s181_s2] sm:$0xff]  ;;  %v23_v2 = vld [vmem:[%s181_s2 + $0x8] sm:$0xff] }
   0x2   :  { %26 = vperm.xlu0 %114, %v22_v1   ;;  %v110_v3 = vld [vmem:[%s182_s1] sm:$0xff]   ;;  %v21_v8 = vld [vmem:[%s183_s0 + $0x8] sm:$0xff] }
   0x3   :  { %v20_v4 = vld [vmem:[%s183_s0] sm:$0xff]  ;;  %v111_v5 = vunpack.c.l.bf16 %v110_v3  ;;  %v112_v10 = vunpack.c.h.bf16 %v110_v3 }
   0x4   :  { %v103_v33 = vld [vmem:[%s184_s3] ss:$0 sm:$0xff] }
   0x5   :  { %v104_v35 = vld [vmem:[%s185_s4] ss:$0 sm:$0xff] }
   0x6   :  { %31 = vperm.xlu0 %114, %v23_v2  }
  0x81   :  { %v27_v6 = vpop.permute.xlu0 %26 }
  0x82   :  { %v34_v7 = vmul.f32 %v27_v6, %v20_v4 }
  0x84   :  { %v40_v9 = vadd.f32 %v111_v5, %v34_v7 }
  0x85   :  { %v32_v11 = vpop.permute.xlu0 %31 }
  0x86   :  { %v35_v12 = vmul.f32 %v32_v11, %v21_v8  ;;  %v43_v13 = vsel %vm42_vm0, %v40_v9, 0.0 }
  0x87   :  { %44 = vadd.xlane.f32.xlu1 %v43_v13 }
  0x88   :  { %v41_v14 = vadd.f32 %v112_v10, %v35_v12 }
  0x8a   :  { %v46_v15 = vsel %vm42_vm0, %v41_v14, 0.0 }
  0x8b   :  { %47 = vadd.xlane.f32.xlu1 %v46_v15 }
 0x114   :  { %v45_v16 = vpop.xlane.xlu1 %44 }
 0x115   :  { %v50_v17 = vmul.f32 0.03125, %v45_v16 }
 0x117   :  { %v52_v18 = vsub.f32 %v40_v9, %v50_v17 }
 0x118   :  { %v48_v19 = vpop.xlane.xlu1 %47 }
 0x119   :  { %v51_v20 = vmul.f32 0.03125, %v48_v19  ;;  %v54_v21 = vmul.f32 %v52_v18, %v52_v18 }
 0x11b   :  { %v53_v22 = vsub.f32 %v41_v14, %v51_v20  ;;  %v56_v23 = vsel %vm42_vm0, %v54_v21, 0.0 }
 0x11c   :  { %57 = vadd.xlane.f32.xlu0 %v56_v23 }
 0x11d   :  { %v55_v24 = vmul.f32 %v53_v22, %v53_v22 }
 0x11f   :  { %v59_v25 = vsel %vm42_vm0, %v55_v24, 0.0 }
 0x120   :  { %60 = vadd.xlane.f32.xlu1 %v59_v25 }
 0x1a9   :  { %v58_v26 = vpop.xlane.xlu0 %57 }
 0x1aa   :  { %v62_v27 = vmul.f32 0.03125, %v58_v26 }
 0x1ac   :  { %v64_v28 = vadd.f32 1e-05, %v62_v27 }
 0x1ad   :  { %v61_v29 = vpop.xlane.xlu1 %60 }
 0x1ae   :  { %115 = vrsqrt.f32 %v64_v28  ;;  %v63_v30 = vmul.f32 0.03125, %v61_v29 }
 0x1b0   :  { %v65_v31 = vadd.f32 1e-05, %v63_v30 }
 0x1b2   :  { %117 = vrsqrt.f32 %v65_v31 }
 0x1b8   :  { %v116_v32 = vpop.eup %115 }
 0x1b9   :  { %v68_v34 = vmul.f32 %v116_v32, %v52_v18 }
 0x1bb   :  { %v77_v36 = vmul.f32 %v103_v33, %v68_v34 }
 0x1bc   :  { %v118_v37 = vpop.eup %117 }
 0x1bd   :  { %v86_v38 = vadd.f32 %v104_v35, %v77_v36  ;;  %v69_v39 = vmul.f32 %v118_v37, %v53_v22 }
 0x1bf   :  { %v107_v40 = vpack.c.bf16 %v86_v38, %v86_v38  ;;  %v78_v41 = vmul.f32 %v103_v33, %v69_v39 }
 0x1c1   :  { %97 = vst.msk [vmem:[%s186_s5] sm:$0xf] %vm96_vm1, %v107_v40  ;;  %v87_v42 = vadd.f32 %v104_v35, %v78_v41 }
 0x1c3   :  { %v108_v43 = vpack.c.bf16 %v87_v42, %v87_v42 }
 0x1c5   :  { %98 = vst.msk [vmem:[%s186_s5 + $0x4] sm:$0xf] %vm96_vm1, %v108_v43 }

// kernel: _lambda_.29
= control target key start
LH: loop header
LB: loop body
LE: loop exit
PB: predicated region body
PF: predicated region fallthrough
CT: control target
= control target key end

     0   :  { %s1268_s21 = smov 0   ;;  %s1270_s22 = smov 0   ;;  %s1410_s0 = inlined_call_operand.vmem [shape: bf16[2,8,32], index: 0, kind: input, shape index: {}]   ;;  %s1411_s1 = inlined_call_operand.vmem [shape: bf16[2,8,32], index: 1, kind: input, shape index: {}]   ;;  %s1412_s2 = inlined_call_operand.vmem [shape: bf16[2,8,32], index: 2, kind: input, shape index: {}]   ;;  %s1413_s3 = inlined_call_operand.vmem [shape: f32[2,1,8], index: 3, kind: input, shape index: {}]   ;;  %s1414_s4 = inlined_call_operand.vmem [shape: bf16[32,32], index: 4, kind: input, shape index: {}]   ;;  %s1415_s5 = inlined_call_operand.vmem [shape: f32[1,32], index: 5, kind: input, shape index: {}]   ;;  %s1416_s6 = inlined_call_operand.vmem [shape: bf16[2,8,32], index: 6, kind: output, shape index: {}]  }
   0x1   :  { %s1272_s23 = smov 0  }
   0x2 LB: > { %s28_s24 = sadd.s32 1, %s1218_s22  ;;  %p1031_p0 = scmp.ge.s32.totalorder %s1222_s23, 1  ;;  %s1222_s23 = sphi %s1272_s23, %s16_s23   ;;  %s1218_s22 = sphi %s1270_s22, %s1418_s22   ;;  %s1214_s21 = sphi %s1268_s21, %s1417_s21  }
   0x3   : > { %p30_p1 = scmp.ge.s32.totalorder %s28_s24, 2  ;;  %p256_p2 = scmp.lt.s32.totalorder %s1222_s23, 3 }
   0x5   : > { %s1420_s24 = smov (%p30_p1, %s28_s24), 0  ;;  %p257_p3 = pnand %p1031_p0, %p256_p2 }
   0x6   : > { %p301_p4 = scmp.lt.s32.totalorder (!%p257_p3), %s1214_s21, 1  ;;  %v1224_v0 = vmov (!%p257_p3), 0.0   ;;  %vm1225_vm0 = vmmov (!%p257_p3), 0   ;;  %vm333_vm1 = vcmask (!%p257_p3), 64512   ;;  %v382_v4 = vlaneseq (!%p257_p3)  ;;  %s1227_s11 = smov (!%p257_p3), 120  }
   0x7   : > { %260 = sbr.rel (%p257_p3) target bundleno = 1705 (0x6a9), region = 44  ;;  %1084 = vmatprep.subr.bf16.mxu0 (!%p257_p3), %v1224_v0  ;;  %1086 = vmatprep.mubr.msk.bf16.mxu0 (!%p257_p3), %vm1225_vm0, %v1224_v0  ;;  %v1226_v8 = vmov (!%p257_p3), -1e+30   ;;  %s1228_s12 = smov (!%p257_p3), 112   ;;  %vm403_vm3 = vcmask (!%p257_p3), 1043456   ;;  %vm448_vm4 = vcmask (!%p257_p3), 60416  }
   0x8   : > { %1090 = vmatprep.subr.bf16.mxu1 (!%p257_p3), %v1224_v0  ;;  %1092 = vmatprep.mubr.msk.bf16.mxu1 (!%p257_p3), %vm1225_vm0, %v1224_v0  ;;  %v383_v6 = vshrl.u32 (!%p257_p3), %v382_v4, 7  ;;  %s1229_s13 = smov (!%p257_p3), 104   ;;  %s1230_s17 = smov (!%p257_p3), 8   ;;  %vm581_vm5 = vcmask (!%p257_p3), 126016   ;;  %vm714_vm6 = vcmask (!%p257_p3), 191616   ;;  %vm847_vm7 = vcmask (!%p257_p3), 257216  }
   0x9   : > { %s1231_s18 = smov (!%p257_p3), 16   ;;  %s1232_s27 = smov (!%p257_p3), 24   ;;  %vm873_vm8 = vcmask (!%p257_p3), 261120   ;;  %vm918_vm9 = vcmask (!%p257_p3), 257024  }
   0xa   : > { %v384_v7 = vsub.s32 (!%p257_p3), 0, %v383_v6 }
   0xe   : > { %s1422_s21 = smov (!%p301_p4, %s1214_s21), 1 }
   0xf   : > { %s1292_s25 = sshll.u32 %s1422_s21, 2  ;;  %s318_s10 = scalar_lea.vmem %s1413_s3, %s1422_s21 }
  0x10   : > { %s1298_s28 = scalar_lea.vmem %s1411_s1, %s1292_s25  ;;  %s1305_s7 = scalar_lea.vmem %s1410_s0, %s1292_s25  ;;  %v327_v5 = vld [vmem:[%s318_s10] sm:$0x1] }
  0x11   : > { %v331_v1 = vld [vmem:[%s1298_s28] sm:$0xf]  ;;  %vm328_vm2 = vcmp.gt.f32.partialorder %v327_v5, 0.0  ;;  %s1335_s16 = scalar_lea.vmem %s1412_s2, %s1292_s25  ;;  %s325_s8 = scalar_lea.vmem %s1416_s6, %s1292_s25 }
  0x12   : > { %v338_v2 = vsel %vm333_vm1, %v331_v1, 0  ;;  %v330_v3 = vld [vmem:[%s1305_s7] sm:$0xf]  ;;  %v329_v9 = vsel %vm328_vm2, 0.0, %v1226_v8 }
  0x13   : > { %1085 = vmatpush3.bf16.xpose.msra.mxu0 %v338_v2  ;;  %v1316_v10 = vrot.slane %v329_v9, %v384_v7  ;;  %v1173_v18 = vld [vmem:[%s1298_s28] ss:$0 sps:$4 sm:$0xff]  }
  0x14   : > { %1102 = vmatprep.subr.bf16.mxu0 %v1224_v0  ;;  %461 = vrot.lane.b32.xlu1 %v1173_v18, %s1227_s11  ;;  %v1174_v19 = vld [vmem:[%s1305_s7] ss:$0 sps:$4 sm:$0xff]  }
  0x15   : > { %v1176_v20 = vld [vmem:[%s1305_s7] ss:$0 sps:$4 sm:$0xff]  }
  0x16   : > { %v1177_v21 = vld [vmem:[%s1298_s28] ss:$0 sps:$4 sm:$0xff]  }
  0x17   : > { %v1178_v22 = vld [vmem:[%s1305_s7] ss:$0 sps:$4 sm:$0xff]  }
  0x18   : > { %456 = vrot.lane.b32.xlu1 %v1174_v19, %s1227_s11  ;;  %v332_v28 = vld [vmem:[%s1335_s16] sm:$0xf] }
  0x19   : > { %v405_v29 = vsel %vm403_vm3, %v332_v28, 0  ;;  %v1175_v30 = vld [vmem:[%s1298_s28] ss:$0 sps:$4 sm:$0xff]  }
  0x1a   : > { %1087 = vmatmul.mubr.msk.bf16.vlgmr.msra.gmra.mrb[0].mxu0 %vm333_vm1, %v330_v3  ;;  %1091 = vmatpush3.bf16.msra.mxu1 %v405_v29  ;;  %v1180_v18 = vld [vmem:[%s1335_s16] ss:$0 sps:$4 sm:$0xff]  }
  0x1b   : > { %1104 = vmatprep.mubr.msk.bf16.mxu0 %vm1225_vm0, %v1224_v0  ;;  %1096 = vmatprep.subr.bf16.mxu1 %v1224_v0 }
  0x1c   : > { %589 = vrot.lane.b32.xlu1 %v1176_v20, %s1228_s12 }
  0x20   : > { %727 = vrot.lane.b32.xlu1 %v1177_v21, %s1229_s13 }
  0x24   : > { %722 = vrot.lane.b32.xlu1 %v1178_v22, %s1229_s13 }
  0x86   : > { %v462_v33 = vpop.permute.xlu1 %461 }
  0x87   : > { %v467_v35 = vsel %vm333_vm1, %v462_v33, 0 }
  0x8a   : > { %v457_v37 = vpop.permute.xlu1 %456 }
  0x8e   : > { %v590_v39 = vpop.permute.xlu1 %589 }
  0x92   : > { %v728_v41 = vpop.permute.xlu1 %727 }
  0x93   : > { %v733_v42 = vsel %vm333_vm1, %v728_v41, 0 }
  0x96   : > { %v723_v43 = vpop.permute.xlu1 %722 }
  0xed   : > { %v374_v11 = vpop.f32.mrb[0].mxu0 }
  0xee   : > { %v380_v12 = vmul.f32 0.35355338, %v374_v11  ;;  %v1088_v13 = vpop.f32.mrb[1].mxu0 }
  0xef   : > { %v377_v14 = vpop.f32.mrb[2].mxu0 }
  0xf0   : > { %v1089_v15 = vpop.f32.mrb[3].mxu0  ;;  %v387_v16 = vadd.f32 %v1316_v10, %v380_v12 }
  0xf2   : > { %v388_v17 = vsel %vm333_vm1, %v387_v16, -inf }
  0xf3   : > { %389 = vmax.xlane.f32.xlu0 %v388_v17  ;;  %v1179_v17 = vld [vmem:[%s1335_s16] ss:$0 sps:$4 sm:$0xff]  }
 0x180   : > { %v390_v23 = vpop.xlane.xlu0 %389 }
 0x181   : > { %v391_v24 = vsub.f32 %v387_v16, %v390_v23 }
 0x183   : > { %v392_v25 = vmul.f32 1.442695, %v391_v24  ;;  %v1181_v24 = vld [vmem:[%s1335_s16] ss:$0 sps:$4 sm:$0xff]  }
 0x185   : > { %1184 = vpow2.f32 %v392_v25 }
 0x18f   : > { %v1185_v26 = vpop.eup %1184 }
 0x190   : > { %v394_v27 = vsel %vm333_vm1, %v1185_v26, 0.0 }
 0x191   : > { %395 = vadd.xlane.f32.xlu0 %v394_v27 }
 0x1a7   : > { %594 = vrot.lane.b32.xlu0 %v1175_v30, %s1228_s12 }
 0x21e   : > { %v396_v31 = vpop.xlane.xlu0 %395 }
 0x21f   : > { %1186 = vrcp.f32 %v396_v31 }
 0x222   : > { %v595_v38 = vpop.permute.xlu0 %594 }
 0x223   : > { %v600_v40 = vsel %vm333_vm1, %v595_v38, 0 }
 0x229   : > { %v1187_v32 = vpop.eup %1186 }
 0x22a   : > { %v398_v34 = vmul.f32 %v1187_v32, %v1185_v26 }
 0x22c   : > { %v399_v36 = vpack.c.bf16 %v398_v34, %v398_v34 }
 0x22e   : > { %1093 = vmatmul.mubr.msk.bf16.vlgmr.msra.gmra.mrb[0].mxu1 %vm333_vm1, %v399_v36 }
 0x22f   : > { %1097 = vmatpush3.bf16.xpose.msra.mxu1 %v467_v35  ;;  %1098 = vmatprep.mubr.msk.bf16.mxu1 %vm1225_vm0, %v1224_v0 }
 0x230   : > { %1108 = vmatprep.subr.bf16.mxu1 %v1224_v0 }
 0x236   : > { %1099 = vmatmul.mubr.msk.bf16.vlgmr.msra.gmra.mrb[4].mxu1 %vm333_vm1, %v457_v37 }
 0x237   : > { %1109 = vmatpush3.bf16.xpose.msra.mxu1 %v600_v40  ;;  %1110 = vmatprep.mubr.msk.bf16.mxu1 %vm1225_vm0, %v1224_v0 }
 0x238   : > { %1120 = vmatprep.subr.bf16.mxu1 %v1224_v0 }
 0x23e   : > { %1111 = vmatmul.mubr.msk.bf16.vlgmr.msra.gmra.mrb[8].mxu1 %vm333_vm1, %v590_v39 }
 0x23f   : > { %1121 = vmatpush3.bf16.xpose.msra.mxu1 %v733_v42  ;;  %1122 = vmatprep.mubr.msk.bf16.mxu1 %vm1225_vm0, %v1224_v0 }
 0x240   : > { %1132 = vmatprep.subr.bf16.mxu1 %v1224_v0 }
 0x246   : > { %1123 = vmatmul.mubr.msk.bf16.vlgmr.msra.gmra.mrb[12].mxu1 %vm333_vm1, %v723_v43 }
 0x247   : > { %1136 = vmatprep.mubr.msk.bf16.mxu1 %vm1225_vm0, %v1224_v0 }
 0x301   : > { %v441_v44 = vpop.f32.mrb[0].mxu1 }
 0x302   : > { %v447_v45 = vpack.c.bf16 %v441_v44, %v441_v44  ;;  %v1094_v46 = vpop.f32.mrb[1].mxu1 }
 0x303   : > { %v444_v47 = vpop.f32.mrb[2].mxu1 }
 0x304   : > { %449 = vst.msk [vmem:[#allocation2] sm:$0xf] %vm448_vm4, %v447_v45  ;;  %v1095_v48 = vpop.f32.mrb[3].mxu1 }
 0x309   : > { %v503_v49 = vpop.f32.mrb[4].mxu1 }
 0x30a   : > { %v509_v50 = vmul.f32 0.35355338, %v503_v49  ;;  %v1100_v51 = vpop.f32.mrb[5].mxu1 }
 0x30b   : > { %v506_v52 = vpop.f32.mrb[6].mxu1 }
 0x30c   : > { %v1101_v53 = vpop.f32.mrb[7].mxu1  ;;  %v510_v54 = vadd.f32 %v509_v50, %v1316_v10 }
 0x30d   : > { %v1182_v53 = vld [vmem:[%s1414_s4] sm:$0xff]  }
 0x30e   : > { %v511_v55 = vsel %vm333_vm1, %v510_v54, -inf  ;;  %1133 = vmatpush3.bf16.msra.mxu1 %v1182_v53 }
 0x30f   : > { %512 = vmax.xlane.f32.xlu1 %v511_v55  ;;  %1134 = vmatprep.subr.bf16.mxu1 %v1224_v0 }
 0x311   : > { %v636_v56 = vpop.f32.mrb[8].mxu1 }
 0x312   : > { %v642_v57 = vmul.f32 0.35355338, %v636_v56  ;;  %v1112_v58 = vpop.f32.mrb[9].mxu1 }
 0x313   : > { %v639_v59 = vpop.f32.mrb[10].mxu1 }
 0x314   : > { %v643_v60 = vadd.f32 %v642_v57, %v1316_v10  ;;  %v1113_v61 = vpop.f32.mrb[11].mxu1 }
 0x316   : > { %v644_v62 = vsel %vm333_vm1, %v643_v60, -inf }
 0x317   : > { %645 = vmax.xlane.f32.xlu0 %v644_v62 }
 0x319   : > { %v769_v63 = vpop.f32.mrb[12].mxu1 }
 0x31a   : > { %v775_v1 = vmul.f32 0.35355338, %v769_v63  ;;  %v1124_v2 = vpop.f32.mrb[13].mxu1  ;;  %v1056_v63 = vld [vmem:[%s1415_s5] ss:$0 sm:$0xff] }
 0x31b   : > { %v772_v3 = vpop.f32.mrb[14].mxu1 }
 0x31c   : > { %v776_v4 = vadd.f32 %v775_v1, %v1316_v10  ;;  %v1125_v5 = vpop.f32.mrb[15].mxu1 }
 0x31e   : > { %v777_v6 = vsel %vm333_vm1, %v776_v4, -inf }
 0x31f   : > { %778 = vmax.xlane.f32.xlu1 %v777_v6 }
 0x39c   : > { %v513_v7 = vpop.xlane.xlu1 %512 }
 0x39d   : > { %v514_v8 = vsub.f32 %v510_v54, %v513_v7  ;;  %v1183_v54 = vld [vmem:[%s1414_s4 + $0x8] sm:$0xff]  }
 0x39e   : > { %1135 = vmatpush3.bf16.msra.mxu1 %v1183_v54 }
 0x39f   : > { %v515_v9 = vmul.f32 1.442695, %v514_v8 }
 0x3a1   : > { %1188 = vpow2.f32 %v515_v9 }
 0x3a4   : > { %v646_v11 = vpop.xlane.xlu0 %645 }
 0x3a5   : > { %v647_v12 = vsub.f32 %v643_v60, %v646_v11 }
 0x3a7   : > { %v648_v13 = vmul.f32 1.442695, %v647_v12 }
 0x3a9   : > { %1190 = vpow2.f32 %v648_v13 }
 0x3ab   : > { %v1189_v14 = vpop.eup %1188 }
 0x3ac   : > { %v517_v15 = vsel %vm333_vm1, %v1189_v14, 0.0  ;;  %v779_v19 = vpop.xlane.xlu1 %778 }
 0x3ad   : > { %518 = vadd.xlane.f32.xlu1 %v517_v15  ;;  %v780_v20 = vsub.f32 %v776_v4, %v779_v19 }
 0x3af   : > { %v781_v21 = vmul.f32 1.442695, %v780_v20 }
 0x3b1   : > { %1192 = vpow2.f32 %v781_v21 }
 0x3b3   : > { %v1191_v10 = vpop.eup %1190 }
 0x3b4   : > { %v650_v16 = vsel %vm333_vm1, %v1191_v10, 0.0 }
 0x3b5   : > { %651 = vadd.xlane.f32.xlu0 %v650_v16 }
 0x3bb   : > { %v1193_v22 = vpop.eup %1192 }
 0x3bc   : > { %v783_v23 = vsel %vm333_vm1, %v1193_v22, 0.0 }
 0x3be   : > { %659 = vrot.lane.b32.xlu1 %v1179_v17, %s1228_s12 }
 0x3cb   : > { %526 = vrot.lane.b32.xlu0 %v1180_v18, %s1227_s11 }
 0x3e2   : > { %784 = vadd.xlane.f32.xlu1 %v783_v23 }
 0x3f3   : > { %792 = vrot.lane.b32.xlu1 %v1181_v24, %s1229_s13 }
 0x43a   : > { %v519_v25 = vpop.xlane.xlu1 %518 }
 0x43b   : > { %1194 = vrcp.f32 %v519_v25 }
 0x43e   : > { %v660_v31 = vpop.permute.xlu1 %659 }
 0x43f   : > { %v665_v33 = vsel %vm403_vm3, %v660_v31, 0 }
 0x442   : > { %v652_v26 = vpop.xlane.xlu0 %651 }
 0x443   : > { %1196 = vrcp.f32 %v652_v26 }
 0x445   : > { %v1195_v27 = vpop.eup %1194 }
 0x446   : > { %v521_v28 = vmul.f32 %v1195_v27, %v1189_v14  ;;  %v527_v29 = vpop.permute.xlu0 %526 }
 0x447   : > { %v532_v30 = vsel %vm403_vm3, %v527_v29, 0 }
 0x448   : > { %1103 = vmatpush3.bf16.msra.mxu0 %v532_v30  ;;  %v522_v32 = vpack.c.bf16 %v521_v28, %v521_v28 }
 0x449   : > { %1114 = vmatprep.subr.bf16.mxu0 %v1224_v0 }
 0x44b   : > { %1105 = vmatmul.mubr.msk.bf16.vlgmr.msra.gmra.mrb[4].mxu0 %vm333_vm1, %v522_v32 }
 0x44c   : > { %1115 = vmatpush3.bf16.msra.mxu0 %v665_v33  ;;  %1116 = vmatprep.mubr.msk.bf16.mxu0 %vm1225_vm0, %v1224_v0 }
 0x44d   : > { %v1197_v34 = vpop.eup %1196  ;;  %1126 = vmatprep.subr.bf16.mxu0 %v1224_v0 }
 0x44e   : > { %v654_v35 = vmul.f32 %v1197_v34, %v1191_v10 }
 0x450   : > { %v655_v36 = vpack.c.bf16 %v654_v35, %v654_v35 }
 0x453   : > { %1117 = vmatmul.mubr.msk.bf16.vlgmr.msra.gmra.mrb[8].mxu0 %vm333_vm1, %v655_v36 }
 0x454   : > { %1128 = vmatprep.mubr.msk.bf16.mxu0 %vm1225_vm0, %v1224_v0 }
 0x46f   : > { %v785_v37 = vpop.xlane.xlu1 %784 }
 0x470   : > { %1198 = vrcp.f32 %v785_v37 }
 0x473   : > { %v793_v38 = vpop.permute.xlu1 %792 }
 0x474   : > { %v798_v39 = vsel %vm403_vm3, %v793_v38, 0 }
 0x475   : > { %1127 = vmatpush3.bf16.msra.mxu0 %v798_v39 }
 0x47a   : > { %v1199_v40 = vpop.eup %1198 }
 0x47b   : > { %v787_v41 = vmul.f32 %v1199_v40, %v1193_v22 }
 0x47d   : > { %v788_v42 = vpack.c.bf16 %v787_v41, %v787_v41 }
 0x47f   : > { %1129 = vmatmul.mubr.msk.bf16.vlgmr.msra.gmra.mrb[12].mxu0 %vm333_vm1, %v788_v42 }
 0x51e   : > { %v568_v43 = vpop.f32.mrb[4].mxu0 }
 0x51f   : > { %v1062_v44 = vpack.c.bf16 %v568_v43, %v568_v43  ;;  %v1106_v45 = vpop.f32.mrb[5].mxu0 }
 0x520   : > { %v571_v46 = vpop.f32.mrb[6].mxu0 }
 0x521   : > { %578 = vrot.lane.b32.xlu0 %v1062_v44, %s1230_s17  ;;  %v1107_v47 = vpop.f32.mrb[7].mxu0 }
 0x526   : > { %v701_v48 = vpop.f32.mrb[8].mxu0 }
 0x527   : > { %v1063_v49 = vpack.c.bf16 %v701_v48, %v701_v48  ;;  %v1118_v50 = vpop.f32.mrb[9].mxu0 }
 0x528   : > { %v704_v51 = vpop.f32.mrb[10].mxu0 }
 0x529   : > { %711 = vrot.lane.b32.xlu1 %v1063_v49, %s1231_s18  ;;  %v1119_v52 = vpop.f32.mrb[11].mxu0 }
 0x552   : > { %v834_v55 = vpop.f32.mrb[12].mxu0 }
 0x553   : > { %v1064_v56 = vpack.c.bf16 %v834_v55, %v834_v55  ;;  %v1130_v57 = vpop.f32.mrb[13].mxu0 }
 0x554   : > { %v837_v58 = vpop.f32.mrb[14].mxu0 }
 0x555   : > { %844 = vrot.lane.b32.xlu0 %v1064_v56, %s1232_s27  ;;  %v1131_v59 = vpop.f32.mrb[15].mxu0 }
 0x593   : > { %v579_v60 = vpop.permute.xlu0 %578 }
 0x594   : > { %582 = vst.msk [vmem:[#allocation2] sm:$0xf] %vm581_vm5, %v579_v60 }
 0x59b   : > { %v712_v61 = vpop.permute.xlu1 %711 }
 0x59c   : > { %715 = vst.msk [vmem:[#allocation2] sm:$0xf] %vm714_vm6, %v712_v61 }
 0x5c7   : > { %v845_v62 = vpop.permute.xlu0 %844 }
 0x5c8   : > { %848 = vst.msk [vmem:[#allocation2] sm:$0xf] %vm847_vm7, %v845_v62 }
 0x5cf   : > { %v849_v0 = vld [vmem:[#allocation2] sm:$0xf] }
 0x5d0   : > { %1137 = vmatmul.mubr.msk.bf16.vlgmr.msra.gmra.mrb[16].mxu1 %vm873_vm8, %v849_v0 }
 0x6a3   : > { %v911_v1 = vpop.f32.mrb[16].mxu1 }
 0x6a4   : > { %v912_v2 = vadd.f32 %v1056_v63, %v911_v1  ;;  %v1138_v3 = vpop.f32.mrb[17].mxu1 }
 0x6a5   : > { %v914_v4 = vpop.f32.mrb[18].mxu1 }
 0x6a6   : > { %v917_v5 = vpack.c.bf16 %v912_v2, %v912_v2  ;;  %v1139_v6 = vpop.f32.mrb[19].mxu1 }
 0x6a8   : > { %919 = vst.msk [vmem:[%s325_s8] sm:$0xf] %vm918_vm9, %v917_v5 }
 0x6a9 PF: > { %s16_s23 = sadd.s32 1, %s1222_s23   ;;  %s1417_s21 = smov %s1218_s22 }
 0x6aa   : > { %p13_p5 = scmp.ge.s32.totalorder %s16_s23, 4   ;;  %s1418_s22 = smov %s1420_s24 }
 0x6ac   :  { %15 = sbr.rel (!%p13_p5) target bundleno = 2 (0x2), region = 83 }

// kernel: _lambda_.31
= control target key start
LH: loop header
LB: loop body
LE: loop exit
PB: predicated region body
PF: predicated region fallthrough
CT: control target
= control target key end

     0   :  { %vm25_vm0 = vcmask 261120   ;;  %v317_v0 = vmov 0.0   ;;  %vm318_vm1 = vmmov 0   ;;  %vm239_vm2 = vcmask 257024   ;;  %s399_s1 = inlined_call_operand.vmem [shape: bf16[32,128], index: 1, kind: input, shape index: {}]   ;;  %s400_s3 = inlined_call_operand.vmem [shape: bf16[128,32], index: 3, kind: input, shape index: {}]   ;;  %s401_s0 = inlined_call_operand.vmem [shape: bf16[16,32], index: 0, kind: input, shape index: {}]   ;;  %s402_s2 = inlined_call_operand.vmem [shape: f32[1,128], index: 2, kind: input, shape index: {}]   ;;  %s403_s4 = inlined_call_operand.vmem [shape: f32[1,32], index: 4, kind: input, shape index: {}]   ;;  %s404_s5 = inlined_call_operand.vmem [shape: bf16[16,32], index: 5, kind: output, shape index: {}]  }
   0x1   :  { %276 = vmatprep.subr.bf16.mxu0 %v317_v0  ;;  %v306_v1 = vld [vmem:[%s399_s1] sm:$0xff]   ;;  %280 = vmatprep.mubr.msk.bf16.mxu0 %vm318_vm1, %v317_v0  ;;  %26 = vst.msk [vmem:[#allocation2] sm:$0xff] %vm25_vm0, %v317_v0  ;;  %27 = vst.msk [vmem:[#allocation2 + $0x8] sm:$0xff] %vm25_vm0, %v317_v0  ;;  %v307_v2 = vld [vmem:[%s399_s1 + $0x8] sm:$0xff]  }
   0x2   :  { %284 = vmatprep.subr.bf16.mxu1 %v317_v0  ;;  %300 = vmatprep.mubr.msk.bf16.mxu1 %vm318_vm1, %v317_v0  ;;  %v309_v3 = vld [vmem:[%s400_s3] sm:$0xff]   ;;  %v310_v5 = vld [vmem:[%s400_s3 + $0x8] sm:$0xff]   ;;  %v311_v6 = vld [vmem:[%s400_s3 + $0x10] sm:$0xff]  }
   0x3   :  { %277 = vmatpush3.bf16.msra.mxu0 %v306_v1  ;;  %v308_v4 = vld [vmem:[%s401_s0] sm:$0xff]   ;;  %285 = vmatpush3.bf16.msra.mxu1 %v309_v3  ;;  %v312_v7 = vld [vmem:[%s400_s3 + $0x18] sm:$0xff]   ;;  %v314_v9 = vld [vmem:[%s400_s3 + $0x28] sm:$0xff]  }
   0x4   :  { %278 = vmatprep.subr.bf16.mxu0 %v317_v0  ;;  %286 = vmatprep.subr.bf16.mxu1 %v317_v0  ;;  %v313_v8 = vld [vmem:[%s400_s3 + $0x20] sm:$0xff]   ;;  %v315_v10 = vld [vmem:[%s400_s3 + $0x30] sm:$0xff]   ;;  %v316_v11 = vld [vmem:[%s400_s3 + $0x38] sm:$0xff]  }
   0x5   :  { %v246_v12 = vld [vmem:[%s402_s2] ss:$0 sm:$0xff] }
   0x6   :  { %v259_v30 = vld [vmem:[%s403_s4] ss:$0 sm:$0xff] }
   0x7   :  { %279 = vmatpush3.bf16.msra.mxu0 %v307_v2  ;;  %287 = vmatpush3.bf16.msra.mxu1 %v310_v5 }
   0x8   :  { %288 = vmatprep.subr.bf16.mxu1 %v317_v0  ;;  %v105_v22 = vld [vmem:[#allocation2] sm:$0xff]  ;;  %v106_v24 = vld [vmem:[#allocation2 + $0x8] sm:$0xff] }
   0xa   :  { %281 = vmatmul.mubr.msk.bf16.vlgmr.msra.gmra.mrb[0].mxu0 %vm25_vm0, %v308_v4 }
   0xb   :  { %289 = vmatpush3.bf16.msra.mxu1 %v311_v6 }
   0xc   :  { %290 = vmatprep.subr.bf16.mxu1 %v317_v0 }
   0xf   :  { %291 = vmatpush3.bf16.msra.mxu1 %v312_v7 }
  0x10   :  { %292 = vmatprep.subr.bf16.mxu1 %v317_v0 }
  0x13   :  { %293 = vmatpush3.bf16.msra.mxu1 %v313_v8 }
  0x14   :  { %294 = vmatprep.subr.bf16.mxu1 %v317_v0 }
  0x17   :  { %295 = vmatpush3.bf16.msra.mxu1 %v314_v9 }
  0x18   :  { %296 = vmatprep.subr.bf16.mxu1 %v317_v0 }
  0x1b   :  { %297 = vmatpush3.bf16.msra.mxu1 %v315_v10 }
  0x1c   :  { %298 = vmatprep.subr.bf16.mxu1 %v317_v0 }
  0x1f   :  { %299 = vmatpush3.bf16.msra.mxu1 %v316_v11 }
  0xdd   :  { %v96_v13 = vpop.f32.mrb[0].mxu0 }
  0xde   :  { %v97_v14 = vadd.f32 %v246_v12, %v96_v13  ;;  %v282_v15 = vpop.f32.mrb[1].mxu0 }
  0xdf   :  { %v99_v16 = vpop.f32.mrb[2].mxu0 }
  0xe0   :  { %v100_v17 = vadd.f32 %v246_v12, %v99_v16  ;;  %v283_v18 = vpop.f32.mrb[3].mxu0  ;;  %v103_v19 = vmax.f32 %v97_v14, 0.0 }
  0xe2   :  { %v104_v20 = vmax.f32 %v100_v17, 0.0 }
  0xe4   :  { %v107_v21 = vpack.c.bf16 %v104_v20, %v103_v19 }
  0xe6   :  { %301 = vmatmul.mubr.bf16.vlgmr.msra.gmra.mrb[0].mxu1 %v107_v21 }
 0x1b9   :  { %v206_v23 = vpop.f32.mrb[0].mxu1 }
 0x1ba   :  { %v213_v25 = vadd.f32 %v206_v23, %v105_v22  ;;  %v302_v26 = vpop.f32.mrb[1].mxu1 }
 0x1bb   :  { %v209_v27 = vpop.f32.mrb[2].mxu1 }
 0x1bc   :  { %215 = vst.msk [vmem:[#allocation2] sm:$0xff] %vm25_vm0, %v213_v25  ;;  %v214_v28 = vadd.f32 %v209_v27, %v106_v24  ;;  %v303_v29 = vpop.f32.mrb[3].mxu1 }
 0x1be   :  { %216 = vst.msk [vmem:[#allocation2 + $0x8] sm:$0xff] %vm25_vm0, %v214_v28 }
 0x1c3   :  { %v220_v31 = vld [vmem:[#allocation2] sm:$0xff] }
 0x1c4   :  { %v229_v32 = vadd.f32 %v259_v30, %v220_v31 }
 0x1c5   :  { %v221_v33 = vld [vmem:[#allocation2 + $0x8] sm:$0xff] }
 0x1c6   :  { %v262_v34 = vpack.c.bf16 %v229_v32, %v229_v32  ;;  %v230_v35 = vadd.f32 %v259_v30, %v221_v33 }
 0x1c8   :  { %240 = vst.msk [vmem:[%s404_s5] sm:$0xf] %vm239_vm2, %v262_v34  ;;  %v263_v36 = vpack.c.bf16 %v230_v35, %v230_v35 }
 0x1ca   :  { %241 = vst.msk [vmem:[%s404_s5 + $0x4] sm:$0xf] %vm239_vm2, %v263_v36 }

// kernel: _lambda_.32
= control target key start
LH: loop header
LB: loop body
LE: loop exit
PB: predicated region body
PF: predicated region fallthrough
CT: control target
= control target key end

     0   :  { %vm27_vm0 = vcmask 261120   ;;  %vm81_vm1 = vcmask 257024   ;;  %s153_s0 = inlined_call_operand.vmem [shape: bf16[16,32], index: 0, kind: input, shape index: {}]   ;;  %s154_s1 = inlined_call_operand.vmem [shape: bf16[16,32], index: 1, kind: input, shape index: {}]   ;;  %s155_s2 = inlined_call_operand.vmem [shape: f32[1,32], index: 2, kind: input, shape index: {}]   ;;  %s156_s3 = inlined_call_operand.vmem [shape: f32[1,32], index: 3, kind: input, shape index: {}]   ;;  %s157_s4 = inlined_call_operand.vmem [shape: bf16[16,32], index: 4, kind: output, shape index: {}]  }
   0x1   :  { %v95_v0 = vld [vmem:[%s153_s0] sm:$0xff]  }
   0x2   :  { %v99_v1 = vld [vmem:[%s154_s1] sm:$0xff]   ;;  %v96_v2 = vunpack.c.l.bf16 %v95_v0  ;;  %v97_v4 = vunpack.c.h.bf16 %v95_v0 }
   0x3   :  { %v100_v3 = vunpack.c.l.bf16 %v99_v1  ;;  %v101_v5 = vunpack.c.h.bf16 %v99_v1  ;;  %v88_v27 = vld [vmem:[%s155_s2] ss:$0 sm:$0xff] }
   0x4   :  { %v89_v29 = vld [vmem:[%s156_s3] ss:$0 sm:$0xff] }
   0x5   :  { %v25_v6 = vadd.f32 %v100_v3, %v96_v2  ;;  %v26_v7 = vadd.f32 %v101_v5, %v97_v4 }
   0x7   :  { %v28_v8 = vsel %vm27_vm0, %v25_v6, 0.0  ;;  %v31_v9 = vsel %vm27_vm0, %v26_v7, 0.0 }
   0x8   :  { %29 = vadd.xlane.f32.xlu0 %v28_v8 }
   0xc   :  { %32 = vadd.xlane.f32.xlu0 %v31_v9 }
  0x95   :  { %v30_v10 = vpop.xlane.xlu0 %29 }
  0x96   :  { %v35_v11 = vmul.f32 0.03125, %v30_v10 }
  0x98   :  { %v37_v12 = vsub.f32 %v25_v6, %v35_v11 }
  0x99   :  { %v33_v13 = vpop.xlane.xlu0 %32 }
  0x9a   :  { %v36_v14 = vmul.f32 0.03125, %v33_v13  ;;  %v39_v15 = vmul.f32 %v37_v12, %v37_v12 }
  0x9c   :  { %v38_v16 = vsub.f32 %v26_v7, %v36_v14  ;;  %v41_v17 = vsel %vm27_vm0, %v39_v15, 0.0 }
  0x9d   :  { %42 = vadd.xlane.f32.xlu1 %v41_v17 }
  0x9e   :  { %v40_v18 = vmul.f32 %v38_v16, %v38_v16 }
  0xa0   :  { %v44_v19 = vsel %vm27_vm0, %v40_v18, 0.0 }
  0xa1   :  { %45 = vadd.xlane.f32.xlu1 %v44_v19 }
 0x12a   :  { %v43_v20 = vpop.xlane.xlu1 %42 }
 0x12b   :  { %v47_v21 = vmul.f32 0.03125, %v43_v20 }
 0x12d   :  { %v49_v22 = vadd.f32 1e-05, %v47_v21 }
 0x12e   :  { %v46_v23 = vpop.xlane.xlu1 %45 }
 0x12f   :  { %102 = vrsqrt.f32 %v49_v22  ;;  %v48_v24 = vmul.f32 0.03125, %v46_v23 }
 0x131   :  { %v50_v25 = vadd.f32 1e-05, %v48_v24 }
 0x133   :  { %104 = vrsqrt.f32 %v50_v25 }
 0x139   :  { %v103_v26 = vpop.eup %102 }
 0x13a   :  { %v53_v28 = vmul.f32 %v103_v26, %v37_v12 }
 0x13c   :  { %v62_v30 = vmul.f32 %v88_v27, %v53_v28 }
 0x13d   :  { %v105_v31 = vpop.eup %104 }
 0x13e   :  { %v71_v32 = vadd.f32 %v89_v29, %v62_v30  ;;  %v54_v33 = vmul.f32 %v105_v31, %v38_v16 }
 0x140   :  { %v92_v34 = vpack.c.bf16 %v71_v32, %v71_v32  ;;  %v63_v35 = vmul.f32 %v88_v27, %v54_v33 }
 0x142   :  { %82 = vst.msk [vmem:[%s157_s4] sm:$0xf] %vm81_vm1, %v92_v34  ;;  %v72_v36 = vadd.f32 %v89_v29, %v63_v35 }
 0x144   :  { %v93_v37 = vpack.c.bf16 %v72_v36, %v72_v36 }
 0x146   :  { %83 = vst.msk [vmem:[%s157_s4 + $0x4] sm:$0xf] %vm81_vm1, %v93_v37 }

// kernel: _lambda_.35
= control target key start
LH: loop header
LB: loop body
LE: loop exit
PB: predicated region body
PF: predicated region fallthrough
CT: control target
= control target key end

     0   :  { %v125_v0 = vmov 0   ;;  %vm44_vm0 = vcmask 261120   ;;  %vm98_vm1 = vcmask 257024   ;;  %s184_s2 = inlined_call_operand.vmem [shape: f32[16,1], index: 2, kind: input, shape index: {}]   ;;  %s185_s0 = inlined_call_operand.vmem [shape: bf16[16,32], index: 0, kind: input, shape index: {}]   ;;  %s186_s1 = inlined_call_operand.vmem [shape: bf16[16,32], index: 1, kind: input, shape index: {}]   ;;  %s187_s3 = inlined_call_operand.vmem [shape: f32[1,32], index: 3, kind: input, shape index: {}]   ;;  %s188_s4 = inlined_call_operand.vmem [shape: f32[1,32], index: 4, kind: input, shape index: {}]   ;;  %s189_s5 = inlined_call_operand.vmem [shape: bf16[16,32], index: 5, kind: output, shape index: {}]  }
   0x1   :  { %120 = vset.pattern.permute.xlu0 %v125_v0  ;;  %v24_v1 = vld [vmem:[%s184_s2] sm:$0xff]  ;;  %v25_v2 = vld [vmem:[%s184_s2 + $0x8] sm:$0xff] }
   0x2   :  { %28 = vperm.xlu0 %120, %v24_v1   ;;  %v112_v3 = vld [vmem:[%s185_s0] sm:$0xff]  }
   0x3   :  { %v116_v4 = vld [vmem:[%s186_s1] sm:$0xff]   ;;  %v113_v5 = vunpack.c.l.bf16 %v112_v3  ;;  %v114_v9 = vunpack.c.h.bf16 %v112_v3 }
   0x4   :  { %v117_v6 = vunpack.c.l.bf16 %v116_v4  ;;  %v118_v11 = vunpack.c.h.bf16 %v116_v4  ;;  %v105_v34 = vld [vmem:[%s187_s3] ss:$0 sm:$0xff] }
   0x5   :  { %v106_v36 = vld [vmem:[%s188_s4] ss:$0 sm:$0xff] }
   0x6   :  { %33 = vperm.xlu0 %120, %v25_v2  }
  0x81   :  { %v29_v7 = vpop.permute.xlu0 %28 }
  0x82   :  { %v36_v8 = vmul.f32 %v113_v5, %v29_v7 }
  0x84   :  { %v42_v10 = vadd.f32 %v117_v6, %v36_v8 }
  0x85   :  { %v34_v12 = vpop.permute.xlu0 %33 }
  0x86   :  { %v37_v13 = vmul.f32 %v114_v9, %v34_v12  ;;  %v45_v14 = vsel %vm44_vm0, %v42_v10, 0.0 }
  0x87   :  { %46 = vadd.xlane.f32.xlu1 %v45_v14 }
  0x88   :  { %v43_v15 = vadd.f32 %v118_v11, %v37_v13 }
  0x8a   :  { %v48_v16 = vsel %vm44_vm0, %v43_v15, 0.0 }
  0x8b   :  { %49 = vadd.xlane.f32.xlu1 %v48_v16 }
 0x114   :  { %v47_v17 = vpop.xlane.xlu1 %46 }
 0x115   :  { %v52_v18 = vmul.f32 0.03125, %v47_v17 }
 0x117   :  { %v54_v19 = vsub.f32 %v42_v10, %v52_v18 }
 0x118   :  { %v50_v20 = vpop.xlane.xlu1 %49 }
 0x119   :  { %v53_v21 = vmul.f32 0.03125, %v50_v20  ;;  %v56_v22 = vmul.f32 %v54_v19, %v54_v19 }
 0x11b   :  { %v55_v23 = vsub.f32 %v43_v15, %v53_v21  ;;  %v58_v24 = vsel %vm44_vm0, %v56_v22, 0.0 }
 0x11c   :  { %59 = vadd.xlane.f32.xlu0 %v58_v24 }
 0x11d   :  { %v57_v25 = vmul.f32 %v55_v23, %v55_v23 }
 0x11f   :  { %v61_v26 = vsel %vm44_vm0, %v57_v25, 0.0 }
 0x120   :  { %62 = vadd.xlane.f32.xlu1 %v61_v26 }
 0x1a9   :  { %v60_v27 = vpop.xlane.xlu0 %59 }
 0x1aa   :  { %v64_v28 = vmul.f32 0.03125, %v60_v27 }
 0x1ac   :  { %v66_v29 = vadd.f32 1e-05, %v64_v28 }
 0x1ad   :  { %v63_v30 = vpop.xlane.xlu1 %62 }
 0x1ae   :  { %121 = vrsqrt.f32 %v66_v29  ;;  %v65_v31 = vmul.f32 0.03125, %v63_v30 }
 0x1b0   :  { %v67_v32 = vadd.f32 1e-05, %v65_v31 }
 0x1b2   :  { %123 = vrsqrt.f32 %v67_v32 }
 0x1b8   :  { %v122_v33 = vpop.eup %121 }
 0x1b9   :  { %v70_v35 = vmul.f32 %v122_v33, %v54_v19 }
 0x1bb   :  { %v79_v37 = vmul.f32 %v105_v34, %v70_v35 }
 0x1bc   :  { %v124_v38 = vpop.eup %123 }
 0x1bd   :  { %v88_v39 = vadd.f32 %v106_v36, %v79_v37  ;;  %v71_v40 = vmul.f32 %v124_v38, %v55_v23 }
 0x1bf   :  { %v109_v41 = vpack.c.bf16 %v88_v39, %v88_v39  ;;  %v80_v42 = vmul.f32 %v105_v34, %v71_v40 }
 0x1c1   :  { %99 = vst.msk [vmem:[%s189_s5] sm:$0xf] %vm98_vm1, %v109_v41  ;;  %v89_v43 = vadd.f32 %v106_v36, %v80_v42 }
 0x1c3   :  { %v110_v44 = vpack.c.bf16 %v89_v43, %v89_v43 }
 0x1c5   :  { %100 = vst.msk [vmem:[%s189_s5 + $0x4] sm:$0xf] %vm98_vm1, %v110_v44 }

// kernel: _lambda_.33
= control target key start
LH: loop header
LB: loop body
LE: loop exit
PB: predicated region body
PF: predicated region fallthrough
CT: control target
= control target key end

     0   :  { %v375_v0 = vmov 0   ;;  %v376_v3 = vmov 0.0   ;;  %vm377_vm0 = vmmov 0   ;;  %v378_v9 = vmov 839922192   ;;  %s501_s1 = inlined_call_operand.vmem [shape: f32[16,1], index: 1, kind: input, shape index: {}]   ;;  %s502_s2 = inlined_call_operand.vmem [shape: bf16[32,32], index: 2, kind: input, shape index: {}]   ;;  %s503_s3 = inlined_call_operand.vmem [shape: bf16[32,32], index: 3, kind: input, shape index: {}]   ;;  %s504_s4 = inlined_call_operand.vmem [shape: bf16[32,32], index: 4, kind: input, shape index: {}]   ;;  %s505_s0 = inlined_call_operand.vmem [shape: bf16[16,32], index: 0, kind: input, shape index: {}]   ;;  %s506_s5 = inlined_call_operand.vmem [shape: f32[1,32], index: 5, kind: input, shape index: {}, may-alias: {5,6,7}]   ;;  %s507_s6 = inlined_call_operand.vmem [shape: f32[1,32], index: 6, kind: input, shape index: {}, may-alias: {5,6,7}]   ;;  %s508_s8 = inlined_call_operand.vmem [shape: bf16[16,32], index: 8, kind: output, shape index: {0}]   ;;  %s509_s9 = inlined_call_operand.vmem [shape: bf16[16,32], index: 9, kind: output, shape index: {1}]   ;;  %s510_s7 = inlined_call_operand.vmem [shape: f32[1,32], index: 7, kind: input, shape index: {}, may-alias: {5,6,7}]   ;;  %s511_s10 = inlined_call_operand.vmem [shape: bf16[16,32], index: 10, kind: output, shape index: {2}]  }
   0x1   :  { %368 = vset.pattern.permute.xlu0 %v375_v0  ;;  %v35_v1 = vld [vmem:[%s501_s1] sm:$0xff]  ;;  %v36_v2 = vld [vmem:[%s501_s1 + $0x8] sm:$0xff]  ;;  %339 = vmatprep.subr.bf16.mxu0 %v376_v3  ;;  %v44_v10 = vunpack.c.l.s4 %v378_v9  ;;  %v46_v11 = vlaneseq  ;;  %v379_v12 = vmov 1985246804   ;;  %vm89_vm1 = vcmask 261120  }
   0x2   :  { %v37_v4 = vpack.c.bf16 %v36_v2, %v35_v1  ;;  %v369_v5 = vld [vmem:[%s502_s2] sm:$0xff]   ;;  %347 = vmatprep.subr.bf16.mxu1 %v376_v3  ;;  %v371_v7 = vld [vmem:[%s502_s2 + $0x8] sm:$0xff]   ;;  %343 = vmatprep.mubr.msk.bf16.mxu0 %vm377_vm0, %v376_v3  ;;  %v51_v13 = vunpack.c.l.s4 %v379_v12  ;;  %vm142_vm2 = vcmask 257024  }
   0x3   :  { %v370_v6 = vld [vmem:[%s503_s3] sm:$0xff]   ;;  %340 = vmatpush3.bf16.msra.mxu0 %v369_v5  ;;  %v372_v8 = vld [vmem:[%s503_s3 + $0x8] sm:$0xff]   ;;  %351 = vmatprep.mubr.msk.bf16.mxu1 %vm377_vm0, %v376_v3  ;;  %v45_v14 = vunpack.c.0.s8 %v44_v10  ;;  %v47_v15 = vshrl.u32 %v46_v11, 7 }
   0x4   :  { %40 = vperm.xlu0 %368, %v37_v4   ;;  %348 = vmatpush3.bf16.msra.mxu1 %v370_v6  ;;  %v52_v16 = vunpack.c.0.s8 %v51_v13  ;;  %v33_v20 = vld [vmem:[%s505_s0] sm:$0xf]  ;;  %v34_v21 = vld [vmem:[%s505_s0 + $0x4] sm:$0xf]  ;;  %v374_v28 = vld [vmem:[%s504_s4 + $0x8] sm:$0xff]  }
   0x5   :  { %341 = vmatprep.subr.bf16.mxu0 %v376_v3  ;;  %349 = vmatprep.subr.bf16.mxu1 %v376_v3  ;;  %v48_v17 = vsub.s32 %v45_v14, %v47_v15  ;;  %v373_v26 = vld [vmem:[%s504_s4] sm:$0xff]  }
   0x6   :  { %v55_v18 = vsub.s32 %v52_v16, %v47_v15  ;;  %v305_v29 = vld [vmem:[%s506_s5] ss:$0 sm:$0xff] }
   0x7   :  { %342 = vmatpush3.bf16.msra.mxu0 %v371_v7  ;;  %v312_v30 = vld [vmem:[%s507_s6] ss:$0 sm:$0xff] }
   0x8   :  { %350 = vmatpush3.bf16.msra.mxu1 %v372_v8  ;;  %355 = vmatprep.subr.bf16.mxu0 %v376_v3  ;;  %v318_v47 = vld [vmem:[%s510_s7] ss:$0 sm:$0xff] }
  0x83   :  { %v41_v19 = vpop.permute.xlu0 %40 }
  0x84   :  { %v49_v22 = vrot.slane %v41_v19, %v48_v17  ;;  %v56_v23 = vrot.slane %v41_v19, %v55_v18 }
  0x86   :  { %v59_v24 = vmul.bf16 %v49_v22, %v33_v20  ;;  %v60_v25 = vmul.bf16 %v56_v23, %v34_v21 }
  0x88   :  { %v306_v27 = vcombine.low %v59_v24, %v60_v25 }
  0x8a   :  { %344 = vmatmul.mubr.msk.bf16.vlgmr.msra.gmra.mrb[0].mxu0 %vm89_vm1, %v306_v27  ;;  %352 = vmatmul.mubr.msk.bf16.vlgmr.msra.gmra.mrb[0].mxu1 %vm89_vm1, %v306_v27 }
  0x8b   :  { %356 = vmatpush3.bf16.msra.mxu0 %v373_v26  ;;  %359 = vmatprep.mubr.msk.bf16.mxu0 %vm377_vm0, %v376_v3 }
  0x8c   :  { %357 = vmatprep.subr.bf16.mxu0 %v376_v3 }
  0x8f   :  { %358 = vmatpush3.bf16.msra.mxu0 %v374_v28 }
  0x92   :  { %360 = vmatmul.mubr.msk.bf16.vlgmr.msra.gmra.mrb[4].mxu0 %vm89_vm1, %v306_v27 }
 0x15d   :  { %v127_v31 = vpop.f32.mrb[0].mxu0  ;;  %v202_v32 = vpop.f32.mrb[0].mxu1 }
 0x15e   :  { %v128_v33 = vadd.f32 %v305_v29, %v127_v31  ;;  %v203_v34 = vadd.f32 %v312_v30, %v202_v32  ;;  %v345_v35 = vpop.f32.mrb[1].mxu0  ;;  %v353_v36 = vpop.f32.mrb[1].mxu1 }
 0x15f   :  { %v130_v37 = vpop.f32.mrb[2].mxu0  ;;  %v205_v38 = vpop.f32.mrb[2].mxu1 }
 0x160   :  { %v324_v39 = vpack.c.bf16 %v128_v33, %v128_v33  ;;  %v326_v40 = vpack.c.bf16 %v203_v34, %v203_v34  ;;  %v131_v41 = vadd.f32 %v305_v29, %v130_v37  ;;  %v206_v42 = vadd.f32 %v312_v30, %v205_v38  ;;  %v346_v43 = vpop.f32.mrb[3].mxu0  ;;  %v354_v44 = vpop.f32.mrb[3].mxu1 }
 0x162   :  { %143 = vst.msk [vmem:[%s508_s8] sm:$0xf] %vm142_vm2, %v324_v39  ;;  %217 = vst.msk [vmem:[%s509_s9] sm:$0xf] %vm142_vm2, %v326_v40  ;;  %v325_v45 = vpack.c.bf16 %v131_v41, %v131_v41  ;;  %v327_v46 = vpack.c.bf16 %v206_v42, %v206_v42 }
 0x164   :  { %144 = vst.msk [vmem:[%s508_s8 + $0x4] sm:$0xf] %vm142_vm2, %v325_v45  ;;  %218 = vst.msk [vmem:[%s509_s9 + $0x4] sm:$0xf] %vm142_vm2, %v327_v46 }
 0x165   :  { %v276_v48 = vpop.f32.mrb[4].mxu0 }
 0x166   :  { %v277_v49 = vadd.f32 %v318_v47, %v276_v48  ;;  %v361_v50 = vpop.f32.mrb[5].mxu0 }
 0x167   :  { %v279_v51 = vpop.f32.mrb[6].mxu0 }
 0x168   :  { %v328_v52 = vpack.c.bf16 %v277_v49, %v277_v49  ;;  %v280_v53 = vadd.f32 %v318_v47, %v279_v51  ;;  %v362_v54 = vpop.f32.mrb[7].mxu0 }
 0x16a   :  { %291 = vst.msk [vmem:[%s511_s10] sm:$0xf] %vm142_vm2, %v328_v52  ;;  %v329_v55 = vpack.c.bf16 %v280_v53, %v280_v53 }
 0x16c   :  { %292 = vst.msk [vmem:[%s511_s10 + $0x4] sm:$0xf] %vm142_vm2, %v329_v55 }

// kernel: _lambda_.42
= control target key start
LH: loop header
LB: loop body
LE: loop exit
PB: predicated region body
PF: predicated region fallthrough
CT: control target
= control target key end

     0   :  { %v237_v0 = vmov 0.0   ;;  %vm238_vm0 = vmmov 0   ;;  %vm53_vm1 = vcmask 261120   ;;  %vm106_vm2 = vcmask 257024   ;;  %s311_s1 = inlined_call_operand.vmem [shape: bf16[32,32], index: 1, kind: input, shape index: {}]   ;;  %s312_s2 = inlined_call_operand.vmem [shape: bf16[32,32], index: 2, kind: input, shape index: {}]   ;;  %s313_s0 = inlined_call_operand.vmem [shape: bf16[16,32], index: 0, kind: input, shape index: {}]   ;;  %s314_s3 = inlined_call_operand.vmem [shape: f32[1,32], index: 3, kind: input, shape index: {}, may-alias: {3,4}]   ;;  %s315_s4 = inlined_call_operand.vmem [shape: f32[1,32], index: 4, kind: input, shape index: {}, may-alias: {3,4}]   ;;  %s316_s5 = inlined_call_operand.vmem [shape: bf16[16,32], index: 5, kind: output, shape index: {0}]   ;;  %s317_s6 = inlined_call_operand.vmem [shape: bf16[16,32], index: 6, kind: output, shape index: {1}]  }
   0x1   :  { %214 = vmatprep.subr.bf16.mxu0 %v237_v0  ;;  %222 = vmatprep.subr.bf16.mxu1 %v237_v0  ;;  %v232_v1 = vld [vmem:[%s311_s1] sm:$0xff]   ;;  %v234_v3 = vld [vmem:[%s311_s1 + $0x8] sm:$0xff]  }
   0x2   :  { %v233_v2 = vld [vmem:[%s312_s2] sm:$0xff]   ;;  %218 = vmatprep.mubr.msk.bf16.mxu0 %vm238_vm0, %v237_v0  ;;  %226 = vmatprep.mubr.msk.bf16.mxu1 %vm238_vm0, %v237_v0  ;;  %v235_v4 = vld [vmem:[%s312_s2 + $0x8] sm:$0xff]  }
   0x3   :  { %215 = vmatpush3.bf16.msra.mxu0 %v232_v1  ;;  %223 = vmatpush3.bf16.msra.mxu1 %v233_v2  ;;  %v236_v5 = vld [vmem:[%s313_s0] sm:$0xff]  }
   0x4   :  { %216 = vmatprep.subr.bf16.mxu0 %v237_v0  ;;  %224 = vmatprep.subr.bf16.mxu1 %v237_v0  ;;  %v191_v6 = vld [vmem:[%s314_s3] ss:$0 sm:$0xff] }
   0x5   :  { %v198_v7 = vld [vmem:[%s315_s4] ss:$0 sm:$0xff] }
   0x7   :  { %217 = vmatpush3.bf16.msra.mxu0 %v234_v3  ;;  %225 = vmatpush3.bf16.msra.mxu1 %v235_v4 }
   0xa   :  { %219 = vmatmul.mubr.msk.bf16.vlgmr.msra.gmra.mrb[0].mxu0 %vm53_vm1, %v236_v5  ;;  %227 = vmatmul.mubr.msk.bf16.vlgmr.msra.gmra.mrb[0].mxu1 %vm53_vm1, %v236_v5 }
  0xdd   :  { %v91_v8 = vpop.f32.mrb[0].mxu0  ;;  %v166_v10 = vpop.f32.mrb[0].mxu1 }
  0xde   :  { %v92_v9 = vadd.f32 %v191_v6, %v91_v8  ;;  %v220_v11 = vpop.f32.mrb[1].mxu0  ;;  %v167_v12 = vadd.f32 %v198_v7, %v166_v10  ;;  %v228_v13 = vpop.f32.mrb[1].mxu1 }
  0xdf   :  { %v94_v14 = vpop.f32.mrb[2].mxu0  ;;  %v169_v17 = vpop.f32.mrb[2].mxu1 }
  0xe0   :  { %v204_v15 = vpack.c.bf16 %v92_v9, %v92_v9  ;;  %v95_v16 = vadd.f32 %v191_v6, %v94_v14  ;;  %v221_v18 = vpop.f32.mrb[3].mxu0  ;;  %v206_v19 = vpack.c.bf16 %v167_v12, %v167_v12  ;;  %v170_v20 = vadd.f32 %v198_v7, %v169_v17  ;;  %v229_v21 = vpop.f32.mrb[3].mxu1 }
  0xe2   :  { %107 = vst.msk [vmem:[%s316_s5] sm:$0xf] %vm106_vm2, %v204_v15  ;;  %v205_v22 = vpack.c.bf16 %v95_v16, %v95_v16  ;;  %181 = vst.msk [vmem:[%s317_s6] sm:$0xf] %vm106_vm2, %v206_v19  ;;  %v207_v23 = vpack.c.bf16 %v170_v20, %v170_v20 }
  0xe4   :  { %108 = vst.msk [vmem:[%s316_s5 + $0x4] sm:$0xf] %vm106_vm2, %v205_v22  ;;  %182 = vst.msk [vmem:[%s317_s6 + $0x4] sm:$0xf] %vm106_vm2, %v207_v23 }

// kernel: _lambda_.41
= control target key start
LH: loop header
LB: loop body
LE: loop exit
PB: predicated region body
PF: predicated region fallthrough
CT: control target
= control target key end

     0   :  { %v130_v0 = vmov 0.0   ;;  %vm131_vm0 = vmmov 0   ;;  %vm45_vm1 = vcmask 261120   ;;  %vm98_vm2 = vcmask 257024   ;;  %s170_s1 = inlined_call_operand.vmem [shape: bf16[32,32], index: 1, kind: input, shape index: {}]   ;;  %s171_s0 = inlined_call_operand.vmem [shape: bf16[16,32], index: 0, kind: input, shape index: {}]   ;;  %s172_s2 = inlined_call_operand.vmem [shape: f32[1,32], index: 2, kind: input, shape index: {}]   ;;  %s173_s3 = inlined_call_operand.vmem [shape: bf16[16,32], index: 3, kind: output, shape index: {}]  }
   0x1   :  { %117 = vmatprep.subr.bf16.mxu0 %v130_v0  ;;  %v127_v1 = vld [vmem:[%s170_s1] sm:$0xff]   ;;  %121 = vmatprep.mubr.msk.bf16.mxu0 %vm131_vm0, %v130_v0  ;;  %v128_v2 = vld [vmem:[%s170_s1 + $0x8] sm:$0xff]  }
   0x2   :  { %118 = vmatpush3.bf16.msra.mxu0 %v127_v1  ;;  %v129_v3 = vld [vmem:[%s171_s0] sm:$0xff]  }
   0x3   :  { %119 = vmatprep.subr.bf16.mxu0 %v130_v0  ;;  %v105_v4 = vld [vmem:[%s172_s2] ss:$0 sm:$0xff] }
   0x6   :  { %120 = vmatpush3.bf16.msra.mxu0 %v128_v2 }
   0x9   :  { %122 = vmatmul.mubr.msk.bf16.vlgmr.msra.gmra.mrb[0].mxu0 %vm45_vm1, %v129_v3 }
  0xdc   :  { %v83_v5 = vpop.f32.mrb[0].mxu0 }
  0xdd   :  { %v84_v6 = vadd.f32 %v105_v4, %v83_v5  ;;  %v123_v7 = vpop.f32.mrb[1].mxu0 }
  0xde   :  { %v86_v8 = vpop.f32.mrb[2].mxu0 }
  0xdf   :  { %v112_v9 = vpack.c.bf16 %v84_v6, %v84_v6  ;;  %v87_v10 = vadd.f32 %v105_v4, %v86_v8  ;;  %v124_v11 = vpop.f32.mrb[3].mxu0 }
  0xe1   :  { %99 = vst.msk [vmem:[%s173_s3] sm:$0xf] %vm98_vm2, %v112_v9  ;;  %v113_v12 = vpack.c.bf16 %v87_v10, %v87_v10 }
  0xe3   :  { %100 = vst.msk [vmem:[%s173_s3 + $0x4] sm:$0xf] %vm98_vm2, %v113_v12 }

// kernel: _lambda_.55
= control target key start
LH: loop header
LB: loop body
LE: loop exit
PB: predicated region body
PF: predicated region fallthrough
CT: control target
= control target key end

     0   :  { %s202_s0 = inlined_call_operand.vmem [shape: bf16[16,32], index: 0, kind: input, shape index: {}]   ;;  %s203_s1 = inlined_call_operand.vmem [shape: bf16[16,32], index: 1, kind: input, shape index: {}]   ;;  %s204_s2 = inlined_call_operand.vmem [shape: f32[1,32], index: 2, kind: input, shape index: {}]   ;;  %s205_s3 = inlined_call_operand.vmem [shape: f32[1,32], index: 3, kind: input, shape index: {}]   ;;  %s206_s4 = inlined_call_operand.hbm [shape: bf16[16,32], index: 4, kind: output, shape index: {}]  }
   0x1   :  { %v108_v0 = vld [vmem:[%s202_s0] sm:$0xff]  }
   0x2   :  { %v112_v1 = vld [vmem:[%s203_s1] sm:$0xff]  }
   0x3   :  { %9 = vsyncpa [#allocation3], 0  ;;  %v109_v2 = vunpack.c.l.bf16 %v108_v0  ;;  %v113_v3 = vunpack.c.l.bf16 %v112_v1  ;;  %v110_v4 = vunpack.c.h.bf16 %v108_v0  ;;  %v114_v5 = vunpack.c.h.bf16 %v112_v1  ;;  %v101_v27 = vld [vmem:[%s204_s2] ss:$0 sm:$0xff]  ;;  %s146_s21 = smov [#allocation2]  }
   0x4   :  { %vm28_vm0 = vcmask 261120   ;;  %v102_v29 = vld [vmem:[%s205_s3] ss:$0 sm:$0xff]  ;;  %vm82_vm1 = vcmask 257024   ;;  %s90_s22 = sshll.u32 %s146_s21, 4  ;;  %s91_s22 = int_to_ptr.vmem [resolvable:$true] %s90_s22 }
   0x5   :  { %v26_v6 = vadd.f32 %v113_v3, %v109_v2  ;;  %v27_v7 = vadd.f32 %v114_v5, %v110_v4  ;;  %s122_s2 = scalar_lea.vmem %s91_s22, 128  ;;  %p127_p1 = scmp.lt.s32.totalorder %s91_s22, %s91_s22 }
   0x6   :  { %p123_p0 = scmp.ne.s32.totalorder %s91_s22, %s122_s2  ;;  %p128_p2 = scmp.lt.s32.totalorder %s122_s2, %s122_s2 }
   0x7   :  { %v29_v8 = vsel %vm28_vm0, %v26_v6, 0.0  ;;  %v32_v9 = vsel %vm28_vm0, %v27_v7, 0.0 }
   0x8   :  { %30 = vadd.xlane.f32.xlu0 %v29_v8  ;;  %p129_p3 = por %p128_p2, %p127_p1 }
   0xa   :  { %p130_p4 = pnand %p129_p3, %p123_p0 }
   0xc   :  { %33 = vadd.xlane.f32.xlu0 %v32_v9 }
  0x95   :  { %v31_v10 = vpop.xlane.xlu0 %30 }
  0x96   :  { %v36_v11 = vmul.f32 0.03125, %v31_v10 }
  0x98   :  { %v38_v12 = vsub.f32 %v26_v6, %v36_v11 }
  0x99   :  { %v34_v13 = vpop.xlane.xlu0 %33 }
  0x9a   :  { %v37_v14 = vmul.f32 0.03125, %v34_v13  ;;  %v40_v15 = vmul.f32 %v38_v12, %v38_v12 }
  0x9c   :  { %v39_v16 = vsub.f32 %v27_v7, %v37_v14  ;;  %v42_v17 = vsel %vm28_vm0, %v40_v15, 0.0 }
  0x9d   :  { %43 = vadd.xlane.f32.xlu1 %v42_v17 }
  0x9e   :  { %v41_v18 = vmul.f32 %v39_v16, %v39_v16 }
  0xa0   :  { %v45_v19 = vsel %vm28_vm0, %v41_v18, 0.0 }
  0xa1   :  { %46 = vadd.xlane.f32.xlu1 %v45_v19 }
 0x12a   :  { %v44_v20 = vpop.xlane.xlu1 %43 }
 0x12b   :  { %v48_v21 = vmul.f32 0.03125, %v44_v20 }
 0x12d   :  { %v50_v22 = vadd.f32 1e-05, %v48_v21 }
 0x12e   :  { %v47_v23 = vpop.xlane.xlu1 %46 }
 0x12f   :  { %118 = vrsqrt.f32 %v50_v22  ;;  %v49_v24 = vmul.f32 0.03125, %v47_v23 }
 0x131   :  { %v51_v25 = vadd.f32 1e-05, %v49_v24 }
 0x133   :  { %120 = vrsqrt.f32 %v51_v25 }
 0x139   :  { %v119_v26 = vpop.eup %118 }
 0x13a   :  { %v54_v28 = vmul.f32 %v119_v26, %v38_v12 }
 0x13c   :  { %v63_v30 = vmul.f32 %v101_v27, %v54_v28 }
 0x13d   :  { %v121_v31 = vpop.eup %120 }
 0x13e   :  { %v55_v32 = vmul.f32 %v121_v31, %v39_v16  ;;  %v72_v33 = vadd.f32 %v102_v29, %v63_v30 }
 0x140   :  { %v64_v34 = vmul.f32 %v101_v27, %v55_v32  ;;  %v105_v35 = vpack.c.bf16 %v72_v33, %v72_v33 }
 0x142   :  { %v73_v36 = vadd.f32 %v102_v29, %v64_v34  ;;  %83 = vst.msk [vmem:[#allocation2] sm:$0xf] %vm82_vm1, %v105_v35 }
 0x144   :  { %v106_v37 = vpack.c.bf16 %v73_v36, %v73_v36 }
 0x146   :  { %84 = vst.msk [vmem:[#allocation2 + $0x4] sm:$0xf] %vm82_vm1, %v106_v37 }
 0x147   :  { %133 = shalt.err (!%p130_p4)
}
 0x148   :  { %s134_s24 = scalar_lea.hbm %s206_s4, 128 }
 0x149   :  { %p135_p5 = scmp.ne.s32.totalorder %s206_s4, %s134_s24  ;;  %p138_p6 = scmp.lt.u32.totalorder %s134_s24, %s206_s4 }
 0x14b   :  { %p140_p7 = pnand %p138_p6, %p135_p5 }
 0x14d   :  { %143 = shalt.err (!%p140_p7)
}
 0x14e   :  { %s147_s29 = smov 64   ;;  %s148_s30 = smov 4  }
 0x14f   :  { %96 = dma.vmem_to_hbm [thread:$0]  %s91_s22, 128, %s206_s4, [#allocation3], %s147_s29, %s147_s29, %s148_s30  }
 0x150   :  { %144 = dma.done.wait [#allocation3], 128  }
 0x151   :  { %145 = vsyncadd [#allocation3], 4294967168 }
 0x152   :  { %100 = vsyncpa [#allocation3], 1 }

// kernel: _lambda_.39
= control target key start
LH: loop header
LB: loop body
LE: loop exit
PB: predicated region body
PF: predicated region fallthrough
CT: control target
= control target key end

     0   :  { %s1277_s21 = smov 0   ;;  %s1279_s22 = smov 0   ;;  %s1419_s0 = inlined_call_operand.vmem [shape: bf16[2,8,32], index: 0, kind: input, shape index: {}]   ;;  %s1420_s1 = inlined_call_operand.vmem [shape: bf16[2,8,32], index: 1, kind: input, shape index: {}]   ;;  %s1421_s2 = inlined_call_operand.vmem [shape: bf16[2,8,32], index: 2, kind: input, shape index: {}]   ;;  %s1422_s3 = inlined_call_operand.vmem [shape: f32[2,1,8], index: 3, kind: input, shape index: {}]   ;;  %s1423_s4 = inlined_call_operand.vmem [shape: bf16[32,32], index: 4, kind: input, shape index: {}]   ;;  %s1424_s5 = inlined_call_operand.vmem [shape: f32[1,32], index: 5, kind: input, shape index: {}]   ;;  %s1425_s6 = inlined_call_operand.vmem [shape: bf16[2,8,32], index: 6, kind: output, shape index: {}]  }
   0x1   :  { %s1281_s23 = smov 0  }
   0x2 LB: > { %s28_s24 = sadd.s32 1, %s1227_s22  ;;  %p1040_p0 = scmp.ge.s32.totalorder %s1231_s23, 1  ;;  %s1231_s23 = sphi %s1281_s23, %s16_s23   ;;  %s1227_s22 = sphi %s1279_s22, %s1427_s22   ;;  %s1223_s21 = sphi %s1277_s21, %s1426_s21  }
   0x3   : > { %p30_p1 = scmp.ge.s32.totalorder %s28_s24, 2  ;;  %p256_p2 = scmp.lt.s32.totalorder %s1231_s23, 3 }
   0x5   : > { %s1429_s24 = smov (%p30_p1, %s28_s24), 0  ;;  %p257_p3 = pnand %p1040_p0, %p256_p2 }
   0x6   : > { %p301_p4 = scmp.lt.s32.totalorder (!%p257_p3), %s1223_s21, 1  ;;  %v1233_v0 = vmov (!%p257_p3), 0.0   ;;  %vm1234_vm0 = vmmov (!%p257_p3), 0   ;;  %vm348_vm1 = vcmask (!%p257_p3), 64512   ;;  %v331_v4 = vlaneseq (!%p257_p3)  ;;  %s1236_s11 = smov (!%p257_p3), 120  }
   0x7   : > { %260 = sbr.rel (%p257_p3) target bundleno = 1705 (0x6a9), region = 44  ;;  %1093 = vmatprep.subr.bf16.mxu0 (!%p257_p3), %v1233_v0  ;;  %1095 = vmatprep.mubr.msk.bf16.mxu0 (!%p257_p3), %vm1234_vm0, %v1233_v0  ;;  %v1235_v8 = vmov (!%p257_p3), -1e+30   ;;  %s1237_s12 = smov (!%p257_p3), 112   ;;  %vm412_vm4 = vcmask (!%p257_p3), 1043456   ;;  %vm457_vm5 = vcmask (!%p257_p3), 60416  }
   0x8   : > { %1099 = vmatprep.subr.bf16.mxu1 (!%p257_p3), %v1233_v0  ;;  %1101 = vmatprep.mubr.msk.bf16.mxu1 (!%p257_p3), %vm1234_vm0, %v1233_v0  ;;  %v332_v6 = vshrl.u32 (!%p257_p3), %v331_v4, 7  ;;  %v336_v10 = vand.u32 (!%p257_p3), 127, %v331_v4  ;;  %s1238_s13 = smov (!%p257_p3), 104   ;;  %s1239_s17 = smov (!%p257_p3), 8   ;;  %vm590_vm6 = vcmask (!%p257_p3), 126016   ;;  %vm723_vm7 = vcmask (!%p257_p3), 191616  }
   0x9   : > { %s1240_s18 = smov (!%p257_p3), 16   ;;  %s1241_s27 = smov (!%p257_p3), 24   ;;  %vm856_vm8 = vcmask (!%p257_p3), 257216   ;;  %vm882_vm9 = vcmask (!%p257_p3), 261120   ;;  %vm927_vm10 = vcmask (!%p257_p3), 257024  }
   0xa   : > { %v341_v7 = vsub.s32 (!%p257_p3), 0, %v332_v6  ;;  %vm337_vm3 = vcmp.le.s32.totalorder (!%p257_p3), %v336_v10, %v332_v6 }
   0xe   : > { %s1431_s21 = smov (!%p301_p4, %s1223_s21), 1 }
   0xf   : > { %s1301_s25 = sshll.u32 %s1431_s21, 2  ;;  %s318_s10 = scalar_lea.vmem %s1422_s3, %s1431_s21 }
  0x10   : > { %s1307_s28 = scalar_lea.vmem %s1420_s1, %s1301_s25  ;;  %s1314_s7 = scalar_lea.vmem %s1419_s0, %s1301_s25  ;;  %v327_v5 = vld [vmem:[%s318_s10] sm:$0x1] }
  0x11   : > { %v346_v1 = vld [vmem:[%s1307_s28] sm:$0xf]  ;;  %vm328_vm2 = vcmp.gt.f32.partialorder %v327_v5, 0.0  ;;  %s1344_s16 = scalar_lea.vmem %s1421_s2, %s1301_s25  ;;  %s325_s8 = scalar_lea.vmem %s1425_s6, %s1301_s25 }
  0x12   : > { %v353_v2 = vsel %vm348_vm1, %v346_v1, 0  ;;  %v345_v3 = vld [vmem:[%s1314_s7] sm:$0xf]  ;;  %v329_v9 = vsel %vm328_vm2, 0.0, %v1235_v8 }
  0x13   : > { %1094 = vmatpush3.bf16.xpose.msra.mxu0 %v353_v2  ;;  %v342_v11 = vrot.slane %v329_v9, %v341_v7  ;;  %v1182_v20 = vld [vmem:[%s1307_s28] ss:$0 sps:$4 sm:$0xff]  }
  0x14   : > { %1111 = vmatprep.subr.bf16.mxu0 %v1233_v0  ;;  %470 = vrot.lane.b32.xlu1 %v1182_v20, %s1236_s11  ;;  %v1183_v21 = vld [vmem:[%s1314_s7] ss:$0 sps:$4 sm:$0xff]  }
  0x15   : > { %v1325_v13 = vsel %vm337_vm3, %v342_v11, -1e+30  ;;  %v1185_v22 = vld [vmem:[%s1314_s7] ss:$0 sps:$4 sm:$0xff]  }
  0x16   : > { %v1186_v23 = vld [vmem:[%s1307_s28] ss:$0 sps:$4 sm:$0xff]  }
  0x17   : > { %v1187_v24 = vld [vmem:[%s1314_s7] ss:$0 sps:$4 sm:$0xff]  }
  0x18   : > { %465 = vrot.lane.b32.xlu1 %v1183_v21, %s1236_s11  ;;  %v347_v30 = vld [vmem:[%s1344_s16] sm:$0xf] }
  0x19   : > { %v414_v31 = vsel %vm412_vm4, %v347_v30, 0  ;;  %v1184_v32 = vld [vmem:[%s1307_s28] ss:$0 sps:$4 sm:$0xff]  }
  0x1a   : > { %1096 = vmatmul.mubr.msk.bf16.vlgmr.msra.gmra.mrb[0].mxu0 %vm348_vm1, %v345_v3  ;;  %1100 = vmatpush3.bf16.msra.mxu1 %v414_v31  ;;  %v1189_v20 = vld [vmem:[%s1344_s16] ss:$0 sps:$4 sm:$0xff]  }
  0x1b   : > { %1113 = vmatprep.mubr.msk.bf16.mxu0 %vm1234_vm0, %v1233_v0  ;;  %1105 = vmatprep.subr.bf16.mxu1 %v1233_v0 }
  0x1c   : > { %598 = vrot.lane.b32.xlu1 %v1185_v22, %s1237_s12 }
  0x20   : > { %736 = vrot.lane.b32.xlu1 %v1186_v23, %s1238_s13 }
  0x24   : > { %731 = vrot.lane.b32.xlu1 %v1187_v24, %s1238_s13 }
  0x86   : > { %v471_v35 = vpop.permute.xlu1 %470 }
  0x87   : > { %v476_v37 = vsel %vm348_vm1, %v471_v35, 0 }
  0x8a   : > { %v466_v39 = vpop.permute.xlu1 %465 }
  0x8e   : > { %v599_v41 = vpop.permute.xlu1 %598 }
  0x92   : > { %v737_v43 = vpop.permute.xlu1 %736 }
  0x93   : > { %v742_v44 = vsel %vm348_vm1, %v737_v43, 0 }
  0x96   : > { %v732_v45 = vpop.permute.xlu1 %731 }
  0xed   : > { %v389_v12 = vpop.f32.mrb[0].mxu0 }
  0xee   : > { %v395_v14 = vmul.f32 0.35355338, %v389_v12  ;;  %v1097_v15 = vpop.f32.mrb[1].mxu0 }
  0xef   : > { %v392_v16 = vpop.f32.mrb[2].mxu0 }
  0xf0   : > { %v1098_v17 = vpop.f32.mrb[3].mxu0  ;;  %v396_v18 = vadd.f32 %v395_v14, %v1325_v13 }
  0xf2   : > { %v397_v19 = vsel %vm348_vm1, %v396_v18, -inf }
  0xf3   : > { %398 = vmax.xlane.f32.xlu0 %v397_v19  ;;  %v1188_v19 = vld [vmem:[%s1344_s16] ss:$0 sps:$4 sm:$0xff]  }
 0x180   : > { %v399_v25 = vpop.xlane.xlu0 %398 }
 0x181   : > { %v400_v26 = vsub.f32 %v396_v18, %v399_v25 }
 0x183   : > { %v401_v27 = vmul.f32 1.442695, %v400_v26  ;;  %v1190_v26 = vld [vmem:[%s1344_s16] ss:$0 sps:$4 sm:$0xff]  }
 0x185   : > { %1193 = vpow2.f32 %v401_v27 }
 0x18f   : > { %v1194_v28 = vpop.eup %1193 }
 0x190   : > { %v403_v29 = vsel %vm348_vm1, %v1194_v28, 0.0 }
 0x191   : > { %404 = vadd.xlane.f32.xlu0 %v403_v29 }
 0x1a7   : > { %603 = vrot.lane.b32.xlu0 %v1184_v32, %s1237_s12 }
 0x21e   : > { %v405_v33 = vpop.xlane.xlu0 %404 }
 0x21f   : > { %1195 = vrcp.f32 %v405_v33 }
 0x222   : > { %v604_v40 = vpop.permute.xlu0 %603 }
 0x223   : > { %v609_v42 = vsel %vm348_vm1, %v604_v40, 0 }
 0x229   : > { %v1196_v34 = vpop.eup %1195 }
 0x22a   : > { %v407_v36 = vmul.f32 %v1196_v34, %v1194_v28 }
 0x22c   : > { %v408_v38 = vpack.c.bf16 %v407_v36, %v407_v36 }
 0x22e   : > { %1102 = vmatmul.mubr.msk.bf16.vlgmr.msra.gmra.mrb[0].mxu1 %vm348_vm1, %v408_v38 }
 0x22f   : > { %1106 = vmatpush3.bf16.xpose.msra.mxu1 %v476_v37  ;;  %1107 = vmatprep.mubr.msk.bf16.mxu1 %vm1234_vm0, %v1233_v0 }
 0x230   : > { %1117 = vmatprep.subr.bf16.mxu1 %v1233_v0 }
 0x236   : > { %1108 = vmatmul.mubr.msk.bf16.vlgmr.msra.gmra.mrb[4].mxu1 %vm348_vm1, %v466_v39 }
 0x237   : > { %1118 = vmatpush3.bf16.xpose.msra.mxu1 %v609_v42  ;;  %1119 = vmatprep.mubr.msk.bf16.mxu1 %vm1234_vm0, %v1233_v0 }
 0x238   : > { %1129 = vmatprep.subr.bf16.mxu1 %v1233_v0 }
 0x23e   : > { %1120 = vmatmul.mubr.msk.bf16.vlgmr.msra.gmra.mrb[8].mxu1 %vm348_vm1, %v599_v41 }
 0x23f   : > { %1130 = vmatpush3.bf16.xpose.msra.mxu1 %v742_v44  ;;  %1131 = vmatprep.mubr.msk.bf16.mxu1 %vm1234_vm0, %v1233_v0 }
 0x240   : > { %1141 = vmatprep.subr.bf16.mxu1 %v1233_v0 }
 0x246   : > { %1132 = vmatmul.mubr.msk.bf16.vlgmr.msra.gmra.mrb[12].mxu1 %vm348_vm1, %v732_v45 }
 0x247   : > { %1145 = vmatprep.mubr.msk.bf16.mxu1 %vm1234_vm0, %v1233_v0 }
 0x301   : > { %v450_v46 = vpop.f32.mrb[0].mxu1 }
 0x302   : > { %v456_v47 = vpack.c.bf16 %v450_v46, %v450_v46  ;;  %v1103_v48 = vpop.f32.mrb[1].mxu1 }
 0x303   : > { %v453_v49 = vpop.f32.mrb[2].mxu1 }
 0x304   : > { %458 = vst.msk [vmem:[#allocation2] sm:$0xf] %vm457_vm5, %v456_v47  ;;  %v1104_v50 = vpop.f32.mrb[3].mxu1 }
 0x309   : > { %v512_v51 = vpop.f32.mrb[4].mxu1 }
 0x30a   : > { %v518_v52 = vmul.f32 0.35355338, %v512_v51  ;;  %v1109_v53 = vpop.f32.mrb[5].mxu1 }
 0x30b   : > { %v515_v54 = vpop.f32.mrb[6].mxu1 }
 0x30c   : > { %v1110_v55 = vpop.f32.mrb[7].mxu1  ;;  %v519_v56 = vadd.f32 %v518_v52, %v1325_v13 }
 0x30d   : > { %v1191_v55 = vld [vmem:[%s1423_s4] sm:$0xff]  }
 0x30e   : > { %v520_v57 = vsel %vm348_vm1, %v519_v56, -inf  ;;  %1142 = vmatpush3.bf16.msra.mxu1 %v1191_v55 }
 0x30f   : > { %521 = vmax.xlane.f32.xlu1 %v520_v57  ;;  %1143 = vmatprep.subr.bf16.mxu1 %v1233_v0 }
 0x311   : > { %v645_v58 = vpop.f32.mrb[8].mxu1 }
 0x312   : > { %v651_v59 = vmul.f32 0.35355338, %v645_v58  ;;  %v1121_v60 = vpop.f32.mrb[9].mxu1 }
 0x313   : > { %v648_v61 = vpop.f32.mrb[10].mxu1 }
 0x314   : > { %v652_v62 = vadd.f32 %v651_v59, %v1325_v13  ;;  %v1122_v63 = vpop.f32.mrb[11].mxu1 }
 0x316   : > { %v653_v1 = vsel %vm348_vm1, %v652_v62, -inf }
 0x317   : > { %654 = vmax.xlane.f32.xlu0 %v653_v1 }
 0x319   : > { %v778_v2 = vpop.f32.mrb[12].mxu1 }
 0x31a   : > { %v784_v3 = vmul.f32 0.35355338, %v778_v2  ;;  %v1133_v4 = vpop.f32.mrb[13].mxu1  ;;  %v1065_v2 = vld [vmem:[%s1424_s5] ss:$0 sm:$0xff] }
 0x31b   : > { %v781_v5 = vpop.f32.mrb[14].mxu1 }
 0x31c   : > { %v785_v6 = vadd.f32 %v784_v3, %v1325_v13  ;;  %v1134_v7 = vpop.f32.mrb[15].mxu1 }
 0x31e   : > { %v786_v8 = vsel %vm348_vm1, %v785_v6, -inf }
 0x31f   : > { %787 = vmax.xlane.f32.xlu1 %v786_v8 }
 0x39c   : > { %v522_v9 = vpop.xlane.xlu1 %521 }
 0x39d   : > { %v523_v10 = vsub.f32 %v519_v56, %v522_v9  ;;  %v1192_v56 = vld [vmem:[%s1423_s4 + $0x8] sm:$0xff]  }
 0x39e   : > { %1144 = vmatpush3.bf16.msra.mxu1 %v1192_v56 }
 0x39f   : > { %v524_v11 = vmul.f32 1.442695, %v523_v10 }
 0x3a1   : > { %1197 = vpow2.f32 %v524_v11 }
 0x3a4   : > { %v655_v12 = vpop.xlane.xlu0 %654 }
 0x3a5   : > { %v656_v14 = vsub.f32 %v652_v62, %v655_v12 }
 0x3a7   : > { %v657_v15 = vmul.f32 1.442695, %v656_v14 }
 0x3a9   : > { %1199 = vpow2.f32 %v657_v15 }
 0x3ab   : > { %v1198_v16 = vpop.eup %1197 }
 0x3ac   : > { %v526_v17 = vsel %vm348_vm1, %v1198_v16, 0.0  ;;  %v788_v21 = vpop.xlane.xlu1 %787 }
 0x3ad   : > { %527 = vadd.xlane.f32.xlu1 %v526_v17  ;;  %v789_v22 = vsub.f32 %v785_v6, %v788_v21 }
 0x3af   : > { %v790_v23 = vmul.f32 1.442695, %v789_v22 }
 0x3b1   : > { %1201 = vpow2.f32 %v790_v23 }
 0x3b3   : > { %v1200_v13 = vpop.eup %1199 }
 0x3b4   : > { %v659_v18 = vsel %vm348_vm1, %v1200_v13, 0.0 }
 0x3b5   : > { %660 = vadd.xlane.f32.xlu0 %v659_v18 }
 0x3bb   : > { %v1202_v24 = vpop.eup %1201 }
 0x3bc   : > { %v792_v25 = vsel %vm348_vm1, %v1202_v24, 0.0 }
 0x3be   : > { %668 = vrot.lane.b32.xlu1 %v1188_v19, %s1237_s12 }
 0x3cb   : > { %535 = vrot.lane.b32.xlu0 %v1189_v20, %s1236_s11 }
 0x3e2   : > { %793 = vadd.xlane.f32.xlu1 %v792_v25 }
 0x3f3   : > { %801 = vrot.lane.b32.xlu1 %v1190_v26, %s1238_s13 }
 0x43a   : > { %v528_v27 = vpop.xlane.xlu1 %527 }
 0x43b   : > { %1203 = vrcp.f32 %v528_v27 }
 0x43e   : > { %v669_v33 = vpop.permute.xlu1 %668 }
 0x43f   : > { %v674_v35 = vsel %vm412_vm4, %v669_v33, 0 }
 0x442   : > { %v661_v28 = vpop.xlane.xlu0 %660 }
 0x443   : > { %1205 = vrcp.f32 %v661_v28 }
 0x445   : > { %v1204_v29 = vpop.eup %1203 }
 0x446   : > { %v530_v30 = vmul.f32 %v1204_v29, %v1198_v16  ;;  %v536_v31 = vpop.permute.xlu0 %535 }
 0x447   : > { %v541_v32 = vsel %vm412_vm4, %v536_v31, 0 }
 0x448   : > { %1112 = vmatpush3.bf16.msra.mxu0 %v541_v32  ;;  %v531_v34 = vpack.c.bf16 %v530_v30, %v530_v30 }
 0x449   : > { %1123 = vmatprep.subr.bf16.mxu0 %v1233_v0 }
 0x44b   : > { %1114 = vmatmul.mubr.msk.bf16.vlgmr.msra.gmra.mrb[4].mxu0 %vm348_vm1, %v531_v34 }
 0x44c   : > { %1124 = vmatpush3.bf16.msra.mxu0 %v674_v35  ;;  %1125 = vmatprep.mubr.msk.bf16.mxu0 %vm1234_vm0, %v1233_v0 }
 0x44d   : > { %v1206_v36 = vpop.eup %1205  ;;  %1135 = vmatprep.subr.bf16.mxu0 %v1233_v0 }
 0x44e   : > { %v663_v37 = vmul.f32 %v1206_v36, %v1200_v13 }
 0x450   : > { %v664_v38 = vpack.c.bf16 %v663_v37, %v663_v37 }
 0x453   : > { %1126 = vmatmul.mubr.msk.bf16.vlgmr.msra.gmra.mrb[8].mxu0 %vm348_vm1, %v664_v38 }
 0x454   : > { %1137 = vmatprep.mubr.msk.bf16.mxu0 %vm1234_vm0, %v1233_v0 }
 0x46f   : > { %v794_v39 = vpop.xlane.xlu1 %793 }
 0x470   : > { %1207 = vrcp.f32 %v794_v39 }
 0x473   : > { %v802_v40 = vpop.permute.xlu1 %801 }
 0x474   : > { %v807_v41 = vsel %vm412_vm4, %v802_v40, 0 }
 0x475   : > { %1136 = vmatpush3.bf16.msra.mxu0 %v807_v41 }
 0x47a   : > { %v1208_v42 = vpop.eup %1207 }
 0x47b   : > { %v796_v43 = vmul.f32 %v1208_v42, %v1202_v24 }
 0x47d   : > { %v797_v44 = vpack.c.bf16 %v796_v43, %v796_v43 }
 0x47f   : > { %1138 = vmatmul.mubr.msk.bf16.vlgmr.msra.gmra.mrb[12].mxu0 %vm348_vm1, %v797_v44 }
 0x51e   : > { %v577_v45 = vpop.f32.mrb[4].mxu0 }
 0x51f   : > { %v1071_v46 = vpack.c.bf16 %v577_v45, %v577_v45  ;;  %v1115_v47 = vpop.f32.mrb[5].mxu0 }
 0x520   : > { %v580_v48 = vpop.f32.mrb[6].mxu0 }
 0x521   : > { %587 = vrot.lane.b32.xlu0 %v1071_v46, %s1239_s17  ;;  %v1116_v49 = vpop.f32.mrb[7].mxu0 }
 0x526   : > { %v710_v50 = vpop.f32.mrb[8].mxu0 }
 0x527   : > { %v1072_v51 = vpack.c.bf16 %v710_v50, %v710_v50  ;;  %v1127_v52 = vpop.f32.mrb[9].mxu0 }
 0x528   : > { %v713_v53 = vpop.f32.mrb[10].mxu0 }
 0x529   : > { %720 = vrot.lane.b32.xlu1 %v1072_v51, %s1240_s18  ;;  %v1128_v54 = vpop.f32.mrb[11].mxu0 }
 0x552   : > { %v843_v57 = vpop.f32.mrb[12].mxu0 }
 0x553   : > { %v1073_v58 = vpack.c.bf16 %v843_v57, %v843_v57  ;;  %v1139_v59 = vpop.f32.mrb[13].mxu0 }
 0x554   : > { %v846_v60 = vpop.f32.mrb[14].mxu0 }
 0x555   : > { %853 = vrot.lane.b32.xlu0 %v1073_v58, %s1241_s27  ;;  %v1140_v61 = vpop.f32.mrb[15].mxu0 }
 0x593   : > { %v588_v62 = vpop.permute.xlu0 %587 }
 0x594   : > { %591 = vst.msk [vmem:[#allocation2] sm:$0xf] %vm590_vm6, %v588_v62 }
 0x59b   : > { %v721_v63 = vpop.permute.xlu1 %720 }
 0x59c   : > { %724 = vst.msk [vmem:[#allocation2] sm:$0xf] %vm723_vm7, %v721_v63 }
 0x5c7   : > { %v854_v1 = vpop.permute.xlu0 %853 }
 0x5c8   : > { %857 = vst.msk [vmem:[#allocation2] sm:$0xf] %vm856_vm8, %v854_v1 }
 0x5cf   : > { %v858_v0 = vld [vmem:[#allocation2] sm:$0xf] }
 0x5d0   : > { %1146 = vmatmul.mubr.msk.bf16.vlgmr.msra.gmra.mrb[16].mxu1 %vm882_vm9, %v858_v0 }
 0x6a3   : > { %v920_v3 = vpop.f32.mrb[16].mxu1 }
 0x6a4   : > { %v921_v4 = vadd.f32 %v1065_v2, %v920_v3  ;;  %v1147_v5 = vpop.f32.mrb[17].mxu1 }
 0x6a5   : > { %v923_v6 = vpop.f32.mrb[18].mxu1 }
 0x6a6   : > { %v926_v7 = vpack.c.bf16 %v921_v4, %v921_v4  ;;  %v1148_v8 = vpop.f32.mrb[19].mxu1 }
 0x6a8   : > { %928 = vst.msk [vmem:[%s325_s8] sm:$0xf] %vm927_vm10, %v926_v7 }
 0x6a9 PF: > { %s16_s23 = sadd.s32 1, %s1231_s23   ;;  %s1426_s21 = smov %s1227_s22 }
 0x6aa   : > { %p13_p5 = scmp.ge.s32.totalorder %s16_s23, 4   ;;  %s1427_s22 = smov %s1429_s24 }
 0x6ac   :  { %15 = sbr.rel (!%p13_p5) target bundleno = 2 (0x2), region = 83 }

</bundles_post_ra>
